<compile_context>
chip_gen: v7x
topology: tpu7x:2x2x1
jax: 0.10.0
libtpu: 0.0.40
codegen_flags: <defaults>
</compile_context>

<pallas_src>
import functools
from typing import NamedTuple

import jax
import jax.numpy as jnp
from jax.experimental import pallas as pl
from jax.experimental.pallas import tpu as pltpu

LN_EPS = 1e-5
TILE_TARGET = 512                    # 512-1024 per perf review; 512 is safe everywhere
RESIDENT_CAP = 16 * 1024 * 1024      # per resident feature operand (x2 for buffering)
VMEM_CAP = 56 * 1024 * 1024          # stay under v7x's 64 MiB physical VMEM


def _round_up(x, m):
    return ((x + m - 1) // m) * m


def _silu(x):
    return x * jax.nn.sigmoid(x)


def _layernorm_padded(x, gamma, beta, c_real):
    # Single-pass LayerNorm over the lane-padded channel axis.  Padded lanes of
    # x / gamma / beta are zero, so dividing lane sums by the *real* channel
    # count reproduces unpadded statistics; padded output lanes come out zero.
    inv_c = 1.0 / float(c_real)
    mu = jnp.sum(x, axis=-1, keepdims=True) * inv_c
    ex2 = jnp.sum(x * x, axis=-1, keepdims=True) * inv_c
    var = jnp.maximum(ex2 - mu * mu, 0.0)      # guard E[x^2]-mu^2 cancellation
    return (x - mu) * jax.lax.rsqrt(var + LN_EPS) * gamma + beta


# --------------------------- phase 1: clause update ---------------------------
def _cls_update_kernel(adj_ref, h_lit_ref, h_cls_ref, inv_deg_ref,
                       wc1_ref, bc1_ref, wc2_ref, bc2_ref, g_ref, b_ref,
                       out_f32_ref, out_bf16_ref, acc_ref,
                       *, c_real, k_tile, feat_resident):
    k = pl.program_id(1)

    @pl.when(k == 0)
    def _():
        acc_ref[...] = jnp.zeros_like(acc_ref)

    if feat_resident:
        start = pl.multiple_of(k * k_tile, 128)
        feat = h_lit_ref[pl.ds(start, k_tile), :]   # resident in VMEM, sliced per k
    else:
        feat = h_lit_ref[...]                        # streamed per k step

    # accumulate adj @ h_lit over literal tiles (bf16 operands, f32 accumulate)
    acc_ref[...] += jnp.dot(adj_ref[...], feat, preferred_element_type=jnp.float32)

    @pl.when(k == pl.num_programs(1) - 1)
    def _():
        h_cls = h_cls_ref[...]                       # f32 residual copy
        agg = acc_ref[...] * inv_deg_ref[...]        # 'mean' reduce
        # cls_up first layer: single fused K=2*Cpad MXU pass on concat([h_cls, agg])
        z = jnp.concatenate([h_cls.astype(jnp.bfloat16),
                             agg.astype(jnp.bfloat16)], axis=-1)
        u = jnp.dot(z, wc1_ref[...], preferred_element_type=jnp.float32) + bc1_ref[...]
        u = _silu(u)                                 # Dropout (eval mode): identity
        v = jnp.dot(u.astype(jnp.bfloat16), wc2_ref[...],
                    preferred_element_type=jnp.float32) + bc2_ref[...]
        y = _layernorm_padded(h_cls + v, g_ref[...], b_ref[...], c_real)
        out_f32_ref[...] = y
        out_bf16_ref[...] = y.astype(jnp.bfloat16)   # consumed directly by phase 2


# --------------------------- phase 2: literal update --------------------------
def _lit_update_kernel(adjT_ref, h_cls_ref, h_lit_ref, inv_deg_ref,
                       wl1_ref, bl1_ref, wl2_ref, bl2_ref, g_ref, b_ref,
                       out_ref, acc_ref, *, c_real, k_tile, feat_resident):
    k = pl.program_id(1)

    @pl.when(k == 0)
    def _():
        acc_ref[...] = jnp.zeros_like(acc_ref)

    if feat_resident:
        start = pl.multiple_of(k * k_tile, 128)
        feat = h_cls_ref[pl.ds(start, k_tile), :]
    else:
        feat = h_cls_ref[...]

    # adj.T was materialized once per graph -> plain row-major matmul, no in-loop
    # transpose / dim-0 dot_general contraction.
    acc_ref[...] += jnp.dot(adjT_ref[...], feat, preferred_element_type=jnp.float32)

    @pl.when(k == pl.num_programs(1) - 1)
    def _():
        h_lit = h_lit_ref[...]                       # f32 residual copy
        agg = acc_ref[...] * inv_deg_ref[...]

        # flip_lit_emb: swap rows (2m, 2m+1).  Tile row count is a multiple of 128
        # (even), so +/- pairs never straddle a tile boundary.
        n_rows = h_lit.shape[0]
        rolled_down = pltpu.roll(h_lit, shift=n_rows - 1, axis=0)   # out[i] = x[i+1]
        rolled_up = pltpu.roll(h_lit, shift=1, axis=0)              # out[i] = x[i-1]
        row_ids = jax.lax.broadcasted_iota(jnp.int32, h_lit.shape, 0)
        h_flip = jnp.where(row_ids % 2 == 0, rolled_down, rolled_up)

        # lit_up first layer: single fused K=3*Cpad MXU pass
        z = jnp.concatenate([h_lit.astype(jnp.bfloat16),
                             h_flip.astype(jnp.bfloat16),
                             agg.astype(jnp.bfloat16)], axis=-1)
        u = jnp.dot(z, wl1_ref[...], preferred_element_type=jnp.float32) + bl1_ref[...]
        u = _silu(u)
        v = jnp.dot(u.astype(jnp.bfloat16), wl2_ref[...],
                    preferred_element_type=jnp.float32) + bl2_ref[...]
        out_ref[...] = _layernorm_padded(h_lit + v, g_ref[...], b_ref[...], c_real)


# --------------------------- once-per-graph / per-model prep ------------------
class GNNMeta(NamedTuple):
    n_lit: int
    n_cls: int
    c: int
    cpad: int
    tl: int
    tc: int
    n_lit_p: int
    n_cls_p: int
    lit_resident: bool
    cls_resident: bool
    vmem_limit: int


def _pick_tile(n_aligned_128, target=TILE_TARGET):
    t = min(target, n_aligned_128)
    # Keep >= 2 tiles along the axis when possible so v7x megacore ("parallel"
    # row axis) has work on both TensorCores; never drop below 128 because both
    # adj dims ride a lane axis in one of the two phases.
    if n_aligned_128 // t < 2 and n_aligned_128 >= 256:
        t = _round_up(n_aligned_128 // 2, 128)
    return t


def preprocess_graph(adj, channels, tile_target=TILE_TARGET):
    """Once-per-graph: degrees, padding, bf16 cast, adj.T.  Reuse across layers."""
    n_cls, n_lit = adj.shape
    assert n_lit % 2 == 0, "literals must come in +/- pairs"
    c = channels
    f32, bf16 = jnp.float32, jnp.bfloat16

    cpad = _round_up(c, 128)
    tl = _pick_tile(_round_up(n_lit, 128), tile_target)
    tc = _pick_tile(_round_up(n_cls, 128), tile_target)
    n_lit_p = _round_up(n_lit, tl)
    n_cls_p = _round_up(n_cls, tc)

    lit_resident = n_lit_p * cpad * 2 <= RESIDENT_CAP
    cls_resident = n_cls_p * cpad * 2 <= RESIDENT_CAP

    # Rough VMEM footprint (x2 for double-buffered pipelined operands).
    def est(resident, n_p, t_row, t_red):
        adj_tile = t_row * t_red * 2 * 2
        feat = (n_p * cpad * 2 * 2) if resident else (t_red * cpad * 2 * 2)
        rows = t_row * cpad * (4 + 4 + 2 + 4) * 2      # h_in f32, out f32, out bf16, acc
        weights = (3 * cpad * cpad + cpad * cpad) * 2 + 8 * cpad * 4
        return adj_tile + feat + rows + weights
    need = max(est(lit_resident, n_lit_p, tc, tl), est(cls_resident, n_cls_p, tl, tc))
    vmem_limit = int(min(max(need + (8 << 20), 32 << 20), VMEM_CAP))

    adj_f = adj.astype(f32)
    # 'mean' reduce: reciprocal degrees; rows with 0 neighbors -> 0 aggregate
    inv_deg_cls = 1.0 / jnp.maximum(jnp.sum(adj_f, axis=1, keepdims=True), 1.0)
    inv_deg_lit = 1.0 / jnp.maximum(jnp.sum(adj_f, axis=0)[:, None], 1.0)

    adj_p = jnp.pad(adj_f, ((0, n_cls_p - n_cls), (0, n_lit_p - n_lit))).astype(bf16)
    adjT_p = jnp.asarray(adj_p.T)                      # materialized once per graph

    graph = dict(
        adj=adj_p,
        adjT=adjT_p,
        inv_deg_cls=jnp.pad(inv_deg_cls, ((0, n_cls_p - n_cls), (0, 0))),
        inv_deg_lit=jnp.pad(inv_deg_lit, ((0, n_lit_p - n_lit), (0, 0))),
    )
    meta = GNNMeta(n_lit, n_cls, c, cpad, tl, tc, n_lit_p, n_cls_p,
                   lit_resident, cls_resident, vmem_limit)
    return graph, meta


def prepare_params(params, meta):
    """Once-per-model: pad weights to lane width, fuse first-layer K-concat, bf16."""
    c, cpad = meta.c, meta.cpad
    f32, bf16 = jnp.float32, jnp.bfloat16

    def pad_w(w):
        return jnp.pad(w.astype(f32), ((0, cpad - c), (0, cpad - c)))

    def pad_v(v):
        return jnp.pad(v.astype(f32), ((0, 0), (0, cpad - c)))

    wc1 = jnp.concatenate([pad_w(params["wc1_h"]), pad_w(params["wc1_a"])],
                          axis=0).astype(bf16)                      # (2*Cpad, Cpad)
    wl1 = jnp.concatenate([pad_w(params["wl1_s"]), pad_w(params["wl1_f"]),
                           pad_w(params["wl1_a"])], axis=0).astype(bf16)  # (3*Cpad, Cpad)
    return dict(
        wc1=wc1, bc1=pad_v(params["bc1"]),
        wc2=pad_w(params["wc2"]).astype(bf16), bc2=pad_v(params["bc2"]),
        g_cls=pad_v(params["g_cls"]), b_cls=pad_v(params["b_cls"]),
        wl1=wl1, bl1=pad_v(params["bl1"]),
        wl2=pad_w(params["wl2"]).astype(bf16), bl2=pad_v(params["bl2"]),
        g_lit=pad_v(params["g_lit"]), b_lit=pad_v(params["b_lit"]),
    )


# --------------------------------- layer --------------------------------------
@functools.partial(jax.jit, static_argnames=("meta",))
def gnn_layer(h_lit, h_cls, graph, wp, meta):
    """One GNN layer.  graph/meta from preprocess_graph, wp from prepare_params."""
    m = meta
    f32, bf16 = jnp.float32, jnp.bfloat16

    # TODO(synk): when stacking layers, keep the lane-padded (N, cpad) layout and
    # bf16 activations between layers instead of padding/slicing per call.
    h_lit_p = jnp.pad(h_lit.astype(f32), ((0, m.n_lit_p - m.n_lit), (0, m.cpad - m.c)))
    h_cls_p = jnp.pad(h_cls.astype(f32), ((0, m.n_cls_p - m.n_cls), (0, m.cpad - m.c)))
    h_lit_bf = h_lit_p.astype(bf16)

    cparams = pltpu.CompilerParams(
        dimension_semantics=("parallel", "arbitrary"),
        vmem_limit_bytes=m.vmem_limit,
    )
    w1c_spec = pl.BlockSpec((2 * m.cpad, m.cpad), lambda i, k: (0, 0))
    w1l_spec = pl.BlockSpec((3 * m.cpad, m.cpad), lambda i, k: (0, 0))
    w_spec = pl.BlockSpec((m.cpad, m.cpad), lambda i, k: (0, 0))
    v_spec = pl.BlockSpec((1, m.cpad), lambda i, k: (0, 0))

    # reduction-side feature operand: resident in VMEM when it fits, else per-k tiles
    if m.lit_resident:
        lit_feat_spec = pl.BlockSpec((m.n_lit_p, m.cpad), lambda i, k: (0, 0))
    else:
        lit_feat_spec = pl.BlockSpec((m.tl, m.cpad), lambda i, k: (k, 0))
    if m.cls_resident:
        cls_feat_spec = pl.BlockSpec((m.n_cls_p, m.cpad), lambda i, k: (0, 0))
    else:
        cls_feat_spec = pl.BlockSpec((m.tc, m.cpad), lambda i, k: (k, 0))

    cost1 = pl.CostEstimate(
        flops=2 * m.n_cls_p * m.n_lit_p * m.cpad
              + 2 * m.n_cls_p * (2 * m.cpad) * m.cpad
              + 2 * m.n_cls_p * m.cpad * m.cpad,
        transcendentals=m.n_cls_p * m.cpad,
        bytes_accessed=m.n_cls_p * m.n_lit_p * 2
              + m.n_lit_p * m.cpad * 2 * (1 if m.lit_resident else m.n_cls_p // m.tc)
              + m.n_cls_p * m.cpad * (4 + 4 + 2),
    )
    cost2 = pl.CostEstimate(
        flops=2 * m.n_lit_p * m.n_cls_p * m.cpad
              + 2 * m.n_lit_p * (3 * m.cpad) * m.cpad
              + 2 * m.n_lit_p * m.cpad * m.cpad,
        transcendentals=m.n_lit_p * m.cpad,
        bytes_accessed=m.n_lit_p * m.n_cls_p * 2
              + m.n_cls_p * m.cpad * 2 * (1 if m.cls_resident else m.n_lit_p // m.tl)
              + m.n_lit_p * m.cpad * (4 + 4),
    )

    # ---- phase 1: clause update (grid: clause rows x literal reduction) ----
    h_cls_new_p, h_cls_new_bf = pl.pallas_call(
        functools.partial(_cls_update_kernel, c_real=m.c, k_tile=m.tl,
                          feat_resident=m.lit_resident),
        out_shape=(jax.ShapeDtypeStruct((m.n_cls_p, m.cpad), f32),
                   jax.ShapeDtypeStruct((m.n_cls_p, m.cpad), bf16)),
        grid_spec=pltpu.PrefetchScalarGridSpec(
            num_scalar_prefetch=0,
            grid=(m.n_cls_p // m.tc, m.n_lit_p // m.tl),
            in_specs=[
                pl.BlockSpec((m.tc, m.tl), lambda i, k: (i, k)),     # adj tile
                lit_feat_spec,                                        # h_lit (bf16)
                pl.BlockSpec((m.tc, m.cpad), lambda i, k: (i, 0)),   # h_cls (f32)
                pl.BlockSpec((m.tc, 1), lambda i, k: (i, 0)),        # 1/deg_cls
                w1c_spec, v_spec, w_spec, v_spec, v_spec, v_spec,
            ],
            out_specs=[pl.BlockSpec((m.tc, m.cpad), lambda i, k: (i, 0)),
                       pl.BlockSpec((m.tc, m.cpad), lambda i, k: (i, 0))],
            scratch_shapes=[pltpu.VMEM((m.tc, m.cpad), f32)],
        ),
        compiler_params=cparams,
        cost_estimate=cost1,
    )(graph["adj"], h_lit_bf, h_cls_p, graph["inv_deg_cls"],
      wp["wc1"], wp["bc1"], wp["wc2"], wp["bc2"], wp["g_cls"], wp["b_cls"])

    # ---- phase 2: literal update (grid: literal rows x clause reduction) ----
    h_lit_new_p = pl.pallas_call(
        functools.partial(_lit_update_kernel, c_real=m.c, k_tile=m.tc,
                          feat_resident=m.cls_resident),
        out_shape=jax.ShapeDtypeStruct((m.n_lit_p, m.cpad), f32),
        grid_spec=pltpu.PrefetchScalarGridSpec(
            num_scalar_prefetch=0,
            grid=(m.n_lit_p // m.tl, m.n_cls_p // m.tc),
            in_specs=[
                pl.BlockSpec((m.tl, m.tc), lambda i, k: (i, k)),     # adj.T tile
                cls_feat_spec,                                        # h_cls_new (bf16)
                pl.BlockSpec((m.tl, m.cpad), lambda i, k: (i, 0)),   # h_lit (f32)
                pl.BlockSpec((m.tl, 1), lambda i, k: (i, 0)),        # 1/deg_lit
                w1l_spec, v_spec, w_spec, v_spec, v_spec, v_spec,
            ],
            out_specs=pl.BlockSpec((m.tl, m.cpad), lambda i, k: (i, 0)),
            scratch_shapes=[pltpu.VMEM((m.tl, m.cpad), f32)],
        ),
        compiler_params=cparams,
        cost_estimate=cost2,
    )(graph["adjT"], h_cls_new_bf, h_lit_p, graph["inv_deg_lit"],
      wp["wl1"], wp["bl1"], wp["wl2"], wp["bl2"], wp["g_lit"], wp["b_lit"])

    return h_lit_new_p[:m.n_lit, :m.c], h_cls_new_p[:m.n_cls, :m.c]


# ---------------- pure-JAX f32 reference for verification ----------------
def _ln_ref(x, gamma, beta):
    mu = jnp.mean(x, axis=-1, keepdims=True)
    var = jnp.mean((x - mu) ** 2, axis=-1, keepdims=True)
    return (x - mu) * jax.lax.rsqrt(var + LN_EPS) * gamma + beta


def gnn_layer_ref(h_lit, h_cls, adj, params):
    adj = adj.astype(jnp.float32)
    deg_cls = jnp.maximum(jnp.sum(adj, axis=1, keepdims=True), 1.0)
    deg_lit = jnp.maximum(jnp.sum(adj, axis=0)[:, None], 1.0)

    agg_cls = (adj @ h_lit) / deg_cls
    u = h_cls @ params["wc1_h"] + agg_cls @ params["wc1_a"] + params["bc1"]
    u = u * jax.nn.sigmoid(u)
    h_cls_new = _ln_ref(h_cls + (u @ params["wc2"] + params["bc2"]),
                        params["g_cls"], params["b_cls"])

    h_flip = h_lit.reshape(-1, 2, h_lit.shape[-1])[:, ::-1, :].reshape(h_lit.shape)
    agg_lit = (adj.T @ h_cls_new) / deg_lit
    u2 = (h_lit @ params["wl1_s"] + h_flip @ params["wl1_f"]
          + agg_lit @ params["wl1_a"] + params["bl1"])
    u2 = u2 * jax.nn.sigmoid(u2)
    h_lit_new = _ln_ref(h_lit + (u2 @ params["wl2"] + params["bl2"]),
                        params["g_lit"], params["b_lit"])
    return h_lit_new, h_cls_new


def init_params(key, channels):
    ks = jax.random.split(key, 11)
    s = 0.1
    f32 = jnp.float32
    return {
        # cls_up: Linear(2C->C) split along input dim, then Linear(C->C)
        "wc1_h": jax.random.normal(ks[0], (channels, channels), f32) * s,
        "wc1_a": jax.random.normal(ks[1], (channels, channels), f32) * s,
        "bc1": jax.random.normal(ks[2], (1, channels), f32) * s,
        "wc2": jax.random.normal(ks[3], (channels, channels), f32) * s,
        "bc2": jax.random.normal(ks[4], (1, channels), f32) * s,
        "g_cls": jnp.ones((1, channels), f32),
        "b_cls": jnp.zeros((1, channels), f32),
        # lit_up: Linear(3C->C) split along input dim, then Linear(C->C)
        "wl1_s": jax.random.normal(ks[5], (channels, channels), f32) * s,
        "wl1_f": jax.random.normal(ks[6], (channels, channels), f32) * s,
        "wl1_a": jax.random.normal(ks[7], (channels, channels), f32) * s,
        "bl1": jax.random.normal(ks[8], (1, channels), f32) * s,
        "wl2": jax.random.normal(ks[9], (channels, channels), f32) * s,
        "bl2": jax.random.normal(ks[10], (1, channels), f32) * s,
        "g_lit": jnp.ones((1, channels), f32),
        "b_lit": jnp.zeros((1, channels), f32),
    }


if __name__ == "__main__":
    key = jax.random.PRNGKey(0)
    k_lit, k_cls, k_adj, k_par = jax.random.split(key, 4)

    channels = 32          # padded to 128 lanes inside the wrapper
    n_lit = 384            # 192 variables -> 384 literals (even/odd pairs)
    n_cls = 48             # small clause count; still exercises tiled grids

    h_lit = jax.random.normal(k_lit, (n_lit, channels), jnp.float32)
    h_cls = jax.random.normal(k_cls, (n_cls, channels), jnp.float32)
    adj = jax.random.bernoulli(k_adj, 0.3, (n_cls, n_lit)).astype(jnp.float32)

    params = init_params(k_par, channels)

    # once-per-graph / once-per-model preprocessing (reused across layers)
    graph, meta = preprocess_graph(adj, channels)
    wp = prepare_params(params, meta)

    out_lit, out_cls = gnn_layer(h_lit, h_cls, graph, wp, meta=meta)
    jax.block_until_ready((out_lit, out_cls))

    ref_lit, ref_cls = gnn_layer_ref(h_lit, h_cls, adj, params)
    # bf16 matmul operands (f32 accumulation) vs. the all-f32 reference:
    # outputs are LayerNorm'd (O(1)), observed error is ~1e-2 worst case.
    assert out_lit.shape == ref_lit.shape and out_cls.shape == ref_cls.shape
    assert jnp.allclose(out_lit, ref_lit, atol=5e-2, rtol=5e-2)
    assert jnp.allclose(out_cls, ref_cls, atol=5e-2, rtol=5e-2)

    print("KERNEL_OK")
</pallas_src>

<mosaic_0001>
module attributes {stable_mosaic.version = 11 : i64} {
  func.func @_cls_update_kernel(%arg0: i32, %arg1: i32, %arg2: memref<128x256xbf16, #tpu.memory_space<vmem>>, %arg3: memref<512x128xbf16, #tpu.memory_space<vmem>>, %arg4: memref<128x128xf32, #tpu.memory_space<vmem>>, %arg5: memref<128x1xf32, #tpu.memory_space<vmem>>, %arg6: memref<256x128xbf16, #tpu.memory_space<vmem>>, %arg7: memref<1x128xf32, #tpu.memory_space<vmem>>, %arg8: memref<128x128xbf16, #tpu.memory_space<vmem>>, %arg9: memref<1x128xf32, #tpu.memory_space<vmem>>, %arg10: memref<1x128xf32, #tpu.memory_space<vmem>>, %arg11: memref<1x128xf32, #tpu.memory_space<vmem>>, %arg12: memref<128x128xf32, #tpu.memory_space<vmem>>, %arg13: memref<128x128xbf16, #tpu.memory_space<vmem>>, %arg14: memref<128x128xf32, #tpu.memory_space<vmem>>) attributes {dimension_semantics = [#tpu.dimension_semantics<parallel>, #tpu.dimension_semantics<arbitrary>], iteration_bounds = array<i64: 1, 2>, scalar_prefetch = 0 : i64, scratch_operands = 1 : i64, tpu.core_type = #tpu.core_type<tc>, window_params = [{transform_indices = @transform_0, window_bounds = array<i64: 128, 256>}, {pipeline_mode = #tpu.pipeline_mode<synchronous>, transform_indices = @transform_1, window_bounds = array<i64: 512, 128>}, {transform_indices = @transform_2, window_bounds = array<i64: 128, 128>}, {transform_indices = @transform_3, window_bounds = array<i64: 128, 1>}, {pipeline_mode = #tpu.pipeline_mode<synchronous>, transform_indices = @transform_4, window_bounds = array<i64: 256, 128>}, {pipeline_mode = #tpu.pipeline_mode<synchronous>, transform_indices = @transform_5, window_bounds = array<i64: 1, 128>}, {pipeline_mode = #tpu.pipeline_mode<synchronous>, transform_indices = @transform_6, window_bounds = array<i64: 128, 128>}, {pipeline_mode = #tpu.pipeline_mode<synchronous>, transform_indices = @transform_7, window_bounds = array<i64: 1, 128>}, {pipeline_mode = #tpu.pipeline_mode<synchronous>, transform_indices = @transform_8, window_bounds = array<i64: 1, 128>}, {pipeline_mode = #tpu.pipeline_mode<synchronous>, transform_indices = @transform_9, window_bounds = array<i64: 1, 128>}, {transform_indices = @transform_10, window_bounds = array<i64: 128, 128>}, {transform_indices = @transform_11, window_bounds = array<i64: 128, 128>}]} {
    %c0_i32 = arith.constant 0 : i32
    %0 = arith.cmpi eq, %arg1, %c0_i32 : i32
    %1 = arith.extui %0 : i1 to i32
    %c0_i32_0 = arith.constant 0 : i32
    %2 = arith.cmpi ne, %1, %c0_i32_0 : i32
    scf.if %2 {
      %cst_8 = arith.constant 0.000000e+00 : f32
      %15 = vector.broadcast %cst_8 : f32 to vector<128x128xf32>
      %c0_9 = arith.constant 0 : index
      %c0_10 = arith.constant 0 : index
      %16 = vector.load %arg14[%c0_9, %c0_10] : memref<128x128xf32, #tpu.memory_space<vmem>>, vector<128x128xf32>
      tpu.vector_store %arg14[%c0_9, %c0_10], %15 {strides = array<i32>} : memref<128x128xf32, #tpu.memory_space<vmem>>, vector<128x128xf32>,
    } else {
    }
    %c256_i32 = arith.constant 256 : i32
    %3 = arith.muli %arg1, %c256_i32 : i32
    %4 = tpu.assume_multiple %3, 128 : i32
    %5 = arith.index_cast %4 : i32 to index
    %c0 = arith.constant 0 : index
    %6 = vector.load %arg3[%5, %c0] : memref<512x128xbf16, #tpu.memory_space<vmem>>, vector<256x128xbf16>
    %c0_1 = arith.constant 0 : index
    %c0_2 = arith.constant 0 : index
    %7 = vector.load %arg14[%c0_1, %c0_2] : memref<128x128xf32, #tpu.memory_space<vmem>>, vector<128x128xf32>
    %c0_3 = arith.constant 0 : index
    %c0_4 = arith.constant 0 : index
    %8 = vector.load %arg2[%c0_3, %c0_4] : memref<128x256xbf16, #tpu.memory_space<vmem>>, vector<128x256xbf16>
    %cst = arith.constant dense<0.000000e+00> : vector<128x128xf32>
    %9 = tpu.matmul %8, %6, %cst {dimension_numbers = #tpu.dot_dimension_numbers<[1], [0], [0], [1], [0, 0, 1, 1], [], []>} : vector<128x256xbf16>, vector<256x128xbf16>, vector<128x128xf32> -> vector<128x128xf32>
    %10 = arith.addf %7, %9 : vector<128x128xf32>
    %c0_5 = arith.constant 0 : index
    %c0_6 = arith.constant 0 : index
    %11 = vector.load %arg14[%c0_5, %c0_6] : memref<128x128xf32, #tpu.memory_space<vmem>>, vector<128x128xf32>
    tpu.vector_store %arg14[%c0_5, %c0_6], %10 {strides = array<i32>} : memref<128x128xf32, #tpu.memory_space<vmem>>, vector<128x128xf32>,
    %c1_i32 = arith.constant 1 : i32
    %12 = arith.cmpi eq, %arg1, %c1_i32 : i32
    %13 = arith.extui %12 : i1 to i32
    %c0_i32_7 = arith.constant 0 : i32
    %14 = arith.cmpi ne, %13, %c0_i32_7 : i32
    scf.if %14 {
      %c0_8 = arith.constant 0 : index
      %c0_9 = arith.constant 0 : index
      %15 = vector.load %arg4[%c0_8, %c0_9] : memref<128x128xf32, #tpu.memory_space<vmem>>, vector<128x128xf32>
      %c0_10 = arith.constant 0 : index
      %c0_11 = arith.constant 0 : index
      %16 = vector.load %arg14[%c0_10, %c0_11] : memref<128x128xf32, #tpu.memory_space<vmem>>, vector<128x128xf32>
      %c0_12 = arith.constant 0 : index
      %c0_13 = arith.constant 0 : index
      %17 = vector.load %arg5[%c0_12, %c0_13] : memref<128x1xf32, #tpu.memory_space<vmem>>, vector<128x1xf32>
      %18 = vector.broadcast %17 : vector<128x1xf32> to vector<128x128xf32>
      %19 = arith.mulf %16, %18 : vector<128x128xf32>
      %20 = arith.truncf %15 : vector<128x128xf32> to vector<128x128xbf16>
      %21 = arith.truncf %19 : vector<128x128xf32> to vector<128x128xbf16>
      %22 = tpu.concatenate %20, %21 in 1 : vector<128x128xbf16>, vector<128x128xbf16> -> vector<128x256xbf16>
      %c0_14 = arith.constant 0 : index
      %c0_15 = arith.constant 0 : index
      %23 = vector.load %arg6[%c0_14, %c0_15] : memref<256x128xbf16, #tpu.memory_space<vmem>>, vector<256x128xbf16>
      %cst_16 = arith.constant dense<0.000000e+00> : vector<128x128xf32>
      %24 = tpu.matmul %22, %23, %cst_16 {dimension_numbers = #tpu.dot_dimension_numbers<[1], [0], [0], [1], [0, 0, 1, 1], [], []>} : vector<128x256xbf16>, vector<256x128xbf16>, vector<128x128xf32> -> vector<128x128xf32>
      %c0_17 = arith.constant 0 : index
      %c0_18 = arith.constant 0 : index
      %25 = vector.load %arg7[%c0_17, %c0_18] : memref<1x128xf32, #tpu.memory_space<vmem>>, vector<1x128xf32>
      %26 = vector.broadcast %25 : vector<1x128xf32> to vector<128x128xf32>
      %27 = arith.addf %24, %26 : vector<128x128xf32>
      %28 = arith.negf %27 : vector<128x128xf32>
      %29 = math.exp %28 : vector<128x128xf32>
      %cst_19 = arith.constant 1.000000e+00 : f32
      %30 = vector.broadcast %cst_19 : f32 to vector<128x128xf32>
      %31 = arith.addf %30, %29 : vector<128x128xf32>
      %32 = arith.divf %30, %31 : vector<128x128xf32>
      %33 = arith.mulf %27, %32 : vector<128x128xf32>
      %34 = arith.truncf %33 : vector<128x128xf32> to vector<128x128xbf16>
      %c0_20 = arith.constant 0 : index
      %c0_21 = arith.constant 0 : index
      %35 = vector.load %arg8[%c0_20, %c0_21] : memref<128x128xbf16, #tpu.memory_space<vmem>>, vector<128x128xbf16>
      %cst_22 = arith.constant dense<0.000000e+00> : vector<128x128xf32>
      %36 = tpu.matmul %34, %35, %cst_22 {dimension_numbers = #tpu.dot_dimension_numbers<[1], [0], [0], [1], [0, 0, 1, 1], [], []>} : vector<128x128xbf16>, vector<128x128xbf16>, vector<128x128xf32> -> vector<128x128xf32>
      %c0_23 = arith.constant 0 : index
      %c0_24 = arith.constant 0 : index
      %37 = vector.load %arg9[%c0_23, %c0_24] : memref<1x128xf32, #tpu.memory_space<vmem>>, vector<1x128xf32>
      %38 = vector.broadcast %37 : vector<1x128xf32> to vector<128x128xf32>
      %39 = arith.addf %36, %38 : vector<128x128xf32>
      %40 = arith.addf %15, %39 : vector<128x128xf32>
      %c0_25 = arith.constant 0 : index
      %c0_26 = arith.constant 0 : index
      %41 = vector.load %arg10[%c0_25, %c0_26] : memref<1x128xf32, #tpu.memory_space<vmem>>, vector<1x128xf32>
      %c0_27 = arith.constant 0 : index
      %c0_28 = arith.constant 0 : index
      %42 = vector.load %arg11[%c0_27, %c0_28] : memref<1x128xf32, #tpu.memory_space<vmem>>, vector<1x128xf32>
      %cst_29 = arith.constant dense<0.000000e+00> : vector<128xf32>
      %43 = vector.multi_reduction <add>, %40, %cst_29 [1] : vector<128x128xf32> to vector<128xf32>
      %44 = vector.shape_cast %43 : vector<128xf32> to vector<128x1xf32>
      %cst_30 = arith.constant 3.125000e-02 : f32
      %45 = vector.broadcast %cst_30 : f32 to vector<128x1xf32>
      %46 = arith.mulf %44, %45 : vector<128x1xf32>
      %47 = arith.mulf %40, %40 : vector<128x128xf32>
      %cst_31 = arith.constant dense<0.000000e+00> : vector<128xf32>
      %48 = vector.multi_reduction <add>, %47, %cst_31 [1] : vector<128x128xf32> to vector<128xf32>
      %49 = vector.shape_cast %48 : vector<128xf32> to vector<128x1xf32>
      %cst_32 = arith.constant 3.125000e-02 : f32
      %50 = vector.broadcast %cst_32 : f32 to vector<128x1xf32>
      %51 = arith.mulf %49, %50 : vector<128x1xf32>
      %52 = arith.mulf %46, %46 : vector<128x1xf32>
      %53 = arith.subf %51, %52 : vector<128x1xf32>
      %cst_33 = arith.constant 0.000000e+00 : f32
      %54 = vector.broadcast %cst_33 : f32 to vector<128x1xf32>
      %55 = arith.maximumf %53, %54 : vector<128x1xf32>
      %56 = vector.broadcast %46 : vector<128x1xf32> to vector<128x128xf32>
      %57 = arith.subf %40, %56 : vector<128x128xf32>
      %cst_34 = arith.constant 9.99999974E-6 : f32
      %58 = vector.broadcast %cst_34 : f32 to vector<128x1xf32>
      %59 = arith.addf %55, %58 : vector<128x1xf32>
      %60 = math.rsqrt %59 : vector<128x1xf32>
      %61 = vector.broadcast %60 : vector<128x1xf32> to vector<128x128xf32>
      %62 = arith.mulf %57, %61 : vector<128x128xf32>
      %63 = vector.broadcast %41 : vector<1x128xf32> to vector<128x128xf32>
      %64 = arith.mulf %62, %63 : vector<128x128xf32>
      %65 = vector.broadcast %42 : vector<1x128xf32> to vector<128x128xf32>
      %66 = arith.addf %64, %65 : vector<128x128xf32>
      %c0_35 = arith.constant 0 : index
      %c0_36 = arith.constant 0 : index
      %67 = vector.load %arg12[%c0_35, %c0_36] : memref<128x128xf32, #tpu.memory_space<vmem>>, vector<128x128xf32>
      tpu.vector_store %arg12[%c0_35, %c0_36], %66 {strides = array<i32>} : memref<128x128xf32, #tpu.memory_space<vmem>>, vector<128x128xf32>,
      %68 = arith.truncf %66 : vector<128x128xf32> to vector<128x128xbf16>
      %c0_37 = arith.constant 0 : index
      %c0_38 = arith.constant 0 : index
      %69 = vector.load %arg13[%c0_37, %c0_38] : memref<128x128xbf16, #tpu.memory_space<vmem>>, vector<128x128xbf16>
      tpu.vector_store %arg13[%c0_37, %c0_38], %68 {strides = array<i32>} : memref<128x128xbf16, #tpu.memory_space<vmem>>, vector<128x128xbf16>,
    } else {
    }
    return
  }
  func.func @transform_0(%arg0: i32, %arg1: i32) -> (i32, i32) {
    %c0_i32 = arith.constant 0 : i32
    return %arg0, %arg1 : i32, i32
  }
  func.func @transform_1(%arg0: i32, %arg1: i32) -> (i32, i32) {
    %c0_i32 = arith.constant 0 : i32
    %c0_i32_0 = arith.constant 0 : i32
    %c0_i32_1 = arith.constant 0 : i32
    return %c0_i32, %c0_i32_0 : i32, i32
  }
  func.func @transform_2(%arg0: i32, %arg1: i32) -> (i32, i32) {
    %c0_i32 = arith.constant 0 : i32
    %c0_i32_0 = arith.constant 0 : i32
    return %arg0, %c0_i32 : i32, i32
  }
  func.func @transform_3(%arg0: i32, %arg1: i32) -> (i32, i32) {
    %c0_i32 = arith.constant 0 : i32
    %c0_i32_0 = arith.constant 0 : i32
    return %arg0, %c0_i32 : i32, i32
  }
  func.func @transform_4(%arg0: i32, %arg1: i32) -> (i32, i32) {
    %c0_i32 = arith.constant 0 : i32
    %c0_i32_0 = arith.constant 0 : i32
    %c0_i32_1 = arith.constant 0 : i32
    return %c0_i32, %c0_i32_0 : i32, i32
  }
  func.func @transform_5(%arg0: i32, %arg1: i32) -> (i32, i32) {
    %c0_i32 = arith.constant 0 : i32
    %c0_i32_0 = arith.constant 0 : i32
    %c0_i32_1 = arith.constant 0 : i32
    return %c0_i32, %c0_i32_0 : i32, i32
  }
  func.func @transform_6(%arg0: i32, %arg1: i32) -> (i32, i32) {
    %c0_i32 = arith.constant 0 : i32
    %c0_i32_0 = arith.constant 0 : i32
    %c0_i32_1 = arith.constant 0 : i32
    return %c0_i32, %c0_i32_0 : i32, i32
  }
  func.func @transform_7(%arg0: i32, %arg1: i32) -> (i32, i32) {
    %c0_i32 = arith.constant 0 : i32
    %c0_i32_0 = arith.constant 0 : i32
    %c0_i32_1 = arith.constant 0 : i32
    return %c0_i32, %c0_i32_0 : i32, i32
  }
  func.func @transform_8(%arg0: i32, %arg1: i32) -> (i32, i32) {
    %c0_i32 = arith.constant 0 : i32
    %c0_i32_0 = arith.constant 0 : i32
    %c0_i32_1 = arith.constant 0 : i32
    return %c0_i32, %c0_i32_0 : i32, i32
  }
  func.func @transform_9(%arg0: i32, %arg1: i32) -> (i32, i32) {
    %c0_i32 = arith.constant 0 : i32
    %c0_i32_0 = arith.constant 0 : i32
    %c0_i32_1 = arith.constant 0 : i32
    return %c0_i32, %c0_i32_0 : i32, i32
  }
  func.func @transform_10(%arg0: i32, %arg1: i32) -> (i32, i32) {
    %c0_i32 = arith.constant 0 : i32
    %c0_i32_0 = arith.constant 0 : i32
    return %arg0, %c0_i32 : i32, i32
  }
  func.func @transform_11(%arg0: i32, %arg1: i32) -> (i32, i32) {
    %c0_i32 = arith.constant 0 : i32
    %c0_i32_0 = arith.constant 0 : i32
    return %arg0, %c0_i32 : i32, i32
  }
}

module attributes {stable_mosaic.version = 11 : i64} {
  func.func @_lit_update_kernel(%arg0: i32, %arg1: i32, %arg2: memref<256x128xbf16, #tpu.memory_space<vmem>>, %arg3: memref<128x128xbf16, #tpu.memory_space<vmem>>, %arg4: memref<256x128xf32, #tpu.memory_space<vmem>>, %arg5: memref<256x1xf32, #tpu.memory_space<vmem>>, %arg6: memref<384x128xbf16, #tpu.memory_space<vmem>>, %arg7: memref<1x128xf32, #tpu.memory_space<vmem>>, %arg8: memref<128x128xbf16, #tpu.memory_space<vmem>>, %arg9: memref<1x128xf32, #tpu.memory_space<vmem>>, %arg10: memref<1x128xf32, #tpu.memory_space<vmem>>, %arg11: memref<1x128xf32, #tpu.memory_space<vmem>>, %arg12: memref<256x128xf32, #tpu.memory_space<vmem>>, %arg13: memref<256x128xf32, #tpu.memory_space<vmem>>) attributes {dimension_semantics = [#tpu.dimension_semantics<parallel>, #tpu.dimension_semantics<arbitrary>], iteration_bounds = array<i64: 2, 1>, scalar_prefetch = 0 : i64, scratch_operands = 1 : i64, tpu.core_type = #tpu.core_type<tc>, window_params = [{transform_indices = @transform_0, window_bounds = array<i64: 256, 128>}, {pipeline_mode = #tpu.pipeline_mode<synchronous>, transform_indices = @transform_1, window_bounds = array<i64: 128, 128>}, {transform_indices = @transform_2, window_bounds = array<i64: 256, 128>}, {transform_indices = @transform_3, window_bounds = array<i64: 256, 1>}, {pipeline_mode = #tpu.pipeline_mode<synchronous>, transform_indices = @transform_4, window_bounds = array<i64: 384, 128>}, {pipeline_mode = #tpu.pipeline_mode<synchronous>, transform_indices = @transform_5, window_bounds = array<i64: 1, 128>}, {pipeline_mode = #tpu.pipeline_mode<synchronous>, transform_indices = @transform_6, window_bounds = array<i64: 128, 128>}, {pipeline_mode = #tpu.pipeline_mode<synchronous>, transform_indices = @transform_7, window_bounds = array<i64: 1, 128>}, {pipeline_mode = #tpu.pipeline_mode<synchronous>, transform_indices = @transform_8, window_bounds = array<i64: 1, 128>}, {pipeline_mode = #tpu.pipeline_mode<synchronous>, transform_indices = @transform_9, window_bounds = array<i64: 1, 128>}, {transform_indices = @transform_10, window_bounds = array<i64: 256, 128>}]} {
    %c0_i32 = arith.constant 0 : i32
    %0 = arith.cmpi eq, %arg1, %c0_i32 : i32
    %1 = arith.extui %0 : i1 to i32
    %c0_i32_0 = arith.constant 0 : i32
    %2 = arith.cmpi ne, %1, %c0_i32_0 : i32
    scf.if %2 {
      %cst_9 = arith.constant 0.000000e+00 : f32
      %15 = vector.broadcast %cst_9 : f32 to vector<256x128xf32>
      %c0_10 = arith.constant 0 : index
      %c0_11 = arith.constant 0 : index
      %16 = vector.load %arg13[%c0_10, %c0_11] : memref<256x128xf32, #tpu.memory_space<vmem>>, vector<256x128xf32>
      tpu.vector_store %arg13[%c0_10, %c0_11], %15 {strides = array<i32>} : memref<256x128xf32, #tpu.memory_space<vmem>>, vector<256x128xf32>,
    } else {
    }
    %c128_i32 = arith.constant 128 : i32
    %3 = arith.muli %arg1, %c128_i32 : i32
    %4 = tpu.assume_multiple %3, 128 : i32
    %5 = arith.index_cast %4 : i32 to index
    %c0 = arith.constant 0 : index
    %6 = vector.load %arg3[%5, %c0] : memref<128x128xbf16, #tpu.memory_space<vmem>>, vector<128x128xbf16>
    %c0_1 = arith.constant 0 : index
    %c0_2 = arith.constant 0 : index
    %7 = vector.load %arg13[%c0_1, %c0_2] : memref<256x128xf32, #tpu.memory_space<vmem>>, vector<256x128xf32>
    %c0_3 = arith.constant 0 : index
    %c0_4 = arith.constant 0 : index
    %8 = vector.load %arg2[%c0_3, %c0_4] : memref<256x128xbf16, #tpu.memory_space<vmem>>, vector<256x128xbf16>
    %cst = arith.constant dense<0.000000e+00> : vector<256x128xf32>
    %9 = tpu.matmul %8, %6, %cst {dimension_numbers = #tpu.dot_dimension_numbers<[1], [0], [0], [1], [0, 0, 1, 1], [], []>} : vector<256x128xbf16>, vector<128x128xbf16>, vector<256x128xf32> -> vector<256x128xf32>
    %10 = arith.addf %7, %9 : vector<256x128xf32>
    %c0_5 = arith.constant 0 : index
    %c0_6 = arith.constant 0 : index
    %11 = vector.load %arg13[%c0_5, %c0_6] : memref<256x128xf32, #tpu.memory_space<vmem>>, vector<256x128xf32>
    tpu.vector_store %arg13[%c0_5, %c0_6], %10 {strides = array<i32>} : memref<256x128xf32, #tpu.memory_space<vmem>>, vector<256x128xf32>,
    %c0_i32_7 = arith.constant 0 : i32
    %12 = arith.cmpi eq, %arg1, %c0_i32_7 : i32
    %13 = arith.extui %12 : i1 to i32
    %c0_i32_8 = arith.constant 0 : i32
    %14 = arith.cmpi ne, %13, %c0_i32_8 : i32
    scf.if %14 {
      %c0_9 = arith.constant 0 : index
      %c0_10 = arith.constant 0 : index
      %15 = vector.load %arg4[%c0_9, %c0_10] : memref<256x128xf32, #tpu.memory_space<vmem>>, vector<256x128xf32>
      %c0_11 = arith.constant 0 : index
      %c0_12 = arith.constant 0 : index
      %16 = vector.load %arg13[%c0_11, %c0_12] : memref<256x128xf32, #tpu.memory_space<vmem>>, vector<256x128xf32>
      %c0_13 = arith.constant 0 : index
      %c0_14 = arith.constant 0 : index
      %17 = vector.load %arg5[%c0_13, %c0_14] : memref<256x1xf32, #tpu.memory_space<vmem>>, vector<256x1xf32>
      %18 = vector.broadcast %17 : vector<256x1xf32> to vector<256x128xf32>
      %19 = arith.mulf %16, %18 : vector<256x128xf32>
      %c255_i32 = arith.constant 255 : i32
      %20 = tpu.dynamic_rotate %15 by %c255_i32 dim 0 : vector<256x128xf32>, i32 -> vector<256x128xf32>
      %c1_i32 = arith.constant 1 : i32
      %21 = tpu.dynamic_rotate %15 by %c1_i32 dim 0 : vector<256x128xf32>, i32 -> vector<256x128xf32>
      %22 = tpu.iota {dimensions = array<i32: 0>} : vector<256x128xi32>
      %c2_i32 = arith.constant 2 : i32
      %c0_i32_15 = arith.constant 0 : i32
      %23 = arith.cmpi eq, %c2_i32, %c0_i32_15 : i32
      %c1_i32_16 = arith.constant 1 : i32
      %24 = arith.select %23, %c1_i32_16, %c2_i32 : i32
      %25 = vector.broadcast %24 : i32 to vector<256x128xi32>
      %26 = arith.remsi %22, %25 : vector<256x128xi32>
      %c0_i32_17 = arith.constant 0 : i32
      %27 = vector.broadcast %c0_i32_17 : i32 to vector<256x128xi32>
      %28 = arith.cmpi ne, %26, %27 : vector<256x128xi32>
      %c0_i32_18 = arith.constant 0 : i32
      %29 = vector.broadcast %c0_i32_18 : i32 to vector<256x128xi32>
      %30 = arith.cmpi slt, %26, %29 : vector<256x128xi32>
      %c0_i32_19 = arith.constant 0 : i32
      %31 = arith.cmpi slt, %24, %c0_i32_19 : i32
      %32 = vector.broadcast %31 : i1 to vector<256x128xi1>
      %33 = vector.broadcast %32 : vector<256x128xi1> to vector<256x128xi1>
      %34 = arith.xori %30, %33 : vector<256x128xi1>
      %35 = arith.andi %34, %28 : vector<256x128xi1>
      %36 = vector.broadcast %24 : i32 to vector<256x128xi32>
      %37 = arith.addi %26, %36 : vector<256x128xi32>
      %38 = arith.select %35, %37, %26 : vector<256x128xi1>, vector<256x128xi32>
      %c0_i32_20 = arith.constant 0 : i32
      %39 = vector.broadcast %c0_i32_20 : i32 to vector<256x128xi32>
      %40 = arith.cmpi eq, %38, %39 : vector<256x128xi32>
      %41 = arith.select %40, %20, %21 : vector<256x128xi1>, vector<256x128xf32>
      %42 = arith.truncf %15 : vector<256x128xf32> to vector<256x128xbf16>
      %43 = arith.truncf %41 : vector<256x128xf32> to vector<256x128xbf16>
      %44 = arith.truncf %19 : vector<256x128xf32> to vector<256x128xbf16>
      %45 = tpu.concatenate %42, %43, %44 in 1 : vector<256x128xbf16>, vector<256x128xbf16>, vector<256x128xbf16> -> vector<256x384xbf16>
      %c0_21 = arith.constant 0 : index
      %c0_22 = arith.constant 0 : index
      %46 = vector.load %arg6[%c0_21, %c0_22] : memref<384x128xbf16, #tpu.memory_space<vmem>>, vector<384x128xbf16>
      %cst_23 = arith.constant dense<0.000000e+00> : vector<256x128xf32>
      %47 = tpu.matmul %45, %46, %cst_23 {dimension_numbers = #tpu.dot_dimension_numbers<[1], [0], [0], [1], [0, 0, 1, 1], [], []>} : vector<256x384xbf16>, vector<384x128xbf16>, vector<256x128xf32> -> vector<256x128xf32>
      %c0_24 = arith.constant 0 : index
      %c0_25 = arith.constant 0 : index
      %48 = vector.load %arg7[%c0_24, %c0_25] : memref<1x128xf32, #tpu.memory_space<vmem>>, vector<1x128xf32>
      %49 = vector.broadcast %48 : vector<1x128xf32> to vector<256x128xf32>
      %50 = arith.addf %47, %49 : vector<256x128xf32>
      %51 = arith.negf %50 : vector<256x128xf32>
      %52 = math.exp %51 : vector<256x128xf32>
      %cst_26 = arith.constant 1.000000e+00 : f32
      %53 = vector.broadcast %cst_26 : f32 to vector<256x128xf32>
      %54 = arith.addf %53, %52 : vector<256x128xf32>
      %55 = arith.divf %53, %54 : vector<256x128xf32>
      %56 = arith.mulf %50, %55 : vector<256x128xf32>
      %57 = arith.truncf %56 : vector<256x128xf32> to vector<256x128xbf16>
      %c0_27 = arith.constant 0 : index
      %c0_28 = arith.constant 0 : index
      %58 = vector.load %arg8[%c0_27, %c0_28] : memref<128x128xbf16, #tpu.memory_space<vmem>>, vector<128x128xbf16>
      %cst_29 = arith.constant dense<0.000000e+00> : vector<256x128xf32>
      %59 = tpu.matmul %57, %58, %cst_29 {dimension_numbers = #tpu.dot_dimension_numbers<[1], [0], [0], [1], [0, 0, 1, 1], [], []>} : vector<256x128xbf16>, vector<128x128xbf16>, vector<256x128xf32> -> vector<256x128xf32>
      %c0_30 = arith.constant 0 : index
      %c0_31 = arith.constant 0 : index
      %60 = vector.load %arg9[%c0_30, %c0_31] : memref<1x128xf32, #tpu.memory_space<vmem>>, vector<1x128xf32>
      %61 = vector.broadcast %60 : vector<1x128xf32> to vector<256x128xf32>
      %62 = arith.addf %59, %61 : vector<256x128xf32>
      %63 = arith.addf %15, %62 : vector<256x128xf32>
      %c0_32 = arith.constant 0 : index
      %c0_33 = arith.constant 0 : index
      %64 = vector.load %arg10[%c0_32, %c0_33] : memref<1x128xf32, #tpu.memory_space<vmem>>, vector<1x128xf32>
      %c0_34 = arith.constant 0 : index
      %c0_35 = arith.constant 0 : index
      %65 = vector.load %arg11[%c0_34, %c0_35] : memref<1x128xf32, #tpu.memory_space<vmem>>, vector<1x128xf32>
      %cst_36 = arith.constant dense<0.000000e+00> : vector<256xf32>
      %66 = vector.multi_reduction <add>, %63, %cst_36 [1] : vector<256x128xf32> to vector<256xf32>
      %67 = vector.shape_cast %66 : vector<256xf32> to vector<256x1xf32>
      %cst_37 = arith.constant 3.125000e-02 : f32
      %68 = vector.broadcast %cst_37 : f32 to vector<256x1xf32>
      %69 = arith.mulf %67, %68 : vector<256x1xf32>
      %70 = arith.mulf %63, %63 : vector<256x128xf32>
      %cst_38 = arith.constant dense<0.000000e+00> : vector<256xf32>
      %71 = vector.multi_reduction <add>, %70, %cst_38 [1] : vector<256x128xf32> to vector<256xf32>
      %72 = vector.shape_cast %71 : vector<256xf32> to vector<256x1xf32>
      %cst_39 = arith.constant 3.125000e-02 : f32
      %73 = vector.broadcast %cst_39 : f32 to vector<256x1xf32>
      %74 = arith.mulf %72, %73 : vector<256x1xf32>
      %75 = arith.mulf %69, %69 : vector<256x1xf32>
      %76 = arith.subf %74, %75 : vector<256x1xf32>
      %cst_40 = arith.constant 0.000000e+00 : f32
      %77 = vector.broadcast %cst_40 : f32 to vector<256x1xf32>
      %78 = arith.maximumf %76, %77 : vector<256x1xf32>
      %79 = vector.broadcast %69 : vector<256x1xf32> to vector<256x128xf32>
      %80 = arith.subf %63, %79 : vector<256x128xf32>
      %cst_41 = arith.constant 9.99999974E-6 : f32
      %81 = vector.broadcast %cst_41 : f32 to vector<256x1xf32>
      %82 = arith.addf %78, %81 : vector<256x1xf32>
      %83 = math.rsqrt %82 : vector<256x1xf32>
      %84 = vector.broadcast %83 : vector<256x1xf32> to vector<256x128xf32>
      %85 = arith.mulf %80, %84 : vector<256x128xf32>
      %86 = vector.broadcast %64 : vector<1x128xf32> to vector<256x128xf32>
      %87 = arith.mulf %85, %86 : vector<256x128xf32>
      %88 = vector.broadcast %65 : vector<1x128xf32> to vector<256x128xf32>
      %89 = arith.addf %87, %88 : vector<256x128xf32>
      %c0_42 = arith.constant 0 : index
      %c0_43 = arith.constant 0 : index
      %90 = vector.load %arg12[%c0_42, %c0_43] : memref<256x128xf32, #tpu.memory_space<vmem>>, vector<256x128xf32>
      tpu.vector_store %arg12[%c0_42, %c0_43], %89 {strides = array<i32>} : memref<256x128xf32, #tpu.memory_space<vmem>>, vector<256x128xf32>,
    } else {
    }
    return
  }
  func.func @transform_0(%arg0: i32, %arg1: i32) -> (i32, i32) {
    %c0_i32 = arith.constant 0 : i32
    return %arg0, %arg1 : i32, i32
  }
  func.func @transform_1(%arg0: i32, %arg1: i32) -> (i32, i32) {
    %c0_i32 = arith.constant 0 : i32
    %c0_i32_0 = arith.constant 0 : i32
    %c0_i32_1 = arith.constant 0 : i32
    return %c0_i32, %c0_i32_0 : i32, i32
  }
  func.func @transform_2(%arg0: i32, %arg1: i32) -> (i32, i32) {
    %c0_i32 = arith.constant 0 : i32
    %c0_i32_0 = arith.constant 0 : i32
    return %arg0, %c0_i32 : i32, i32
  }
  func.func @transform_3(%arg0: i32, %arg1: i32) -> (i32, i32) {
    %c0_i32 = arith.constant 0 : i32
    %c0_i32_0 = arith.constant 0 : i32
    return %arg0, %c0_i32 : i32, i32
  }
  func.func @transform_4(%arg0: i32, %arg1: i32) -> (i32, i32) {
    %c0_i32 = arith.constant 0 : i32
    %c0_i32_0 = arith.constant 0 : i32
    %c0_i32_1 = arith.constant 0 : i32
    return %c0_i32, %c0_i32_0 : i32, i32
  }
  func.func @transform_5(%arg0: i32, %arg1: i32) -> (i32, i32) {
    %c0_i32 = arith.constant 0 : i32
    %c0_i32_0 = arith.constant 0 : i32
    %c0_i32_1 = arith.constant 0 : i32
    return %c0_i32, %c0_i32_0 : i32, i32
  }
  func.func @transform_6(%arg0: i32, %arg1: i32) -> (i32, i32) {
    %c0_i32 = arith.constant 0 : i32
    %c0_i32_0 = arith.constant 0 : i32
    %c0_i32_1 = arith.constant 0 : i32
    return %c0_i32, %c0_i32_0 : i32, i32
  }
  func.func @transform_7(%arg0: i32, %arg1: i32) -> (i32, i32) {
    %c0_i32 = arith.constant 0 : i32
    %c0_i32_0 = arith.constant 0 : i32
    %c0_i32_1 = arith.constant 0 : i32
    return %c0_i32, %c0_i32_0 : i32, i32
  }
  func.func @transform_8(%arg0: i32, %arg1: i32) -> (i32, i32) {
    %c0_i32 = arith.constant 0 : i32
    %c0_i32_0 = arith.constant 0 : i32
    %c0_i32_1 = arith.constant 0 : i32
    return %c0_i32, %c0_i32_0 : i32, i32
  }
  func.func @transform_9(%arg0: i32, %arg1: i32) -> (i32, i32) {
    %c0_i32 = arith.constant 0 : i32
    %c0_i32_0 = arith.constant 0 : i32
    %c0_i32_1 = arith.constant 0 : i32
    return %c0_i32, %c0_i32_0 : i32, i32
  }
  func.func @transform_10(%arg0: i32, %arg1: i32) -> (i32, i32) {
    %c0_i32 = arith.constant 0 : i32
    %c0_i32_0 = arith.constant 0 : i32
    return %arg0, %c0_i32 : i32, i32
  }
}

</mosaic_0001>

<bundles_post_ra>
// kernel: gnn_layer.2
= control target key start
LH: loop header
LB: loop body
LE: loop exit
PB: predicated region body
PF: predicated region fallthrough
CT: control target
= control target key end

     0   :  { %s2829_s17 = smov 0   ;;  %s2831_s18 = smov 0   ;;  %s3534_s0 = inlined_call_operand.vmem [shape: bf16[128,512], index: 0, kind: input, shape index: {}]   ;;  %s3535_s1 = inlined_call_operand.vmem [shape: bf16[512,128], index: 1, kind: input, shape index: {}]   ;;  %s3536_s2 = inlined_call_operand.vmem [shape: f32[128,128], index: 2, kind: input, shape index: {}]   ;;  %s3537_s3 = inlined_call_operand.vmem [shape: f32[128,1], index: 3, kind: input, shape index: {}]   ;;  %s3538_s4 = inlined_call_operand.vmem [shape: bf16[256,128], index: 4, kind: input, shape index: {}]   ;;  %s3539_s5 = inlined_call_operand.vmem [shape: f32[1,128], index: 5, kind: input, shape index: {}]   ;;  %s3540_s6 = inlined_call_operand.vmem [shape: bf16[128,128], index: 6, kind: input, shape index: {}]   ;;  %s3541_s7 = inlined_call_operand.vmem [shape: f32[1,128], index: 7, kind: input, shape index: {}]   ;;  %s3542_s8 = inlined_call_operand.vmem [shape: f32[1,128], index: 8, kind: input, shape index: {}]   ;;  %s3543_s9 = inlined_call_operand.vmem [shape: f32[1,128], index: 9, kind: input, shape index: {}]   ;;  %s3544_s10 = inlined_call_operand.vmem [shape: f32[128,128], index: 10, kind: output, shape index: {0}]   ;;  %s3545_s11 = inlined_call_operand.vmem [shape: bf16[128,128], index: 11, kind: output, shape index: {1}]  }
   0x1   :  { %s2833_s19 = smov 0   ;;  %s2835_s20 = smov 0  }
   0x2   :  { %s2837_s21 = smov 0  }
   0x3 LB: > { %s31_s22 = sadd.s32 1, %s2761_s20  ;;  %p50_p1 = scmp.ne.s32.totalorder %s2753_s18, %s2749_s17  ;;  %s2765_s21 = sphi %s2837_s21, %s22_s21   ;;  %s2761_s20 = sphi %s2835_s20, %s3549_s20   ;;  %s2757_s19 = sphi %s2833_s19, %s3548_s19   ;;  %s2753_s18 = sphi %s2831_s18, %s3547_s18   ;;  %s2749_s17 = sphi %s2829_s17, %s3546_s17  }
   0x4   : > { %p32_p0 = scmp.ge.s32.totalorder %s31_s22, 2  ;;  %p51_p2 = scmp.eq.s32.totalorder %s2765_s21, 0 }
   0x5   : > { %s43_s24 = sadd.s32 1, %s2753_s18  ;;  %p2159_p5 = scmp.ge.s32.totalorder %s2765_s21, 2 }
   0x6   : > { %s3551_s22 = smov (%p32_p0, %s31_s22), 0  ;;  %p52_p3 = por %p51_p2, %p50_p1 }
   0x7   : > { %s39_s23 = ssub.s32 %s2761_s20, %s3551_s22  ;;  %366 = sbr.rel (%p2159_p5) target bundleno = 26 (0x1a), region = 52 }
   0x8   : > { %p41_p4 = scmp.eq.s32.totalorder %s39_s23, 0 }
   0xa   : > { %s2864_s25 = scalar_select %p41_p4, %s2753_s18, %s43_s24  }
   0xe   : > { %369 = sbr.rel (!%p52_p3) target bundleno = 26 (0x1a), region = 56  ;;  %s371_s26 = sand.u32 (%p52_p3), 1, %s2753_s18  }
   0xf   : > { %s2267_s27 = sshll.u32 (%p52_p3), %s2761_s20, 3  ;;  %s2160_s28 = sshll.u32 (%p52_p3), %s371_s26, 7 }
  0x10   : > { %s2872_s12 = scalar_lea.vmem (%p52_p3), %s3534_s0, %s2267_s27  ;;  %s373_s13 = scalar_lea.vmem (%p52_p3), [#allocation3], %s2160_s28 }
  0x11   : > { %v437_v0 = vld [vmem:[%s2872_s12] sm:$0xff] (%p52_p3)  ;;  %v439_v1 = vld [vmem:[%s2872_s12 + $0x10] sm:$0xff] (%p52_p3) }
  0x12   : > { %v441_v2 = vld [vmem:[%s2872_s12 + $0x20] sm:$0xff] (%p52_p3)  ;;  %438 = vst [vmem:[%s373_s13] sm:$0xff] (%p52_p3), %v437_v0  ;;  %440 = vst [vmem:[%s373_s13 + $0x8] sm:$0xff] (%p52_p3), %v439_v1  ;;  %v443_v3 = vld [vmem:[%s2872_s12 + $0x30] sm:$0xff] (%p52_p3) }
  0x13   : > { %442 = vst [vmem:[%s373_s13 + $0x10] sm:$0xff] (%p52_p3), %v441_v2  ;;  %v445_v4 = vld [vmem:[%s2872_s12 + $0x40] sm:$0xff] (%p52_p3)  ;;  %v447_v5 = vld [vmem:[%s2872_s12 + $0x50] sm:$0xff] (%p52_p3)  ;;  %444 = vst [vmem:[%s373_s13 + $0x18] sm:$0xff] (%p52_p3), %v443_v3 }
  0x14   : > { %446 = vst [vmem:[%s373_s13 + $0x20] sm:$0xff] (%p52_p3), %v445_v4  ;;  %448 = vst [vmem:[%s373_s13 + $0x28] sm:$0xff] (%p52_p3), %v447_v5  ;;  %v449_v6 = vld [vmem:[%s2872_s12 + $0x60] sm:$0xff] (%p52_p3)  ;;  %v451_v7 = vld [vmem:[%s2872_s12 + $0x70] sm:$0xff] (%p52_p3) }
  0x15   : > { %v453_v8 = vld [vmem:[%s2872_s12 + $0x80] sm:$0xff]  ;;  %450 = vst [vmem:[%s373_s13 + $0x30] sm:$0xff] %v449_v6  ;;  %452 = vst [vmem:[%s373_s13 + $0x38] sm:$0xff] %v451_v7  ;;  %v455_v9 = vld [vmem:[%s2872_s12 + $0x90] sm:$0xff] }
  0x16   : > { %454 = vst [vmem:[%s373_s13 + $0x40] sm:$0xff] %v453_v8  ;;  %v457_v10 = vld [vmem:[%s2872_s12 + $0xa0] sm:$0xff]  ;;  %v459_v11 = vld [vmem:[%s2872_s12 + $0xb0] sm:$0xff]  ;;  %456 = vst [vmem:[%s373_s13 + $0x48] sm:$0xff] %v455_v9 }
  0x17   : > { %458 = vst [vmem:[%s373_s13 + $0x50] sm:$0xff] %v457_v10  ;;  %460 = vst [vmem:[%s373_s13 + $0x58] sm:$0xff] %v459_v11  ;;  %v461_v12 = vld [vmem:[%s2872_s12 + $0xc0] sm:$0xff]  ;;  %v463_v13 = vld [vmem:[%s2872_s12 + $0xd0] sm:$0xff] }
  0x18   : > { %v465_v14 = vld [vmem:[%s2872_s12 + $0xe0] sm:$0xff]  ;;  %462 = vst [vmem:[%s373_s13 + $0x60] sm:$0xff] %v461_v12  ;;  %464 = vst [vmem:[%s373_s13 + $0x68] sm:$0xff] %v463_v13  ;;  %v467_v15 = vld [vmem:[%s2872_s12 + $0xf0] sm:$0xff] }
  0x19   : > { %466 = vst [vmem:[%s373_s13 + $0x70] sm:$0xff] %v465_v14  ;;  %468 = vst [vmem:[%s373_s13 + $0x78] sm:$0xff] %v467_v15 }
  0x1a PF: > { %p2163_p6 = scmp.ge.s32.totalorder %s2765_s21, 1  ;;  %p473_p7 = scmp.lt.s32.totalorder %s2765_s21, 3 }
  0x1c   : > { %p474_p8 = pnand %p2163_p6, %p473_p7 }
  0x1d   : > { %s480_s14 = sand.u32 (!%p474_p8), 1, %s2749_s17   ;;  %p2165_p9 = scmp.ne.s32.totalorder (!%p474_p8), %s2757_s19, 0 }
  0x1e   : > { %477 = sbr.rel (%p474_p8) target bundleno = 1148 (0x47c), region = 94  ;;  %s2164_s15 = sshll.u32 (!%p474_p8), %s480_s14, 7 }
  0x1f   : > { %s2893_s16 = scalar_lea.vmem (!%p474_p8), [#allocation3], %s2164_s15 }
  0x25   : > { %564 = sbr.rel (%p2165_p9) target bundleno = 46 (0x2e), region = 102  ;;  %v2767_v16 = vmov (!%p2165_p9), 0.0  }
  0x26   : > { %565 = vst [vmem:[#allocation2] sm:$0xff] (!%p2165_p9), %v2767_v16  ;;  %566 = vst [vmem:[#allocation2 + $0x8] sm:$0xff] (!%p2165_p9), %v2767_v16 }
  0x27   : > { %567 = vst [vmem:[#allocation2 + $0x10] sm:$0xff] (!%p2165_p9), %v2767_v16  ;;  %568 = vst [vmem:[#allocation2 + $0x18] sm:$0xff] (!%p2165_p9), %v2767_v16 }
  0x28   : > { %569 = vst [vmem:[#allocation2 + $0x20] sm:$0xff] (!%p2165_p9), %v2767_v16  ;;  %570 = vst [vmem:[#allocation2 + $0x28] sm:$0xff] (!%p2165_p9), %v2767_v16 }
  0x29   : > { %571 = vst [vmem:[#allocation2 + $0x30] sm:$0xff] (!%p2165_p9), %v2767_v16  ;;  %572 = vst [vmem:[#allocation2 + $0x38] sm:$0xff] (!%p2165_p9), %v2767_v16 }
  0x2a   : > { %573 = vst [vmem:[#allocation2 + $0x40] sm:$0xff] (!%p2165_p9), %v2767_v16  ;;  %574 = vst [vmem:[#allocation2 + $0x48] sm:$0xff] (!%p2165_p9), %v2767_v16 }
  0x2b   : > { %575 = vst [vmem:[#allocation2 + $0x50] sm:$0xff] (!%p2165_p9), %v2767_v16  ;;  %576 = vst [vmem:[#allocation2 + $0x58] sm:$0xff] (!%p2165_p9), %v2767_v16 }
  0x2c   : > { %577 = vst [vmem:[#allocation2 + $0x60] sm:$0xff] %v2767_v16  ;;  %578 = vst [vmem:[#allocation2 + $0x68] sm:$0xff] %v2767_v16 }
  0x2d   : > { %579 = vst [vmem:[#allocation2 + $0x70] sm:$0xff] %v2767_v16  ;;  %580 = vst [vmem:[#allocation2 + $0x78] sm:$0xff] %v2767_v16 }
  0x2e PF: > { %s2166_s17 = sshll.u32 %s2757_s19, 8  ;;  %v2583_v17 = vld [vmem:[%s2893_s16 + $0x4] ss:$8 sps:$4 sm:$0xff]   ;;  %v2581_v35 = vld [vmem:[%s2893_s16] ss:$8 sps:$4 sm:$0xff]   ;;  %p2200_p10 = scmp.ne.s32.totalorder %s2757_s19, 1 }
  0x2f   : > { %s582_s23 = sshra.s32 %s2166_s17, 3  ;;  %v2586_v18 = vld [vmem:[%s2893_s16 + $0x44] ss:$8 sps:$4 sm:$0xff]   ;;  %858 = vmatprep.mubr.bf16.mxu0 %v2583_v17  ;;  %v2584_v36 = vld [vmem:[%s2893_s16 + $0x40] ss:$8 sps:$4 sm:$0xff]  }
  0x30   : > { %s2167_s24 = sshll.u32 %s582_s23, 2  ;;  %890 = vmatprep.mubr.bf16.mxu1 %v2586_v18  ;;  %v2587_v37 = vld [vmem:[%s2893_s16 + $0x14] ss:$8 sps:$4 sm:$0xff]   ;;  %v2591_v39 = vld [vmem:[%s2893_s16 + $0x10] ss:$8 sps:$4 sm:$0xff]   ;;  %v618_v51 = vld [vmem:[#allocation2] sm:$0xff] }
  0x31   : > { %s2902_s28 = scalar_lea.vmem %s3535_s1, %s2167_s24  ;;  %v2589_v38 = vld [vmem:[%s2893_s16 + $0x54] ss:$8 sps:$4 sm:$0xff]   ;;  %v2592_v40 = vld [vmem:[%s2893_s16 + $0x50] ss:$8 sps:$4 sm:$0xff]   ;;  %v2593_v41 = vld [vmem:[%s2893_s16 + $0x24] ss:$8 sps:$4 sm:$0xff]  }
  0x32   : > { %v2565_v19 = vld [vmem:[%s2902_s28 + $0x40] sm:$0xff]   ;;  %v2567_v21 = vld [vmem:[%s2902_s28 + $0x48] sm:$0xff]   ;;  %v2569_v23 = vld [vmem:[%s2902_s28 + $0x50] sm:$0xff]  }
  0x33   : > { %v2566_v20 = vld [vmem:[%s2902_s28] sm:$0xff]   ;;  %2331 = vmatprep.subr.bf16.mxu0 %v2565_v19  ;;  %2507 = vmatprep.subr.bf16.mxu1 %v2565_v19  ;;  %v2568_v22 = vld [vmem:[%s2902_s28 + $0x8] sm:$0xff]   ;;  %v2570_v24 = vld [vmem:[%s2902_s28 + $0x10] sm:$0xff]  }
  0x34   : > { %2332 = vmatpush3.bf16.msra.mxu0 %v2566_v20  ;;  %2515 = vmatpush3.bf16.msra.mxu1 %v2566_v20  ;;  %v2571_v25 = vld [vmem:[%s2902_s28 + $0x58] sm:$0xff]   ;;  %v2573_v27 = vld [vmem:[%s2902_s28 + $0x60] sm:$0xff]   ;;  %v2575_v29 = vld [vmem:[%s2902_s28 + $0x68] sm:$0xff]  }
  0x35   : > { %2333 = vmatprep.subr.bf16.mxu0 %v2567_v21  ;;  %2508 = vmatprep.subr.bf16.mxu1 %v2567_v21  ;;  %v2572_v26 = vld [vmem:[%s2902_s28 + $0x18] sm:$0xff]   ;;  %v2574_v28 = vld [vmem:[%s2902_s28 + $0x20] sm:$0xff]   ;;  %v2576_v30 = vld [vmem:[%s2902_s28 + $0x28] sm:$0xff]  }
  0x36   : > { %v2577_v31 = vld [vmem:[%s2902_s28 + $0x70] sm:$0xff]   ;;  %v2579_v33 = vld [vmem:[%s2902_s28 + $0x78] sm:$0xff]   ;;  %v2595_v42 = vld [vmem:[%s2893_s16 + $0x64] ss:$8 sps:$4 sm:$0xff]  }
  0x37   : > { %v2578_v32 = vld [vmem:[%s2902_s28 + $0x30] sm:$0xff]   ;;  %v2580_v34 = vld [vmem:[%s2902_s28 + $0x38] sm:$0xff]   ;;  %v2597_v43 = vld [vmem:[%s2893_s16 + $0x20] ss:$8 sps:$4 sm:$0xff]  }
  0x38   : > { %2334 = vmatpush3.bf16.msra.mxu0 %v2568_v22  ;;  %2516 = vmatpush3.bf16.msra.mxu1 %v2568_v22  ;;  %v2598_v44 = vld [vmem:[%s2893_s16 + $0x60] ss:$8 sps:$4 sm:$0xff]   ;;  %v2599_v45 = vld [vmem:[%s2893_s16 + $0x34] ss:$8 sps:$4 sm:$0xff]   ;;  %v2603_v47 = vld [vmem:[%s2893_s16 + $0x30] ss:$8 sps:$4 sm:$0xff]  }
  0x39   : > { %2335 = vmatprep.subr.bf16.mxu0 %v2569_v23  ;;  %2509 = vmatprep.subr.bf16.mxu1 %v2569_v23  ;;  %v2601_v46 = vld [vmem:[%s2893_s16 + $0x74] ss:$8 sps:$4 sm:$0xff]   ;;  %v2604_v48 = vld [vmem:[%s2893_s16 + $0x70] ss:$8 sps:$4 sm:$0xff]   ;;  %v626_v53 = vld [vmem:[#allocation2 + $0x40] sm:$0xff] }
  0x3a   : > { %v619_v59 = vld [vmem:[#allocation2 + $0x8] sm:$0xff]  ;;  %v620_v7 = vld [vmem:[#allocation2 + $0x10] sm:$0xff]  ;;  %v621_v15 = vld [vmem:[#allocation2 + $0x18] sm:$0xff] }
  0x3b   : > { %v627_v61 = vld [vmem:[#allocation2 + $0x48] sm:$0xff]  ;;  %v628_v9 = vld [vmem:[#allocation2 + $0x50] sm:$0xff]  ;;  %v629_v17 = vld [vmem:[#allocation2 + $0x58] sm:$0xff] }
  0x3c   : > { %2336 = vmatpush3.bf16.msra.mxu0 %v2570_v24  ;;  %2517 = vmatpush3.bf16.msra.mxu1 %v2570_v24 }
  0x3d   : > { %2337 = vmatprep.subr.bf16.mxu0 %v2571_v25  ;;  %2510 = vmatprep.subr.bf16.mxu1 %v2571_v25 }
  0x40   : > { %2338 = vmatpush3.bf16.msra.mxu0 %v2572_v26  ;;  %2518 = vmatpush3.bf16.msra.mxu1 %v2572_v26 }
  0x41   : > { %2339 = vmatprep.subr.bf16.mxu0 %v2573_v27  ;;  %2511 = vmatprep.subr.bf16.mxu1 %v2573_v27  ;;  %v622_v27 = vld [vmem:[#allocation2 + $0x20] sm:$0xff] }
  0x44   : > { %2340 = vmatpush3.bf16.msra.mxu0 %v2574_v28  ;;  %2519 = vmatpush3.bf16.msra.mxu1 %v2574_v28 }
  0x45   : > { %2341 = vmatprep.subr.bf16.mxu0 %v2575_v29  ;;  %2512 = vmatprep.subr.bf16.mxu1 %v2575_v29  ;;  %v630_v29 = vld [vmem:[#allocation2 + $0x60] sm:$0xff] }
  0x48   : > { %2342 = vmatpush3.bf16.msra.mxu0 %v2576_v30  ;;  %2520 = vmatpush3.bf16.msra.mxu1 %v2576_v30 }
  0x49   : > { %2343 = vmatprep.subr.bf16.mxu0 %v2577_v31  ;;  %2513 = vmatprep.subr.bf16.mxu1 %v2577_v31 }
  0x4c   : > { %2344 = vmatpush3.bf16.msra.mxu0 %v2578_v32  ;;  %2521 = vmatpush3.bf16.msra.mxu1 %v2578_v32 }
  0x4d   : > { %2345 = vmatprep.subr.bf16.mxu0 %v2579_v33  ;;  %2514 = vmatprep.subr.bf16.mxu1 %v2579_v33 }
  0x50   : > { %2346 = vmatpush3.bf16.msra.mxu0 %v2580_v34  ;;  %2522 = vmatpush3.bf16.msra.mxu1 %v2580_v34 }
  0x53   : > { %859 = vmatmul.mubr.bf16.vlgmr.msra.gmra.mrb[0].mxu0 %v2581_v35  ;;  %891 = vmatmul.mubr.bf16.vlgmr.msra.gmra.mrb[0].mxu1 %v2584_v36  ;;  %v623_v35 = vld [vmem:[#allocation2 + $0x28] sm:$0xff] }
  0x54   : > { %866 = vmatprep.mubr.bf16.mxu0 %v2587_v37  ;;  %898 = vmatprep.mubr.bf16.mxu1 %v2589_v38  ;;  %v631_v37 = vld [vmem:[#allocation2 + $0x68] sm:$0xff] }
  0x5b   : > { %867 = vmatmul.mubr.bf16.gmra.mrb[4].mxu0 %v2591_v39  ;;  %899 = vmatmul.mubr.bf16.gmra.mrb[4].mxu1 %v2592_v40 }
  0x5c   : > { %874 = vmatprep.mubr.bf16.mxu0 %v2593_v41  ;;  %906 = vmatprep.mubr.bf16.mxu1 %v2595_v42 }
  0x63   : > { %875 = vmatmul.mubr.bf16.gmra.mrb[8].mxu0 %v2597_v43  ;;  %907 = vmatmul.mubr.bf16.gmra.mrb[8].mxu1 %v2598_v44 }
  0x64   : > { %882 = vmatprep.mubr.bf16.mxu0 %v2599_v45  ;;  %914 = vmatprep.mubr.bf16.mxu1 %v2601_v46 }
  0x6b   : > { %883 = vmatmul.mubr.bf16.gmra.mrb[12].mxu0 %v2603_v47  ;;  %915 = vmatmul.mubr.bf16.gmra.mrb[12].mxu1 %v2604_v48  ;;  %v624_v47 = vld [vmem:[#allocation2 + $0x30] sm:$0xff] }
 0x126   : > { %v2347_v49 = vpop.f32.mrb[0].mxu0  ;;  %v2371_v50 = vpop.f32.mrb[0].mxu1 }
 0x127   : > { %v2348_v52 = vpop.f32.mrb[1].mxu0  ;;  %v2372_v54 = vpop.f32.mrb[1].mxu1 }
 0x128   : > { %v2349_v55 = vadd.f32 %v2348_v52, %v2347_v49  ;;  %v2373_v56 = vadd.f32 %v2372_v54, %v2371_v50  ;;  %v2350_v57 = vpop.f32.mrb[2].mxu0  ;;  %v2374_v58 = vpop.f32.mrb[2].mxu1  ;;  %v632_v49 = vld [vmem:[#allocation2 + $0x70] sm:$0xff] }
 0x129   : > { %v2351_v60 = vpop.f32.mrb[3].mxu0  ;;  %v2375_v62 = vpop.f32.mrb[3].mxu1 }
 0x12a   : > { %v923_v63 = vadd.f32 %v2349_v55, %v618_v51  ;;  %v931_v0 = vadd.f32 %v2373_v56, %v626_v53  ;;  %v2352_v1 = vadd.f32 %v2351_v60, %v2350_v57  ;;  %v2376_v2 = vadd.f32 %v2375_v62, %v2374_v58  ;;  %v625_v55 = vld [vmem:[#allocation2 + $0x38] sm:$0xff] }
 0x12b   : > { %v633_v57 = vld [vmem:[#allocation2 + $0x78] sm:$0xff] }
 0x12c   : > { %939 = vst [vmem:[#allocation2] sm:$0xff] %v923_v63  ;;  %947 = vst [vmem:[#allocation2 + $0x40] sm:$0xff] %v931_v0  ;;  %v924_v3 = vadd.f32 %v2352_v1, %v619_v59  ;;  %v932_v4 = vadd.f32 %v2376_v2, %v627_v61  ;;  %v993_v1 = vld [vmem:[%s3537_s3 + $0x10] sm:$0xff] (!%p2200_p10)  ;;  %v991_v2 = vld [vmem:[%s3537_s3] sm:$0xff] (!%p2200_p10) }
 0x12e   : > { %940 = vst [vmem:[#allocation2 + $0x8] sm:$0xff] %v924_v3  ;;  %948 = vst [vmem:[#allocation2 + $0x48] sm:$0xff] %v932_v4  ;;  %v2353_v5 = vpop.f32.mrb[4].mxu0  ;;  %v2377_v6 = vpop.f32.mrb[4].mxu1  ;;  %v2768_v3 = vmov (!%p2200_p10), 0   ;;  %v994_v4 = vld [vmem:[%s3537_s3 + $0x18] sm:$0xff] (!%p2200_p10) }
 0x12f   : > { %v2354_v8 = vpop.f32.mrb[5].mxu0  ;;  %v2378_v10 = vpop.f32.mrb[5].mxu1  ;;  %2606 = vset.pattern.permute.xlu1 (!%p2200_p10), %v2768_v3  ;;  %2605 = vset.pattern.permute.xlu0 (!%p2200_p10), %v2768_v3 }
 0x130   : > { %v2355_v11 = vadd.f32 %v2354_v8, %v2353_v5  ;;  %v2379_v12 = vadd.f32 %v2378_v10, %v2377_v6  ;;  %v2356_v13 = vpop.f32.mrb[6].mxu0  ;;  %v2380_v14 = vpop.f32.mrb[6].mxu1  ;;  %1019 = vperm.xlu1 (!%p2200_p10), %2606, %v993_v1   ;;  %1009 = vperm.xlu0 (!%p2200_p10), %2605, %v991_v2   ;;  %v992_v5 = vld [vmem:[%s3537_s3 + $0x8] sm:$0xff] (!%p2200_p10)  ;;  %v2607_v8 = vld [vmem:[%s3538_s4 + $0x40] sm:$0xff] (!%p2200_p10)  }
 0x131   : > { %v2357_v16 = vpop.f32.mrb[7].mxu0  ;;  %v2381_v18 = vpop.f32.mrb[7].mxu1  ;;  %v996_v6 = vld [vmem:[%s3537_s3 + $0x28] sm:$0xff] (!%p2200_p10)  ;;  %2395 = vmatprep.subr.bf16.mxu0 (!%p2200_p10), %v2607_v8  ;;  %v3058_v1 = vld [vmem:[%s3536_s2 + $0x20] sm:$0xff] (!%p2200_p10) }
 0x132   : > { %v925_v19 = vadd.f32 %v2355_v11, %v620_v7  ;;  %v933_v20 = vadd.f32 %v2379_v12, %v628_v9  ;;  %v2358_v21 = vadd.f32 %v2357_v16, %v2356_v13  ;;  %v2382_v22 = vadd.f32 %v2381_v18, %v2380_v14  ;;  %v995_v7 = vld [vmem:[%s3537_s3 + $0x20] sm:$0xff] (!%p2200_p10)  ;;  %v2609_v10 = vld [vmem:[%s3538_s4 + $0x48] sm:$0xff] (!%p2200_p10)   ;;  %v998_v11 = vld [vmem:[%s3537_s3 + $0x38] sm:$0xff] (!%p2200_p10) }
 0x133   : > { %v2608_v9 = vld [vmem:[%s3538_s4] sm:$0xff] (!%p2200_p10)   ;;  %v2610_v12 = vld [vmem:[%s3538_s4 + $0x8] sm:$0xff] (!%p2200_p10)   ;;  %v997_v13 = vld [vmem:[%s3537_s3 + $0x30] sm:$0xff] (!%p2200_p10) }
 0x134   : > { %941 = vst [vmem:[#allocation2 + $0x10] sm:$0xff] %v925_v19  ;;  %949 = vst [vmem:[#allocation2 + $0x50] sm:$0xff] %v933_v20  ;;  %v926_v23 = vadd.f32 %v2358_v21, %v621_v15  ;;  %v934_v24 = vadd.f32 %v2382_v22, %v629_v17  ;;  %1024 = vperm.xlu1 (!%p2200_p10), %2606, %v994_v4   ;;  %1014 = vperm.xlu0 (!%p2200_p10), %2605, %v992_v5   ;;  %v2611_v14 = vld [vmem:[%s3538_s4 + $0x50] sm:$0xff] (!%p2200_p10)   ;;  %v1000_v15 = vld [vmem:[%s3537_s3 + $0x48] sm:$0xff] (!%p2200_p10) }
 0x135   : > { %2396 = vmatpush3.bf16.msra.mxu0 (!%p2200_p10), %v2608_v9  ;;  %v2612_v16 = vld [vmem:[%s3538_s4 + $0x10] sm:$0xff] (!%p2200_p10)   ;;  %v999_v17 = vld [vmem:[%s3537_s3 + $0x40] sm:$0xff] (!%p2200_p10)  ;;  %v2613_v18 = vld [vmem:[%s3538_s4 + $0x58] sm:$0xff] (!%p2200_p10)  }
 0x136   : > { %942 = vst [vmem:[#allocation2 + $0x18] sm:$0xff] %v926_v23  ;;  %950 = vst [vmem:[#allocation2 + $0x58] sm:$0xff] %v934_v24  ;;  %v2359_v25 = vpop.f32.mrb[8].mxu0  ;;  %v2383_v26 = vpop.f32.mrb[8].mxu1  ;;  %2397 = vmatprep.subr.bf16.mxu0 (!%p2200_p10), %v2609_v10  ;;  %v1002_v19 = vld [vmem:[%s3537_s3 + $0x58] sm:$0xff] (!%p2200_p10)  ;;  %v1001_v21 = vld [vmem:[%s3537_s3 + $0x50] sm:$0xff] (!%p2200_p10) }
 0x137   : > { %v2360_v28 = vpop.f32.mrb[9].mxu0  ;;  %v2384_v30 = vpop.f32.mrb[9].mxu1  ;;  %v2614_v20 = vld [vmem:[%s3538_s4 + $0x18] sm:$0xff] (!%p2200_p10)   ;;  %v2615_v22 = vld [vmem:[%s3538_s4 + $0x60] sm:$0xff] (!%p2200_p10)   ;;  %v1004_v24 = vld [vmem:[%s3537_s3 + $0x68] sm:$0xff] (!%p2200_p10) }
 0x138   : > { %v2361_v31 = vadd.f32 %v2360_v28, %v2359_v25  ;;  %v2385_v32 = vadd.f32 %v2384_v30, %v2383_v26  ;;  %v2362_v33 = vpop.f32.mrb[10].mxu0  ;;  %v2386_v34 = vpop.f32.mrb[10].mxu1  ;;  %1034 = vperm.xlu1 (!%p2200_p10), %2606, %v996_v6   ;;  %1029 = vperm.xlu0 (!%p2200_p10), %2605, %v995_v7   ;;  %v2616_v23 = vld [vmem:[%s3538_s4 + $0x20] sm:$0xff] (!%p2200_p10)   ;;  %v2617_v26 = vld [vmem:[%s3538_s4 + $0x68] sm:$0xff] (!%p2200_p10)   ;;  %v1006_v28 = vld [vmem:[%s3537_s3 + $0x78] sm:$0xff] (!%p2200_p10) }
 0x139   : > { %v2363_v36 = vpop.f32.mrb[11].mxu0  ;;  %v2387_v38 = vpop.f32.mrb[11].mxu1  ;;  %2398 = vmatpush3.bf16.msra.mxu0 (!%p2200_p10), %v2610_v12  ;;  %v1003_v25 = vld [vmem:[%s3537_s3 + $0x60] sm:$0xff] (!%p2200_p10)  ;;  %v2619_v30 = vld [vmem:[%s3538_s4 + $0x70] sm:$0xff] (!%p2200_p10)   ;;  %v3063_v2 = vld [vmem:[%s3536_s2 + $0x28] sm:$0xff] (!%p2200_p10) }
 0x13a   : > { %v927_v39 = vadd.f32 %v2361_v31, %v622_v27  ;;  %v935_v40 = vadd.f32 %v2385_v32, %v630_v29  ;;  %v2364_v41 = vadd.f32 %v2363_v36, %v2362_v33  ;;  %v2388_v42 = vadd.f32 %v2387_v38, %v2386_v34  ;;  %2399 = vmatprep.subr.bf16.mxu0 (!%p2200_p10), %v2611_v14  ;;  %v2618_v27 = vld [vmem:[%s3538_s4 + $0x28] sm:$0xff] (!%p2200_p10)   ;;  %v1005_v29 = vld [vmem:[%s3537_s3 + $0x70] sm:$0xff] (!%p2200_p10)  ;;  %v2621_v32 = vld [vmem:[%s3538_s4 + $0x78] sm:$0xff] (!%p2200_p10)  }
 0x13b   : > { %v2620_v31 = vld [vmem:[%s3538_s4 + $0x30] sm:$0xff] (!%p2200_p10)   ;;  %v2622_v33 = vld [vmem:[%s3538_s4 + $0x38] sm:$0xff] (!%p2200_p10)   ;;  %v1105_v5 = vpack.c.bf16 (!%p2200_p10), %v3063_v2, %v3058_v1  ;;  %v984_v8 = vld [vmem:[#allocation2 + $0x48] sm:$0xff] (!%p2200_p10) }
 0x13c   : > { %943 = vst [vmem:[#allocation2 + $0x20] sm:$0xff] %v927_v39  ;;  %951 = vst [vmem:[#allocation2 + $0x60] sm:$0xff] %v935_v40  ;;  %v928_v43 = vadd.f32 %v2364_v41, %v623_v35  ;;  %v936_v44 = vadd.f32 %v2388_v42, %v631_v37  ;;  %1044 = vperm.xlu1 (!%p2200_p10), %2606, %v998_v11   ;;  %1039 = vperm.xlu0 (!%p2200_p10), %2605, %v997_v13   ;;  %v977_v35 = vld [vmem:[#allocation2 + $0x10] sm:$0xff] (!%p2200_p10)  ;;  %v975_v37 = vld [vmem:[#allocation2] sm:$0xff] (!%p2200_p10) }
 0x13d   : > { %2400 = vmatpush3.bf16.msra.mxu0 (!%p2200_p10), %v2612_v16  ;;  %v978_v38 = vld [vmem:[#allocation2 + $0x18] sm:$0xff] (!%p2200_p10)  ;;  %v976_v39 = vld [vmem:[#allocation2 + $0x8] sm:$0xff] (!%p2200_p10)  ;;  %v3034_v41 = vld [vmem:[%s3536_s2] sm:$0xff] (!%p2200_p10) }
 0x13e   : > { %944 = vst [vmem:[#allocation2 + $0x28] sm:$0xff] %v928_v43  ;;  %952 = vst [vmem:[#allocation2 + $0x68] sm:$0xff] %v936_v44  ;;  %v2365_v45 = vpop.f32.mrb[12].mxu0  ;;  %v2389_v46 = vpop.f32.mrb[12].mxu1  ;;  %2401 = vmatprep.subr.bf16.mxu0 (!%p2200_p10), %v2613_v18  ;;  %v3039_v42 = vld [vmem:[%s3536_s2 + $0x8] sm:$0xff] (!%p2200_p10)  ;;  %v983_v10 = vld [vmem:[#allocation2 + $0x40] sm:$0xff] (!%p2200_p10) }
 0x13f   : > { %v2366_v48 = vpop.f32.mrb[13].mxu0  ;;  %v2390_v50 = vpop.f32.mrb[13].mxu1  ;;  %v3070_v11 = vld [vmem:[%s3536_s2 + $0x30] sm:$0xff] (!%p2200_p10)  ;;  %v3075_v12 = vld [vmem:[%s3536_s2 + $0x38] sm:$0xff] (!%p2200_p10) }
 0x140   : > { %v2367_v51 = vadd.f32 %v2366_v48, %v2365_v45  ;;  %v2391_v52 = vadd.f32 %v2390_v50, %v2389_v46  ;;  %v2368_v53 = vpop.f32.mrb[14].mxu0  ;;  %v2392_v54 = vpop.f32.mrb[14].mxu1  ;;  %958 = sbr.rel (%p2200_p10) target bundleno = 1148 (0x47c), region = 106  ;;  %1054 = vperm.xlu1 (!%p2200_p10), %2606, %v1000_v15   ;;  %1049 = vperm.xlu0 (!%p2200_p10), %2605, %v999_v17   ;;  %v1103_v48 = vpack.c.bf16 (!%p2200_p10), %v3039_v42, %v3034_v41  ;;  %v986_v18 = vld [vmem:[#allocation2 + $0x58] sm:$0xff] (!%p2200_p10) }
 0x141   : > { %v2369_v56 = vpop.f32.mrb[15].mxu0  ;;  %v2393_v58 = vpop.f32.mrb[15].mxu1  ;;  %2402 = vmatpush3.bf16.msra.mxu0 (!%p2200_p10), %v2614_v20  ;;  %v1106_v15 = vpack.c.bf16 (!%p2200_p10), %v3075_v12, %v3070_v11  ;;  %v985_v20 = vld [vmem:[#allocation2 + $0x50] sm:$0xff] (!%p2200_p10) }
 0x142   : > { %v929_v59 = vadd.f32 %v2367_v51, %v624_v47  ;;  %v937_v60 = vadd.f32 %v2391_v52, %v632_v49  ;;  %v2370_v61 = vadd.f32 %v2369_v56, %v2368_v53  ;;  %v2394_v62 = vadd.f32 %v2393_v58, %v2392_v54  ;;  %2403 = vmatprep.subr.bf16.mxu0 (!%p2200_p10), %v2615_v22  ;;  %v3051_v56 = vld [vmem:[%s3536_s2 + $0x18] sm:$0xff] (!%p2200_p10)  ;;  %v3087_v22 = vld [vmem:[%s3536_s2 + $0x48] sm:$0xff] (!%p2200_p10) }
 0x143   : > { %v979_v54 = vld [vmem:[#allocation2 + $0x20] sm:$0xff] (!%p2200_p10) }
 0x144   : > { %945 = vst [vmem:[#allocation2 + $0x30] sm:$0xff] %v929_v59  ;;  %953 = vst [vmem:[#allocation2 + $0x70] sm:$0xff] %v937_v60  ;;  %v930_v63 = vadd.f32 %v2370_v61, %v625_v55  ;;  %v938_v0 = vadd.f32 %v2394_v62, %v633_v57  ;;  %1064 = vperm.xlu1 (!%p2200_p10), %2606, %v1002_v19   ;;  %1059 = vperm.xlu0 (!%p2200_p10), %2605, %v1001_v21   ;;  %v3046_v55 = vld [vmem:[%s3536_s2 + $0x10] sm:$0xff] (!%p2200_p10)  ;;  %v3082_v21 = vld [vmem:[%s3536_s2 + $0x40] sm:$0xff] (!%p2200_p10) }
 0x145   : > { %2404 = vmatpush3.bf16.msra.mxu0 (!%p2200_p10), %v2616_v23  ;;  %v980_v52 = vld [vmem:[#allocation2 + $0x28] sm:$0xff] (!%p2200_p10)  ;;  %v1104_v59 = vpack.c.bf16 (!%p2200_p10), %v3051_v56, %v3046_v55 }
 0x146   : > { %946 = vst [vmem:[#allocation2 + $0x38] sm:$0xff] %v930_v63  ;;  %954 = vst [vmem:[#allocation2 + $0x78] sm:$0xff] %v938_v0  ;;  %2405 = vmatprep.subr.bf16.mxu0 (!%p2200_p10), %v2617_v26 }
 0x148   : > { %1074 = vperm.xlu1 %2606, %v1004_v24   ;;  %1069 = vperm.xlu0 %2605, %v1003_v25   ;;  %v1107_v25 = vpack.c.bf16 %v3087_v22, %v3082_v21 }
 0x149   : > { %2406 = vmatpush3.bf16.msra.mxu0 %v2618_v27 }
 0x14a   : > { %2407 = vmatprep.subr.bf16.mxu0 %v2619_v30  ;;  %v987_v30 = vld [vmem:[#allocation2 + $0x60] sm:$0xff] }
 0x14b   : > { %v981_v0 = vld [vmem:[#allocation2 + $0x30] sm:$0xff] }
 0x14c   : > { %1084 = vperm.xlu1 %2606, %v1006_v28   ;;  %1079 = vperm.xlu0 %2605, %v1005_v29   ;;  %v988_v28 = vld [vmem:[#allocation2 + $0x68] sm:$0xff] }
 0x14d   : > { %2408 = vmatpush3.bf16.msra.mxu0 %v2620_v31  ;;  %v982_v62 = vld [vmem:[#allocation2 + $0x38] sm:$0xff]  ;;  %v3094_v31 = vld [vmem:[%s3536_s2 + $0x50] sm:$0xff] }
 0x14e   : > { %2409 = vmatprep.subr.bf16.mxu0 %v2621_v32  ;;  %v3099_v32 = vld [vmem:[%s3536_s2 + $0x58] sm:$0xff] }
 0x151   : > { %2410 = vmatpush3.bf16.msra.mxu0 %v2622_v33 }
 0x1af   : > { %v1020_v34 = vpop.permute.xlu1 %1019  ;;  %v1010_v36 = vpop.permute.xlu0 %1009 }
 0x1b0   : > { %v1089_v40 = vmul.f32 %v1020_v34, %v977_v35  ;;  %v1087_v45 = vmul.f32 %v1010_v36, %v975_v37  ;;  %v1108_v35 = vpack.c.bf16 %v3099_v32, %v3094_v31 }
 0x1b3   : > { %v1025_v43 = vpop.permute.xlu1 %1024  ;;  %v1015_v44 = vpop.permute.xlu0 %1014 }
 0x1b4   : > { %v1090_v46 = vmul.f32 %v1025_v43, %v978_v38  ;;  %v1088_v47 = vmul.f32 %v1015_v44, %v976_v39  ;;  %v990_v38 = vld [vmem:[#allocation2 + $0x78] sm:$0xff]  ;;  %v3106_v43 = vld [vmem:[%s3536_s2 + $0x60] sm:$0xff]  ;;  %v3111_v44 = vld [vmem:[%s3536_s2 + $0x68] sm:$0xff] }
 0x1b6   : > { %v1112_v49 = vpack.c.bf16 %v1090_v46, %v1089_v40  ;;  %v1111_v50 = vpack.c.bf16 %v1088_v47, %v1087_v45  ;;  %v989_v40 = vld [vmem:[#allocation2 + $0x70] sm:$0xff]  ;;  %v1109_v47 = vpack.c.bf16 %v3111_v44, %v3106_v43 }
 0x1b7   : > { %v1035_v51 = vpop.permute.xlu1 %1034  ;;  %v1030_v53 = vpop.permute.xlu0 %1029 }
 0x1b8   : > { %1286 = vmatprep.mubr.bf16.mxu0 %v1111_v50  ;;  %v1092_v57 = vmul.f32 %v1035_v51, %v980_v52  ;;  %v1091_v58 = vmul.f32 %v1030_v53, %v979_v54  ;;  %v3123_v50 = vld [vmem:[%s3536_s2 + $0x78] sm:$0xff]  ;;  %v2623_v52 = vld [vmem:[%s3540_s6] sm:$0xff]   ;;  %v2624_v53 = vld [vmem:[%s3540_s6 + $0x8] sm:$0xff]  }
 0x1b9   : > { %1287 = vmatmul.mubr.bf16.vlgmr.msra.gmra.mrb[0].mxu0 %v1103_v48  ;;  %2475 = vmatprep.subr.bf16.mxu1 %v2623_v52  ;;  %v2625_v54 = vld [vmem:[%s3540_s6 + $0x10] sm:$0xff]  }
 0x1ba   : > { %1294 = vmatprep.mubr.bf16.mxu0 %v1112_v49  ;;  %v1113_v60 = vpack.c.bf16 %v1092_v57, %v1091_v58  ;;  %v3118_v49 = vld [vmem:[%s3536_s2 + $0x70] sm:$0xff]  ;;  %2476 = vmatpush3.bf16.msra.mxu1 %v2623_v52  ;;  %v2626_v57 = vld [vmem:[%s3540_s6 + $0x18] sm:$0xff]   ;;  %v2627_v58 = vld [vmem:[%s3540_s6 + $0x20] sm:$0xff]  }
 0x1bb   : > { %v1045_v61 = vpop.permute.xlu1 %1044  ;;  %v1040_v63 = vpop.permute.xlu0 %1039  ;;  %v1110_v51 = vpack.c.bf16 %v3123_v50, %v3118_v49  ;;  %2477 = vmatprep.subr.bf16.mxu1 %v2624_v53 }
 0x1bc   : > { %v1094_v3 = vmul.f32 %v1045_v61, %v982_v62  ;;  %v1093_v4 = vmul.f32 %v1040_v63, %v981_v0  ;;  %v2630_v61 = vld [vmem:[%s3540_s6 + $0x38] sm:$0xff]   ;;  %v3154_v63 = vld [vmem:[%s3539_s5] ss:$0 sm:$0xff] }
 0x1be   : > { %v1114_v6 = vpack.c.bf16 %v1094_v3, %v1093_v4  ;;  %2478 = vmatpush3.bf16.msra.mxu1 %v2624_v53 }
 0x1bf   : > { %v1055_v7 = vpop.permute.xlu1 %1054  ;;  %v1050_v9 = vpop.permute.xlu0 %1049  ;;  %2479 = vmatprep.subr.bf16.mxu1 %v2625_v54 }
 0x1c0   : > { %v1096_v13 = vmul.f32 %v1055_v7, %v984_v8  ;;  %v1095_v14 = vmul.f32 %v1050_v9, %v983_v10 }
 0x1c1   : > { %1295 = vmatmul.mubr.bf16.gmra.mrb[4].mxu0 %v1104_v59  ;;  %v2628_v59 = vld [vmem:[%s3540_s6 + $0x28] sm:$0xff]  }
 0x1c2   : > { %1302 = vmatprep.mubr.bf16.mxu0 %v1113_v60  ;;  %v1115_v16 = vpack.c.bf16 %v1096_v13, %v1095_v14  ;;  %2480 = vmatpush3.bf16.msra.mxu1 %v2625_v54  ;;  %v2629_v60 = vld [vmem:[%s3540_s6 + $0x30] sm:$0xff]  }
 0x1c3   : > { %v1065_v17 = vpop.permute.xlu1 %1064  ;;  %v1060_v19 = vpop.permute.xlu0 %1059  ;;  %2481 = vmatprep.subr.bf16.mxu1 %v2626_v57 }
 0x1c4   : > { %v1098_v23 = vmul.f32 %v1065_v17, %v986_v18  ;;  %v1097_v24 = vmul.f32 %v1060_v19, %v985_v20 }
 0x1c6   : > { %v1116_v26 = vpack.c.bf16 %v1098_v23, %v1097_v24  ;;  %2482 = vmatpush3.bf16.msra.mxu1 %v2626_v57 }
 0x1c7   : > { %v1075_v27 = vpop.permute.xlu1 %1074  ;;  %v1070_v29 = vpop.permute.xlu0 %1069  ;;  %2483 = vmatprep.subr.bf16.mxu1 %v2627_v58 }
 0x1c8   : > { %v1100_v33 = vmul.f32 %v1075_v27, %v988_v28  ;;  %v1099_v34 = vmul.f32 %v1070_v29, %v987_v30 }
 0x1c9   : > { %1303 = vmatmul.mubr.bf16.gmra.mrb[8].mxu0 %v1105_v5 }
 0x1ca   : > { %1310 = vmatprep.mubr.bf16.mxu0 %v1114_v6  ;;  %v1117_v36 = vpack.c.bf16 %v1100_v33, %v1099_v34  ;;  %2484 = vmatpush3.bf16.msra.mxu1 %v2627_v58 }
 0x1cb   : > { %v1085_v37 = vpop.permute.xlu1 %1084  ;;  %v1080_v39 = vpop.permute.xlu0 %1079  ;;  %2485 = vmatprep.subr.bf16.mxu1 %v2628_v59 }
 0x1cc   : > { %v1102_v45 = vmul.f32 %v1085_v37, %v990_v38  ;;  %v1101_v46 = vmul.f32 %v1080_v39, %v989_v40 }
 0x1ce   : > { %v1118_v48 = vpack.c.bf16 %v1102_v45, %v1101_v46  ;;  %2486 = vmatpush3.bf16.msra.mxu1 %v2628_v59 }
 0x1cf   : > { %2487 = vmatprep.subr.bf16.mxu1 %v2629_v60 }
 0x1d1   : > { %1311 = vmatmul.mubr.bf16.gmra.mrb[12].mxu0 %v1106_v15 }
 0x1d2   : > { %1318 = vmatprep.mubr.bf16.mxu0 %v1115_v16  ;;  %2488 = vmatpush3.bf16.msra.mxu1 %v2629_v60 }
 0x1d3   : > { %2489 = vmatprep.subr.bf16.mxu1 %v2630_v61 }
 0x1d6   : > { %2490 = vmatpush3.bf16.msra.mxu1 %v2630_v61 }
 0x1d9   : > { %1319 = vmatmul.mubr.bf16.gmra.mrb[16].mxu0 %v1107_v25 }
 0x1da   : > { %1326 = vmatprep.mubr.bf16.mxu0 %v1116_v26 }
 0x1e1   : > { %1327 = vmatmul.mubr.bf16.gmra.mrb[20].mxu0 %v1108_v35 }
 0x1e2   : > { %1334 = vmatprep.mubr.bf16.mxu0 %v1117_v36 }
 0x1e9   : > { %1335 = vmatmul.mubr.bf16.gmra.mrb[24].mxu0 %v1109_v47 }
 0x1ea   : > { %1342 = vmatprep.mubr.bf16.mxu0 %v1118_v48 }
 0x1f1   : > { %1343 = vmatmul.mubr.bf16.gmra.mrb[28].mxu0 %v1110_v51 }
 0x28c   : > { %v2411_v62 = vpop.f32.mrb[0].mxu0 }
 0x28d   : > { %v2412_v0 = vpop.f32.mrb[1].mxu0 }
 0x28e   : > { %v2413_v3 = vadd.f32 %v2412_v0, %v2411_v62  ;;  %v2414_v4 = vpop.f32.mrb[2].mxu0 }
 0x28f   : > { %v2415_v5 = vpop.f32.mrb[3].mxu0 }
 0x290   : > { %v1289_v6 = vadd.f32 %v2413_v3, %v3154_v63  ;;  %v2416_v7 = vadd.f32 %v2415_v5, %v2414_v4 }
 0x292   : > { %v2218_v8 = vmul.f32 -1.442695, %v1289_v6  ;;  %v1292_v9 = vadd.f32 %v2416_v7, %v3154_v63 }
 0x294   : > { %2631 = vpow2.f32 %v2218_v8  ;;  %v2219_v10 = vmul.f32 -1.442695, %v1292_v9  ;;  %v2417_v13 = vpop.f32.mrb[4].mxu0 }
 0x295   : > { %v2418_v14 = vpop.f32.mrb[5].mxu0 }
 0x296   : > { %2633 = vpow2.f32 %v2219_v10  ;;  %v2419_v15 = vadd.f32 %v2418_v14, %v2417_v13  ;;  %v2420_v16 = vpop.f32.mrb[6].mxu0 }
 0x297   : > { %v2421_v17 = vpop.f32.mrb[7].mxu0 }
 0x298   : > { %v3159_v18 = vadd.f32 %v2419_v15, %v3154_v63  ;;  %v2422_v19 = vadd.f32 %v2421_v17, %v2420_v16 }
 0x29a   : > { %v2220_v20 = vmul.f32 -1.442695, %v3159_v18  ;;  %v3163_v23 = vadd.f32 %v2422_v19, %v3154_v63 }
 0x29c   : > { %2635 = vpow2.f32 %v2220_v20  ;;  %v2221_v24 = vmul.f32 -1.442695, %v3163_v23  ;;  %v2423_v25 = vpop.f32.mrb[8].mxu0 }
 0x29d   : > { %v2424_v26 = vpop.f32.mrb[9].mxu0 }
 0x29e   : > { %v2632_v27 = vpop.eup %2631  ;;  %2637 = vpow2.f32 %v2221_v24  ;;  %v2425_v28 = vadd.f32 %v2424_v26, %v2423_v25  ;;  %v2426_v29 = vpop.f32.mrb[10].mxu0 }
 0x29f   : > { %v1399_v30 = vadd.f32 1.0, %v2632_v27  ;;  %v2427_v33 = vpop.f32.mrb[11].mxu0 }
 0x2a0   : > { %v2634_v34 = vpop.eup %2633  ;;  %v3167_v35 = vadd.f32 %v2425_v28, %v3154_v63  ;;  %v2428_v36 = vadd.f32 %v2427_v33, %v2426_v29 }
 0x2a1   : > { %2639 = vrcp.f32 %v1399_v30  ;;  %v1400_v37 = vadd.f32 1.0, %v2634_v34 }
 0x2a2   : > { %v2222_v38 = vmul.f32 -1.442695, %v3167_v35  ;;  %v3171_v39 = vadd.f32 %v2428_v36, %v3154_v63 }
 0x2a3   : > { %2641 = vrcp.f32 %v1400_v37 }
 0x2a4   : > { %2643 = vpow2.f32 %v2222_v38  ;;  %v2223_v40 = vmul.f32 -1.442695, %v3171_v39  ;;  %v2429_v45 = vpop.f32.mrb[12].mxu0 }
 0x2a5   : > { %v2430_v46 = vpop.f32.mrb[13].mxu0 }
 0x2a6   : > { %v2636_v47 = vpop.eup %2635  ;;  %2645 = vpow2.f32 %v2223_v40  ;;  %v2431_v48 = vadd.f32 %v2430_v46, %v2429_v45  ;;  %v2432_v51 = vpop.f32.mrb[14].mxu0 }
 0x2a7   : > { %v1401_v52 = vadd.f32 1.0, %v2636_v47  ;;  %v2433_v53 = vpop.f32.mrb[15].mxu0 }
 0x2a8   : > { %v2638_v54 = vpop.eup %2637  ;;  %v3175_v57 = vadd.f32 %v2431_v48, %v3154_v63  ;;  %v2434_v58 = vadd.f32 %v2433_v53, %v2432_v51 }
 0x2a9   : > { %2647 = vrcp.f32 %v1401_v52  ;;  %v1402_v59 = vadd.f32 1.0, %v2638_v54 }
 0x2aa   : > { %v2224_v60 = vmul.f32 -1.442695, %v3175_v57  ;;  %v3179_v61 = vadd.f32 %v2434_v58, %v3154_v63 }
 0x2ab   : > { %v2640_v62 = vpop.eup %2639  ;;  %2649 = vrcp.f32 %v1402_v59 }
 0x2ac   : > { %2651 = vpow2.f32 %v2224_v60  ;;  %v2225_v0 = vmul.f32 -1.442695, %v3179_v61  ;;  %v2435_v3 = vpop.f32.mrb[16].mxu0  ;;  %v1447_v13 = vmul.f32 %v2640_v62, %v1289_v6 }
 0x2ad   : > { %v2642_v4 = vpop.eup %2641  ;;  %v2436_v5 = vpop.f32.mrb[17].mxu0 }
 0x2ae   : > { %v2644_v7 = vpop.eup %2643  ;;  %2653 = vpow2.f32 %v2225_v0  ;;  %v2437_v8 = vadd.f32 %v2436_v5, %v2435_v3  ;;  %v2438_v10 = vpop.f32.mrb[18].mxu0  ;;  %v1448_v14 = vmul.f32 %v2642_v4, %v1292_v9 }
 0x2af   : > { %v1403_v15 = vadd.f32 1.0, %v2644_v7  ;;  %v2439_v16 = vpop.f32.mrb[19].mxu0 }
 0x2b0   : > { %v2646_v17 = vpop.eup %2645  ;;  %v3183_v19 = vadd.f32 %v2437_v8, %v3154_v63  ;;  %v2440_v20 = vadd.f32 %v2439_v16, %v2438_v10  ;;  %v1463_v24 = vpack.c.bf16 %v1448_v14, %v1447_v13 }
 0x2b1   : > { %2655 = vrcp.f32 %v1403_v15  ;;  %v1404_v25 = vadd.f32 1.0, %v2646_v17 }
 0x2b2   : > { %v2226_v26 = vmul.f32 -1.442695, %v3183_v19  ;;  %v3187_v27 = vadd.f32 %v2440_v20, %v3154_v63  ;;  %2491 = vmatprep.mubr.bf16.mxu1 %v1463_v24 }
 0x2b3   : > { %v2648_v28 = vpop.eup %2647  ;;  %2657 = vrcp.f32 %v1404_v25 }
 0x2b4   : > { %2659 = vpow2.f32 %v2226_v26  ;;  %v2227_v6 = vmul.f32 -1.442695, %v3187_v27  ;;  %v2441_v9 = vpop.f32.mrb[20].mxu0  ;;  %v1449_v34 = vmul.f32 %v2648_v28, %v3159_v18 }
 0x2b5   : > { %v2650_v29 = vpop.eup %2649  ;;  %v2442_v30 = vpop.f32.mrb[21].mxu0 }
 0x2b6   : > { %v2652_v33 = vpop.eup %2651  ;;  %v1450_v36 = vmul.f32 %v2650_v29, %v3163_v23  ;;  %2661 = vpow2.f32 %v2227_v6  ;;  %v2443_v37 = vadd.f32 %v2442_v30, %v2441_v9  ;;  %v2444_v38 = vpop.f32.mrb[22].mxu0 }
 0x2b7   : > { %v1405_v40 = vadd.f32 1.0, %v2652_v33  ;;  %v2445_v45 = vpop.f32.mrb[23].mxu0 }
 0x2b8   : > { %v2654_v46 = vpop.eup %2653  ;;  %v3193_v47 = vadd.f32 %v2443_v37, %v3154_v63  ;;  %v2446_v48 = vadd.f32 %v2445_v45, %v2444_v38  ;;  %v1464_v51 = vpack.c.bf16 %v1450_v36, %v1449_v34 }
 0x2b9   : > { %2663 = vrcp.f32 %v1405_v40  ;;  %v1406_v52 = vadd.f32 1.0, %v2654_v46 }
 0x2ba   : > { %v2228_v53 = vmul.f32 -1.442695, %v3193_v47  ;;  %v3197_v54 = vadd.f32 %v2446_v48, %v3154_v63  ;;  %2492 = vmatmul.mubr.bf16.vlgmr.msra.gmra.mrb[0].mxu1 %v1464_v51 }
 0x2bb   : > { %v2656_v18 = vpop.eup %2655  ;;  %2665 = vrcp.f32 %v1406_v52 }
 0x2bc   : > { %2667 = vpow2.f32 %v2228_v53  ;;  %v2229_v23 = vmul.f32 -1.442695, %v3197_v54  ;;  %v2447_v58 = vpop.f32.mrb[24].mxu0  ;;  %v1451_v0 = vmul.f32 %v2656_v18, %v3167_v35 }
 0x2bd   : > { %v2658_v59 = vpop.eup %2657  ;;  %v2448_v60 = vpop.f32.mrb[25].mxu0 }
 0x2be   : > { %v2660_v62 = vpop.eup %2659  ;;  %v1452_v3 = vmul.f32 %v2658_v59, %v3171_v39  ;;  %2669 = vpow2.f32 %v2229_v23  ;;  %v2449_v4 = vadd.f32 %v2448_v60, %v2447_v58  ;;  %v2450_v5 = vpop.f32.mrb[26].mxu0 }
 0x2bf   : > { %v1407_v7 = vadd.f32 1.0, %v2660_v62  ;;  %v2451_v8 = vpop.f32.mrb[27].mxu0 }
 0x2c0   : > { %v2662_v10 = vpop.eup %2661  ;;  %v1337_v13 = vadd.f32 %v2449_v4, %v3154_v63  ;;  %v2452_v14 = vadd.f32 %v2451_v8, %v2450_v5  ;;  %v1465_v15 = vpack.c.bf16 %v1452_v3, %v1451_v0 }
 0x2c1   : > { %2671 = vrcp.f32 %v1407_v7  ;;  %v1408_v16 = vadd.f32 1.0, %v2662_v10 }
 0x2c2   : > { %v2230_v17 = vmul.f32 -1.442695, %v1337_v13  ;;  %v1340_v20 = vadd.f32 %v2452_v14, %v3154_v63  ;;  %2495 = vmatprep.mubr.bf16.mxu1 %v1465_v15 }
 0x2c3   : > { %v2664_v24 = vpop.eup %2663  ;;  %2673 = vrcp.f32 %v1408_v16 }
 0x2c4   : > { %2675 = vpow2.f32 %v2230_v17  ;;  %v2231_v35 = vmul.f32 -1.442695, %v1340_v20  ;;  %v2453_v39 = vpop.f32.mrb[28].mxu0  ;;  %v1453_v6 = vmul.f32 %v2664_v24, %v3175_v57 }
 0x2c5   : > { %v2666_v25 = vpop.eup %2665  ;;  %v2454_v26 = vpop.f32.mrb[29].mxu0 }
 0x2c6   : > { %v2668_v28 = vpop.eup %2667  ;;  %v1454_v9 = vmul.f32 %v2666_v25, %v3179_v61  ;;  %2677 = vpow2.f32 %v2231_v35  ;;  %v2455_v29 = vadd.f32 %v2454_v26, %v2453_v39  ;;  %v2456_v30 = vpop.f32.mrb[30].mxu0 }
 0x2c7   : > { %v1409_v33 = vadd.f32 1.0, %v2668_v28  ;;  %v2457_v34 = vpop.f32.mrb[31].mxu0 }
 0x2c8   : > { %v2670_v36 = vpop.eup %2669  ;;  %v1345_v37 = vadd.f32 %v2455_v29, %v3154_v63  ;;  %v2458_v38 = vadd.f32 %v2457_v34, %v2456_v30  ;;  %v1466_v40 = vpack.c.bf16 %v1454_v9, %v1453_v6 }
 0x2c9   : > { %2679 = vrcp.f32 %v1409_v33  ;;  %v1410_v45 = vadd.f32 1.0, %v2670_v36 }
 0x2ca   : > { %v2232_v46 = vmul.f32 -1.442695, %v1345_v37  ;;  %v1348_v48 = vadd.f32 %v2458_v38, %v3154_v63  ;;  %2496 = vmatmul.mubr.bf16.gmra.mrb[4].mxu1 %v1466_v40 }
 0x2cb   : > { %v2672_v51 = vpop.eup %2671  ;;  %2681 = vrcp.f32 %v1410_v45 }
 0x2cc   : > { %2683 = vpow2.f32 %v2232_v46  ;;  %v2233_v57 = vmul.f32 -1.442695, %v1348_v48  ;;  %v1455_v53 = vmul.f32 %v2672_v51, %v3183_v19 }
 0x2cd   : > { %v2674_v61 = vpop.eup %2673 }
 0x2ce   : > { %v2676_v52 = vpop.eup %2675  ;;  %v1456_v18 = vmul.f32 %v2674_v61, %v3187_v27  ;;  %2685 = vpow2.f32 %v2233_v57 }
 0x2cf   : > { %v1411_v23 = vadd.f32 1.0, %v2676_v52 }
 0x2d0   : > { %v2678_v58 = vpop.eup %2677  ;;  %v1467_v59 = vpack.c.bf16 %v1456_v18, %v1455_v53 }
 0x2d1   : > { %2687 = vrcp.f32 %v1411_v23  ;;  %v1412_v60 = vadd.f32 1.0, %v2678_v58 }
 0x2d2   : > { %2499 = vmatprep.mubr.bf16.mxu1 %v1467_v59 }
 0x2d3   : > { %v2680_v62 = vpop.eup %2679  ;;  %2689 = vrcp.f32 %v1412_v60 }
 0x2d4   : > { %v1457_v3 = vmul.f32 %v2680_v62, %v3193_v47 }
 0x2d5   : > { %v2682_v63 = vpop.eup %2681 }
 0x2d6   : > { %v2684_v0 = vpop.eup %2683  ;;  %v1458_v4 = vmul.f32 %v2682_v63, %v3197_v54  ;;  %v3215_v54 = vld [vmem:[%s3541_s7] ss:$0 sm:$0xff] }
 0x2d7   : > { %v1413_v5 = vadd.f32 1.0, %v2684_v0 }
 0x2d8   : > { %v2686_v7 = vpop.eup %2685  ;;  %v1468_v19 = vpack.c.bf16 %v1458_v4, %v1457_v3 }
 0x2d9   : > { %2691 = vrcp.f32 %v1413_v5  ;;  %v1414_v27 = vadd.f32 1.0, %v2686_v7 }
 0x2da   : > { %2500 = vmatmul.mubr.bf16.gmra.mrb[8].mxu1 %v1468_v19 }
 0x2db   : > { %v2688_v8 = vpop.eup %2687  ;;  %2693 = vrcp.f32 %v1414_v27 }
 0x2dc   : > { %v1459_v14 = vmul.f32 %v2688_v8, %v1337_v13 }
 0x2dd   : > { %v2690_v10 = vpop.eup %2689 }
 0x2de   : > { %v1460_v15 = vmul.f32 %v2690_v10, %v1340_v20 }
 0x2e0   : > { %v1469_v16 = vpack.c.bf16 %v1460_v15, %v1459_v14 }
 0x2e2   : > { %2503 = vmatprep.mubr.bf16.mxu1 %v1469_v16 }
 0x2e3   : > { %v2692_v17 = vpop.eup %2691 }
 0x2e4   : > { %v1461_v35 = vmul.f32 %v2692_v17, %v1345_v37 }
 0x2e5   : > { %v2694_v24 = vpop.eup %2693 }
 0x2e6   : > { %v1462_v39 = vmul.f32 %v2694_v24, %v1348_v48 }
 0x2e8   : > { %v1470_v47 = vpack.c.bf16 %v1462_v39, %v1461_v35 }
 0x2ea   : > { %2504 = vmatmul.mubr.bf16.gmra.mrb[12].mxu1 %v1470_v47 }
 0x38d   : > { %v2493_v25 = vpop.f32.mrb[0].mxu1 }
 0x38e   : > { %v1585_v26 = vadd.f32 %v2493_v25, %v3215_v54  ;;  %v1576_v28 = vpop.f32.mrb[1].mxu1 }
 0x38f   : > { %v2494_v6 = vpop.f32.mrb[2].mxu1  ;;  %v1577_v20 = vadd.f32 %v3215_v54, %v1576_v28 }
 0x390   : > { %v3219_v13 = vadd.f32 %v1585_v26, %v3046_v55  ;;  %v1579_v9 = vpop.f32.mrb[3].mxu1  ;;  %v1588_v34 = vadd.f32 %v2494_v6, %v3215_v54 }
 0x391   : > { %v1580_v29 = vadd.f32 %v3215_v54, %v1579_v9  ;;  %v3227_v33 = vadd.f32 %v1577_v20, %v3034_v41 }
 0x392   : > { %1661 = vadd.xlane.f32.xlu0 %v3219_v13  ;;  %v1707_v30 = vmul.f32 %v3219_v13, %v3219_v13  ;;  %v3235_v55 = vadd.f32 %v1588_v34, %v3051_v56 }
 0x393   : > { %v3231_v36 = vadd.f32 %v1580_v29, %v3039_v42  ;;  %v1705_v37 = vmul.f32 %v3227_v33, %v3227_v33 }
 0x394   : > { %1725 = vadd.xlane.f32.xlu1 %v1707_v30  ;;  %v1708_v41 = vmul.f32 %v3235_v55, %v3235_v55 }
 0x395   : > { %v1706_v57 = vmul.f32 %v3231_v36, %v3231_v36 }
 0x396   : > { %1657 = vadd.xlane.f32.xlu0 %v3227_v33 }
 0x398   : > { %1659 = vadd.xlane.f32.xlu1 %v3231_v36 }
 0x39a   : > { %1663 = vadd.xlane.f32.xlu0 %v3235_v55 }
 0x39c   : > { %1721 = vadd.xlane.f32.xlu1 %v1705_v37 }
 0x39d   : > { %v2497_v38 = vpop.f32.mrb[4].mxu1 }
 0x39e   : > { %v1601_v42 = vadd.f32 %v2497_v38, %v3215_v54  ;;  %v1592_v40 = vpop.f32.mrb[5].mxu1  ;;  %1727 = vadd.xlane.f32.xlu0 %v1708_v41 }
 0x39f   : > { %v2498_v45 = vpop.f32.mrb[6].mxu1  ;;  %v1593_v46 = vadd.f32 %v3215_v54, %v1592_v40 }
 0x3a0   : > { %v3245_v56 = vadd.f32 %v1601_v42, %v3070_v11  ;;  %v1604_v48 = vadd.f32 %v2498_v45, %v3215_v54  ;;  %v1595_v51 = vpop.f32.mrb[7].mxu1 }
 0x3a1   : > { %v3253_v61 = vadd.f32 %v1593_v46, %v3058_v1  ;;  %v1596_v11 = vadd.f32 %v3215_v54, %v1595_v51 }
 0x3a2   : > { %1723 = vadd.xlane.f32.xlu0 %v1706_v57  ;;  %1669 = vadd.xlane.f32.xlu1 %v3245_v56  ;;  %v3256_v52 = vadd.f32 %v1604_v48, %v3075_v12  ;;  %v1711_v18 = vmul.f32 %v3245_v56, %v3245_v56 }
 0x3a3   : > { %v3262_v53 = vadd.f32 %v1596_v11, %v3063_v2  ;;  %v1709_v12 = vmul.f32 %v3253_v61, %v3253_v61 }
 0x3a4   : > { %v1712_v1 = vmul.f32 %v3256_v52, %v3256_v52 }
 0x3a5   : > { %v1710_v3 = vmul.f32 %v3262_v53, %v3262_v53 }
 0x3a6   : > { %1671 = vadd.xlane.f32.xlu0 %v3256_v52  ;;  %1665 = vadd.xlane.f32.xlu1 %v3253_v61 }
 0x3aa   : > { %1667 = vadd.xlane.f32.xlu0 %v3262_v53  ;;  %1733 = vadd.xlane.f32.xlu1 %v1711_v18 }
 0x3ad   : > { %v2501_v23 = vpop.f32.mrb[8].mxu1 }
 0x3ae   : > { %v1617_v58 = vadd.f32 %v2501_v23, %v3215_v54  ;;  %v1608_v59 = vpop.f32.mrb[9].mxu1  ;;  %1735 = vadd.xlane.f32.xlu0 %v1712_v1  ;;  %1729 = vadd.xlane.f32.xlu1 %v1709_v12 }
 0x3af   : > { %v2502_v2 = vpop.f32.mrb[10].mxu1  ;;  %v1609_v62 = vadd.f32 %v3215_v54, %v1608_v59 }
 0x3b0   : > { %v3273_v60 = vadd.f32 %v1617_v58, %v3094_v31  ;;  %v1620_v63 = vadd.f32 %v2502_v2, %v3215_v54  ;;  %v1611_v0 = vpop.f32.mrb[11].mxu1 }
 0x3b1   : > { %v3281_v4 = vadd.f32 %v1609_v62, %v3082_v21  ;;  %v1612_v31 = vadd.f32 %v3215_v54, %v1611_v0 }
 0x3b2   : > { %1731 = vadd.xlane.f32.xlu0 %v1710_v3  ;;  %1677 = vadd.xlane.f32.xlu1 %v3273_v60  ;;  %v3284_v5 = vadd.f32 %v1620_v63, %v3099_v32  ;;  %v1715_v19 = vmul.f32 %v3273_v60, %v3273_v60 }
 0x3b3   : > { %v3290_v7 = vadd.f32 %v1612_v31, %v3087_v22  ;;  %v1713_v32 = vmul.f32 %v3281_v4, %v3281_v4 }
 0x3b4   : > { %v1716_v21 = vmul.f32 %v3284_v5, %v3284_v5 }
 0x3b5   : > { %v1714_v24 = vmul.f32 %v3290_v7, %v3290_v7 }
 0x3b6   : > { %1679 = vadd.xlane.f32.xlu0 %v3284_v5  ;;  %1673 = vadd.xlane.f32.xlu1 %v3281_v4 }
 0x3ba   : > { %1675 = vadd.xlane.f32.xlu0 %v3290_v7  ;;  %1741 = vadd.xlane.f32.xlu1 %v1715_v19 }
 0x3bd   : > { %v2505_v27 = vpop.f32.mrb[12].mxu1 }
 0x3be   : > { %v1633_v8 = vadd.f32 %v2505_v27, %v3215_v54  ;;  %v1624_v10 = vpop.f32.mrb[13].mxu1  ;;  %1743 = vadd.xlane.f32.xlu0 %v1716_v21  ;;  %1737 = vadd.xlane.f32.xlu1 %v1713_v32  ;;  %v3337_v27 = vld [vmem:[%s3542_s8] ss:$0 sm:$0xff] }
 0x3bf   : > { %v2506_v22 = vpop.f32.mrb[14].mxu1  ;;  %v1625_v15 = vadd.f32 %v3215_v54, %v1624_v10 }
 0x3c0   : > { %v3301_v14 = vadd.f32 %v1633_v8, %v3118_v49  ;;  %v1636_v16 = vadd.f32 %v2506_v22, %v3215_v54  ;;  %v1627_v17 = vpop.f32.mrb[15].mxu1 }
 0x3c1   : > { %v3309_v35 = vadd.f32 %v1625_v15, %v3106_v43  ;;  %v1628_v49 = vadd.f32 %v3215_v54, %v1627_v17  ;;  %v3344_v15 = vld [vmem:[%s3543_s9] ss:$0 sm:$0xff] }
 0x3c2   : > { %1739 = vadd.xlane.f32.xlu0 %v1714_v24  ;;  %1685 = vadd.xlane.f32.xlu1 %v3301_v14  ;;  %v3312_v39 = vadd.f32 %v1636_v16, %v3123_v50  ;;  %v1719_v50 = vmul.f32 %v3301_v14, %v3301_v14 }
 0x3c3   : > { %v3318_v47 = vadd.f32 %v1628_v49, %v3111_v44  ;;  %v1717_v25 = vmul.f32 %v3309_v35, %v3309_v35 }
 0x3c4   : > { %v1720_v54 = vmul.f32 %v3312_v39, %v3312_v39 }
 0x3c5   : > { %v1718_v43 = vmul.f32 %v3318_v47, %v3318_v47 }
 0x3c6   : > { %1687 = vadd.xlane.f32.xlu0 %v3312_v39  ;;  %1681 = vadd.xlane.f32.xlu1 %v3309_v35 }
 0x3ca   : > { %1683 = vadd.xlane.f32.xlu0 %v3318_v47  ;;  %1745 = vadd.xlane.f32.xlu1 %v1717_v25 }
 0x3ce   : > { %1747 = vadd.xlane.f32.xlu0 %v1718_v43  ;;  %1749 = vadd.xlane.f32.xlu1 %v1719_v50 }
 0x3d2   : > { %1751 = vadd.xlane.f32.xlu0 %v1720_v54 }
 0x41f   : > { %v1662_v44 = vpop.xlane.xlu0 %1661 }
 0x420   : > { %v1691_v26 = vmul.f32 0.03125, %v1662_v44 }
 0x421   : > { %v1726_v28 = vpop.xlane.xlu1 %1725 }
 0x422   : > { %v1771_v6 = vmul.f32 %v1691_v26, %v1691_v26  ;;  %v1755_v20 = vmul.f32 0.03125, %v1726_v28  ;;  %v1819_v31 = vsub.f32 %v3219_v13, %v1691_v26 }
 0x423   : > { %v1658_v9 = vpop.xlane.xlu0 %1657 }
 0x424   : > { %v1787_v29 = vsub.f32 %v1755_v20, %v1771_v6  ;;  %v1689_v37 = vmul.f32 0.03125, %v1658_v9 }
 0x425   : > { %v1660_v30 = vpop.xlane.xlu1 %1659 }
 0x426   : > { %v1803_v34 = vmax.f32 %v1787_v29, 0.0  ;;  %v1769_v45 = vmul.f32 %v1689_v37, %v1689_v37  ;;  %v3329_v51 = vmul.f32 0.03125, %v1660_v30  ;;  %v1817_v26 = vsub.f32 %v3227_v33, %v1689_v37 }
 0x427   : > { %v1664_v41 = vpop.xlane.xlu0 %1663 }
 0x428   : > { %v1835_v38 = vadd.f32 1e-05, %v1803_v34  ;;  %v1692_v42 = vmul.f32 0.03125, %v1664_v41  ;;  %v1770_v59 = vmul.f32 %v3329_v51, %v3329_v51 }
 0x429   : > { %v1722_v40 = vpop.xlane.xlu1 %1721 }
 0x42a   : > { %2695 = vrsqrt.f32 %v1835_v38  ;;  %v1753_v46 = vmul.f32 0.03125, %v1722_v40  ;;  %v1772_v57 = vmul.f32 %v1692_v42, %v1692_v42  ;;  %v1820_v40 = vsub.f32 %v3235_v55, %v1692_v42 }
 0x42b   : > { %v1728_v48 = vpop.xlane.xlu0 %1727  ;;  %v1818_v55 = vsub.f32 %v3231_v36, %v3329_v51 }
 0x42c   : > { %v1785_v11 = vsub.f32 %v1753_v46, %v1769_v45  ;;  %v1756_v18 = vmul.f32 0.03125, %v1728_v48 }
 0x42e   : > { %v1801_v1 = vmax.f32 %v1785_v11, 0.0  ;;  %v1788_v12 = vsub.f32 %v1756_v18, %v1772_v57 }
 0x42f   : > { %v1724_v23 = vpop.xlane.xlu0 %1723  ;;  %v1670_v58 = vpop.xlane.xlu1 %1669 }
 0x430   : > { %v1833_v2 = vadd.f32 1e-05, %v1801_v1  ;;  %v1804_v62 = vmax.f32 %v1788_v12, 0.0  ;;  %v1754_v63 = vmul.f32 0.03125, %v1724_v23  ;;  %v3339_v10 = vmul.f32 0.03125, %v1670_v58 }
 0x432   : > { %2697 = vrsqrt.f32 %v1833_v2  ;;  %v1836_v0 = vadd.f32 1e-05, %v1804_v62  ;;  %v1786_v3 = vsub.f32 %v1754_v63, %v1770_v59  ;;  %v1775_v25 = vmul.f32 %v3339_v10, %v3339_v10 }
 0x433   : > { %v1672_v19 = vpop.xlane.xlu0 %1671  ;;  %v1666_v21 = vpop.xlane.xlu1 %1665 }
 0x434   : > { %v2696_v32 = vpop.eup %2695  ;;  %2699 = vrsqrt.f32 %v1836_v0  ;;  %v1802_v8 = vmax.f32 %v1786_v3, 0.0  ;;  %v3347_v17 = vmul.f32 0.03125, %v1672_v19  ;;  %v3351_v43 = vmul.f32 0.03125, %v1666_v21 }
 0x435   : > { %v1867_v22 = vmul.f32 %v2696_v32, %v1819_v31 }
 0x436   : > { %v1834_v16 = vadd.f32 1e-05, %v1802_v8  ;;  %v1776_v28 = vmul.f32 %v3347_v17, %v3347_v17  ;;  %v1773_v30 = vmul.f32 %v3351_v43, %v3351_v43 }
 0x437   : > { %v1889_v13 = vmul.f32 %v3337_v27, %v1867_v22  ;;  %v1668_v24 = vpop.xlane.xlu0 %1667  ;;  %v1734_v49 = vpop.xlane.xlu1 %1733 }
 0x438   : > { %2701 = vrsqrt.f32 %v1834_v16  ;;  %v1759_v50 = vmul.f32 0.03125, %v1734_v49  ;;  %v3360_v6 = vmul.f32 0.03125, %v1668_v24 }
 0x439   : > { %v1911_v54 = vadd.f32 %v3344_v15, %v1889_v13 }
 0x43a   : > { %v1791_v44 = vsub.f32 %v1759_v50, %v1775_v25  ;;  %v1774_v18 = vmul.f32 %v3360_v6, %v3360_v6 }
 0x43b   : > { %1927 = vst [vmem:[%s3544_s10 + $0x10] sm:$0xff] %v1911_v54  ;;  %v1736_v20 = vpop.xlane.xlu0 %1735  ;;  %v1730_v9 = vpop.xlane.xlu1 %1729 }
 0x43c   : > { %v2698_v29 = vpop.eup %2697  ;;  %v1807_v34 = vmax.f32 %v1791_v44, 0.0  ;;  %v1760_v41 = vmul.f32 0.03125, %v1736_v20  ;;  %v1757_v38 = vmul.f32 0.03125, %v1730_v9 }
 0x43d   : > { %v1865_v45 = vmul.f32 %v2698_v29, %v1817_v26 }
 0x43e   : > { %v2700_v46 = vpop.eup %2699  ;;  %v1839_v48 = vadd.f32 1e-05, %v1807_v34  ;;  %v1792_v33 = vsub.f32 %v1760_v41, %v1776_v28  ;;  %v1789_v37 = vsub.f32 %v1757_v38, %v1773_v30  ;;  %v1823_v28 = vsub.f32 %v3245_v56, %v3339_v10 }
 0x43f   : > { %v1887_v57 = vmul.f32 %v3337_v27, %v1865_v45  ;;  %v1868_v11 = vmul.f32 %v2700_v46, %v1820_v40  ;;  %v1732_v1 = vpop.xlane.xlu0 %1731  ;;  %v1678_v12 = vpop.xlane.xlu1 %1677  ;;  %v1824_v56 = vsub.f32 %v3256_v52, %v3347_v17 }
 0x440   : > { %2703 = vrsqrt.f32 %v1839_v48  ;;  %v1808_v23 = vmax.f32 %v1792_v33, 0.0  ;;  %v1805_v58 = vmax.f32 %v1789_v37, 0.0  ;;  %v1758_v59 = vmul.f32 0.03125, %v1732_v1 }
 0x441   : > { %v1909_v42 = vadd.f32 %v3344_v15, %v1887_v57  ;;  %v1890_v2 = vmul.f32 %v3337_v27, %v1868_v11  ;;  %v3376_v36 = vmul.f32 0.03125, %v1678_v12  ;;  %v1821_v37 = vsub.f32 %v3253_v61, %v3351_v43 }
 0x442   : > { %v2702_v62 = vpop.eup %2701  ;;  %v1840_v63 = vadd.f32 1e-05, %v1808_v23  ;;  %v1837_v0 = vadd.f32 1e-05, %v1805_v58  ;;  %v1790_v3 = vsub.f32 %v1758_v59, %v1774_v18 }
 0x443   : > { %1925 = vst [vmem:[%s3544_s10] sm:$0xff] %v1909_v42  ;;  %v1912_v31 = vadd.f32 %v3344_v15, %v1890_v2  ;;  %v1866_v19 = vmul.f32 %v2702_v62, %v1818_v55  ;;  %v1680_v21 = vpop.xlane.xlu0 %1679  ;;  %v1674_v32 = vpop.xlane.xlu1 %1673  ;;  %v1779_v50 = vmul.f32 %v3376_v36, %v3376_v36 }
 0x444   : > { %2705 = vrsqrt.f32 %v1840_v63  ;;  %v1806_v8 = vmax.f32 %v1790_v3, 0.0  ;;  %v3386_v24 = vmul.f32 0.03125, %v1680_v21  ;;  %v3390_v44 = vmul.f32 0.03125, %v1674_v32 }
 0x445   : > { %1928 = vst [vmem:[%s3544_s10 + $0x18] sm:$0xff] %v1912_v31  ;;  %v2292_v51 = vpack.c.bf16 %v1912_v31, %v1911_v54  ;;  %v1888_v22 = vmul.f32 %v3337_v27, %v1866_v19  ;;  %2707 = vrsqrt.f32 %v1837_v0 }
 0x446   : > { %v1838_v16 = vadd.f32 1e-05, %v1806_v8  ;;  %v1780_v30 = vmul.f32 %v3386_v24, %v3386_v24  ;;  %v1777_v38 = vmul.f32 %v3390_v44, %v3390_v44 }
 0x447   : > { %2324 = vst [vmem:[%s3545_s11 + $0x8] sm:$0xff] %v2292_v51   ;;  %v1910_v13 = vadd.f32 %v3344_v15, %v1888_v22  ;;  %v1676_v49 = vpop.xlane.xlu0 %1675  ;;  %v1742_v25 = vpop.xlane.xlu1 %1741 }
 0x448   : > { %2709 = vrsqrt.f32 %v1838_v16  ;;  %v1763_v54 = vmul.f32 0.03125, %v1742_v25  ;;  %v3407_v48 = vmul.f32 0.03125, %v1676_v49 }
 0x449   : > { %1926 = vst [vmem:[%s3544_s10 + $0x8] sm:$0xff] %v1910_v13  ;;  %v2287_v26 = vpack.c.bf16 %v1910_v13, %v1909_v42  ;;  %v1822_v42 = vsub.f32 %v3262_v53, %v3360_v6 }
 0x44a   : > { %v2704_v20 = vpop.eup %2703  ;;  %v1795_v9 = vsub.f32 %v1763_v54, %v1779_v50  ;;  %v1778_v43 = vmul.f32 %v3407_v48, %v3407_v48 }
 0x44b   : > { %2288 = vst [vmem:[%s3545_s11] sm:$0xff] %v2287_v26   ;;  %v1871_v29 = vmul.f32 %v2704_v20, %v1823_v28  ;;  %v1744_v34 = vpop.xlane.xlu0 %1743  ;;  %v1738_v41 = vpop.xlane.xlu1 %1737 }
 0x44c   : > { %v1811_v40 = vmax.f32 %v1795_v9, 0.0  ;;  %v1764_v45 = vmul.f32 0.03125, %v1744_v34  ;;  %v1761_v46 = vmul.f32 0.03125, %v1738_v41 }
 0x44d   : > { %v1893_v10 = vmul.f32 %v3337_v27, %v1871_v29  ;;  %v1827_v29 = vsub.f32 %v3273_v60, %v3376_v36  ;;  %v1828_v60 = vsub.f32 %v3284_v5, %v3386_v24 }
 0x44e   : > { %v2706_v33 = vpop.eup %2705  ;;  %v1843_v57 = vadd.f32 1e-05, %v1811_v40  ;;  %v1796_v11 = vsub.f32 %v1764_v45, %v1780_v30  ;;  %v1793_v18 = vsub.f32 %v1761_v46, %v1777_v38 }
 0x44f   : > { %v2708_v1 = vpop.eup %2707  ;;  %v1915_v12 = vadd.f32 %v3344_v15, %v1893_v10  ;;  %v1872_v23 = vmul.f32 %v2706_v33, %v1824_v56  ;;  %v1740_v58 = vpop.xlane.xlu0 %1739 }
 0x450   : > { %v1686_v59 = vpop.xlane.xlu1 %1685  ;;  %v1869_v55 = vmul.f32 %v2708_v1, %v1821_v37  ;;  %2711 = vrsqrt.f32 %v1843_v57  ;;  %v1812_v52 = vmax.f32 %v1796_v11, 0.0  ;;  %v1809_v17 = vmax.f32 %v1793_v18, 0.0 }
 0x451   : > { %1931 = vst [vmem:[%s3544_s10 + $0x30] sm:$0xff] %v1915_v12  ;;  %v1894_v61 = vmul.f32 %v3337_v27, %v1872_v23  ;;  %v1762_v2 = vmul.f32 0.03125, %v1740_v58  ;;  %v3436_v25 = vmul.f32 0.03125, %v1686_v59  ;;  %v1825_v11 = vsub.f32 %v3281_v4, %v3390_v44 }
 0x452   : > { %v2710_v62 = vpop.eup %2709  ;;  %v1891_v63 = vmul.f32 %v3337_v27, %v1869_v55  ;;  %v1844_v0 = vadd.f32 1e-05, %v1812_v52  ;;  %v1841_v3 = vadd.f32 1e-05, %v1809_v17  ;;  %v1826_v44 = vsub.f32 %v3290_v7, %v3407_v48 }
 0x453   : > { %v1916_v31 = vadd.f32 %v3344_v15, %v1894_v61  ;;  %v1870_v19 = vmul.f32 %v2710_v62, %v1822_v42  ;;  %v1794_v21 = vsub.f32 %v1762_v2, %v1778_v43  ;;  %v1688_v53 = vpop.xlane.xlu0 %1687  ;;  %v1783_v38 = vmul.f32 %v3436_v25, %v3436_v25 }
 0x454   : > { %v1682_v6 = vpop.xlane.xlu1 %1681  ;;  %v1913_v32 = vadd.f32 %v3344_v15, %v1891_v63  ;;  %2713 = vrsqrt.f32 %v1844_v0  ;;  %v1704_v37 = vmul.f32 0.03125, %v1688_v53 }
 0x455   : > { %1932 = vst [vmem:[%s3544_s10 + $0x38] sm:$0xff] %v1916_v31  ;;  %v2302_v8 = vpack.c.bf16 %v1916_v31, %v1915_v12  ;;  %v1892_v51 = vmul.f32 %v3337_v27, %v1870_v19  ;;  %2715 = vrsqrt.f32 %v1841_v3  ;;  %v1810_v22 = vmax.f32 %v1794_v21, 0.0 }
 0x456   : > { %1929 = vst [vmem:[%s3544_s10 + $0x20] sm:$0xff] %v1913_v32  ;;  %v3430_v16 = vmul.f32 0.03125, %v1682_v6  ;;  %v1784_v24 = vmul.f32 %v1704_v37, %v1704_v37 }
 0x457   : > { %2326 = vst [vmem:[%s3545_s11 + $0x18] sm:$0xff] %v2302_v8   ;;  %v1914_v13 = vadd.f32 %v3344_v15, %v1892_v51  ;;  %v1842_v49 = vadd.f32 1e-05, %v1810_v22  ;;  %v1684_v50 = vpop.xlane.xlu0 %1683 }
 0x458   : > { %v1746_v54 = vpop.xlane.xlu1 %1745  ;;  %v1781_v26 = vmul.f32 %v3430_v16, %v3430_v16  ;;  %v3440_v28 = vmul.f32 0.03125, %v1684_v50  ;;  %v1829_v6 = vsub.f32 %v3309_v35, %v3430_v16  ;;  %v1831_v35 = vsub.f32 %v3301_v14, %v3436_v25 }
 0x459   : > { %v1765_v20 = vmul.f32 0.03125, %v1746_v54  ;;  %1930 = vst [vmem:[%s3544_s10 + $0x28] sm:$0xff] %v1914_v13  ;;  %v2297_v9 = vpack.c.bf16 %v1914_v13, %v1913_v32  ;;  %2717 = vrsqrt.f32 %v1842_v49 }
 0x45a   : > { %v2712_v30 = vpop.eup %2711  ;;  %v1782_v46 = vmul.f32 %v3440_v28, %v3440_v28  ;;  %v1830_v22 = vsub.f32 %v3318_v47, %v3440_v28 }
 0x45b   : > { %v1797_v34 = vsub.f32 %v1765_v20, %v1781_v26  ;;  %2325 = vst [vmem:[%s3545_s11 + $0x10] sm:$0xff] %v2297_v9   ;;  %v1875_v41 = vmul.f32 %v2712_v30, %v1827_v29  ;;  %v1748_v40 = vpop.xlane.xlu0 %1747  ;;  %v1832_v9 = vsub.f32 %v3312_v39, %v1704_v37 }
 0x45c   : > { %v1750_v45 = vpop.xlane.xlu1 %1749  ;;  %v1766_v10 = vmul.f32 0.03125, %v1748_v40 }
 0x45d   : > { %v1813_v56 = vmax.f32 %v1797_v34, 0.0  ;;  %v1767_v33 = vmul.f32 0.03125, %v1750_v45  ;;  %v1897_v36 = vmul.f32 %v3337_v27, %v1875_v41 }
 0x45e   : > { %v2714_v57 = vpop.eup %2713  ;;  %v1798_v1 = vsub.f32 %v1766_v10, %v1782_v46 }
 0x45f   : > { %v1845_v18 = vadd.f32 1e-05, %v1813_v56  ;;  %v1799_v12 = vsub.f32 %v1767_v33, %v1783_v38  ;;  %v2716_v23 = vpop.eup %2715  ;;  %v1919_v58 = vadd.f32 %v3344_v15, %v1897_v36  ;;  %v1876_v59 = vmul.f32 %v2714_v57, %v1828_v60  ;;  %v1752_v55 = vpop.xlane.xlu0 %1751 }
 0x460   : > { %v1873_v52 = vmul.f32 %v2716_v23, %v1825_v11  ;;  %v1814_v17 = vmax.f32 %v1798_v1, 0.0  ;;  %v1768_v4 = vmul.f32 0.03125, %v1752_v55 }
 0x461   : > { %2719 = vrsqrt.f32 %v1845_v18  ;;  %v1815_v42 = vmax.f32 %v1799_v12, 0.0  ;;  %1935 = vst [vmem:[%s3544_s10 + $0x50] sm:$0xff] %v1919_v58  ;;  %v1898_v5 = vmul.f32 %v3337_v27, %v1876_v59 }
 0x462   : > { %v1895_v61 = vmul.f32 %v3337_v27, %v1873_v52  ;;  %v1846_v43 = vadd.f32 1e-05, %v1814_v17  ;;  %v1800_v0 = vsub.f32 %v1768_v4, %v1784_v24 }
 0x463   : > { %v1847_v2 = vadd.f32 1e-05, %v1815_v42  ;;  %v2718_v62 = vpop.eup %2717  ;;  %v1920_v63 = vadd.f32 %v3344_v15, %v1898_v5 }
 0x464   : > { %v1917_v3 = vadd.f32 %v3344_v15, %v1895_v61  ;;  %v1874_v31 = vmul.f32 %v2718_v62, %v1826_v44  ;;  %2721 = vrsqrt.f32 %v1846_v43  ;;  %v1816_v21 = vmax.f32 %v1800_v0, 0.0 }
 0x465   : > { %1936 = vst [vmem:[%s3544_s10 + $0x58] sm:$0xff] %v1920_v63  ;;  %v2312_v19 = vpack.c.bf16 %v1920_v63, %v1919_v58  ;;  %2723 = vrsqrt.f32 %v1847_v2 }
 0x466   : > { %1933 = vst [vmem:[%s3544_s10 + $0x40] sm:$0xff] %v1917_v3  ;;  %v1896_v7 = vmul.f32 %v3337_v27, %v1874_v31  ;;  %v1848_v48 = vadd.f32 1e-05, %v1816_v21 }
 0x467   : > { %2328 = vst [vmem:[%s3545_s11 + $0x28] sm:$0xff] %v2312_v19  }
 0x468   : > { %v1918_v53 = vadd.f32 %v3344_v15, %v1896_v7  ;;  %2725 = vrsqrt.f32 %v1848_v48 }
 0x46a   : > { %1934 = vst [vmem:[%s3544_s10 + $0x48] sm:$0xff] %v1918_v53  ;;  %v2307_v8 = vpack.c.bf16 %v1918_v53, %v1917_v3 }
 0x46b   : > { %v2720_v32 = vpop.eup %2719 }
 0x46c   : > { %v1877_v51 = vmul.f32 %v2720_v32, %v1829_v6  ;;  %2327 = vst [vmem:[%s3545_s11 + $0x20] sm:$0xff] %v2307_v8  }
 0x46e   : > { %v1899_v13 = vmul.f32 %v3337_v27, %v1877_v51  ;;  %v2722_v49 = vpop.eup %2721 }
 0x46f   : > { %v2724_v16 = vpop.eup %2723  ;;  %v1878_v54 = vmul.f32 %v2722_v49, %v1830_v22 }
 0x470   : > { %v1921_v50 = vadd.f32 %v3344_v15, %v1899_v13  ;;  %v1879_v26 = vmul.f32 %v2724_v16, %v1831_v35 }
 0x471   : > { %v1900_v20 = vmul.f32 %v3337_v27, %v1878_v54 }
 0x472   : > { %1937 = vst [vmem:[%s3544_s10 + $0x60] sm:$0xff] %v1921_v50  ;;  %v1901_v47 = vmul.f32 %v3337_v27, %v1879_v26  ;;  %v2726_v28 = vpop.eup %2725 }
 0x473   : > { %v1922_v29 = vadd.f32 %v3344_v15, %v1900_v20  ;;  %v1880_v25 = vmul.f32 %v2726_v28, %v1832_v9 }
 0x474   : > { %v1923_v14 = vadd.f32 %v3344_v15, %v1901_v47 }
 0x475   : > { %1938 = vst [vmem:[%s3544_s10 + $0x68] sm:$0xff] %v1922_v29  ;;  %v2317_v30 = vpack.c.bf16 %v1922_v29, %v1921_v50  ;;  %v1902_v34 = vmul.f32 %v3337_v27, %v1880_v25 }
 0x476   : > { %1939 = vst [vmem:[%s3544_s10 + $0x70] sm:$0xff] %v1923_v14 }
 0x477   : > { %2329 = vst [vmem:[%s3545_s11 + $0x30] sm:$0xff] %v2317_v30   ;;  %v1924_v39 = vadd.f32 %v3344_v15, %v1902_v34 }
 0x479   : > { %1940 = vst [vmem:[%s3544_s10 + $0x78] sm:$0xff] %v1924_v39  ;;  %v2322_v41 = vpack.c.bf16 %v1924_v39, %v1923_v14 }
 0x47b   : > { %2330 = vst [vmem:[%s3545_s11 + $0x38] sm:$0xff] %v2322_v41  }
 0x47c PF: > { %s22_s21 = sadd.s32 1, %s2765_s21   ;;  %s3546_s17 = smov %s2753_s18 }
 0x47d   : > { %p19_p11 = scmp.ge.s32.totalorder %s22_s21, 4   ;;  %s3547_s18 = smov %s2864_s25 }
 0x47e   : > { %s3548_s19 = smov %s2761_s20  ;;  %s3549_s20 = smov %s3551_s22 }
 0x47f   :  { %21 = sbr.rel (!%p19_p11) target bundleno = 3 (0x3), region = 160 }

// kernel: gnn_layer.3
= control target key start
LH: loop header
LB: loop body
LE: loop exit
PB: predicated region body
PF: predicated region fallthrough
CT: control target
= control target key end

     0   :  { %s4386_s13 = smov 0   ;;  %s4388_s14 = smov 0   ;;  %s6007_s0 = inlined_call_operand.vmem [shape: bf16[512,128], index: 0, kind: input, shape index: {}]   ;;  %s6008_s1 = inlined_call_operand.vmem [shape: bf16[128,128], index: 1, kind: input, shape index: {}]   ;;  %s6009_s2 = inlined_call_operand.vmem [shape: f32[512,128], index: 2, kind: input, shape index: {}]   ;;  %s6010_s3 = inlined_call_operand.vmem [shape: f32[512,1], index: 3, kind: input, shape index: {}]   ;;  %s6011_s4 = inlined_call_operand.vmem [shape: bf16[384,128], index: 4, kind: input, shape index: {}]   ;;  %s6012_s5 = inlined_call_operand.vmem [shape: f32[1,128], index: 5, kind: input, shape index: {}]   ;;  %s6013_s6 = inlined_call_operand.vmem [shape: bf16[128,128], index: 6, kind: input, shape index: {}]   ;;  %s6014_s7 = inlined_call_operand.vmem [shape: f32[1,128], index: 7, kind: input, shape index: {}]   ;;  %s6015_s8 = inlined_call_operand.vmem [shape: f32[1,128], index: 8, kind: input, shape index: {}]   ;;  %s6016_s9 = inlined_call_operand.vmem [shape: f32[1,128], index: 9, kind: input, shape index: {}]   ;;  %s6017_s10 = inlined_call_operand.vmem [shape: f32[512,128], index: 10, kind: output, shape index: {}]  }
   0x1   :  { %s4390_s15 = smov 0  }
   0x2 LB: > { %s32_s16 = sadd.s32 1, %s4324_s14  ;;  %p3552_p0 = scmp.ge.s32.totalorder %s4328_s15, 1  ;;  %s4328_s15 = sphi %s4390_s15, %s20_s15   ;;  %s4324_s14 = sphi %s4388_s14, %s6069_s14   ;;  %s4320_s13 = sphi %s4386_s13, %s6068_s13  }
   0x3   : > { %p34_p1 = scmp.ge.s32.totalorder %s32_s16, 2  ;;  %p352_p2 = scmp.lt.s32.totalorder %s4328_s15, 3 }
   0x5   : > { %s6071_s16 = smov (%p34_p1, %s32_s16), 0  ;;  %p353_p3 = pnand %p3552_p0, %p352_p2 }
   0x6   : > { %v4026_v0 = vld [vmem:[%s6008_s1] sm:$0xff] (!%p353_p3)   ;;  %s3553_s19 = sshll.u32 (!%p353_p3), %s4320_s13, 5  ;;  %v4027_v1 = vld [vmem:[%s6008_s1 + $0x8] sm:$0xff] (!%p353_p3)   ;;  %v4028_v2 = vld [vmem:[%s6008_s1 + $0x10] sm:$0xff] (!%p353_p3)   ;;  %v4330_v3 = vmov (!%p353_p3), 0   ;;  %v1244_v25 = vlaneseq (!%p353_p3) }
   0x7   : > { %356 = sbr.rel (%p353_p3) target bundleno = 1019 (0x3fb), region = 60  ;;  %p404_p4 = scmp.lt.s32.totalorder (!%p353_p3), %s3553_s19, 63  ;;  %3839 = vmatprep.subr.bf16.mxu0 (!%p353_p3), %v4026_v0  ;;  %3983 = vmatprep.subr.bf16.mxu1 (!%p353_p3), %v4026_v0  ;;  %v4029_v4 = vld [vmem:[%s6008_s1 + $0x18] sm:$0xff] (!%p353_p3)   ;;  %v4030_v7 = vld [vmem:[%s6008_s1 + $0x20] sm:$0xff] (!%p353_p3)   ;;  %v4031_v8 = vld [vmem:[%s6008_s1 + $0x28] sm:$0xff] (!%p353_p3)  }
   0x8   : > { %3840 = vmatpush3.bf16.msra.mxu0 (!%p353_p3), %v4026_v0  ;;  %3991 = vmatpush3.bf16.msra.mxu1 (!%p353_p3), %v4026_v0  ;;  %v4032_v9 = vld [vmem:[%s6008_s1 + $0x30] sm:$0xff] (!%p353_p3)   ;;  %v4033_v12 = vld [vmem:[%s6008_s1 + $0x38] sm:$0xff] (!%p353_p3)   ;;  %v4050_v24 = vld [vmem:[%s6011_s4 + $0x40] sm:$0xff] (!%p353_p3)   ;;  %v4471_v34 = vshrl.u32 (!%p353_p3), %v1244_v25, 7 }
   0x9   : > { %3841 = vmatprep.subr.bf16.mxu0 (!%p353_p3), %v4027_v1  ;;  %3984 = vmatprep.subr.bf16.mxu1 (!%p353_p3), %v4027_v1  ;;  %v4051_v29 = vld [vmem:[%s6011_s4] sm:$0xff] (!%p353_p3)   ;;  %v4052_v31 = vld [vmem:[%s6011_s4 + $0x48] sm:$0xff] (!%p353_p3)   ;;  %v4054_v38 = vld [vmem:[%s6011_s4 + $0x50] sm:$0xff] (!%p353_p3)  }
   0xa   : > { %4024 = vset.pattern.permute.xlu0 (!%p353_p3), %v4330_v3  ;;  %4025 = vset.pattern.permute.xlu1 (!%p353_p3), %v4330_v3  ;;  %v4053_v36 = vld [vmem:[%s6011_s4 + $0x8] sm:$0xff] (!%p353_p3)   ;;  %v1344_v39 = vadd.s32 (!%p353_p3), 8, %v4471_v34  ;;  %v4055_v42 = vld [vmem:[%s6011_s4 + $0x10] sm:$0xff] (!%p353_p3)   ;;  %v1379_v46 = vand.u32 (!%p353_p3), 1, %v4471_v34  ;;  %v4056_v51 = vld [vmem:[%s6011_s4 + $0x58] sm:$0xff] (!%p353_p3)   ;;  %vm1246_vm0 = vcmp.lt.s32.totalorder (!%p353_p3), %v4471_v34, 7 }
   0xb   : > { %v4057_v52 = vld [vmem:[%s6011_s4 + $0x18] sm:$0xff] (!%p353_p3)   ;;  %v4058_v53 = vld [vmem:[%s6011_s4 + $0x60] sm:$0xff] (!%p353_p3)   ;;  %vm1311_vm1 = vcmp.lt.s32.totalorder (!%p353_p3), %v4471_v34, 1  ;;  %v4068_v61 = vld [vmem:[%s6011_s4 + $0x90] sm:$0xff] (!%p353_p3)  }
   0xc   : > { %3842 = vmatpush3.bf16.msra.mxu0 (!%p353_p3), %v4027_v1  ;;  %3992 = vmatpush3.bf16.msra.mxu1 (!%p353_p3), %v4027_v1  ;;  %v1386_v48 = vand.u32 (!%p353_p3), 1, %v1344_v39  ;;  %vm4514_vm2 = vcmp.eq.s32.totalorder (!%p353_p3), %v1379_v46, 0 }
   0xd   : > { %3843 = vmatprep.subr.bf16.mxu0 (!%p353_p3), %v4028_v2  ;;  %3985 = vmatprep.subr.bf16.mxu1 (!%p353_p3), %v4028_v2 }
   0xe   : > { %s6073_s19 = smov (!%p404_p4, %s3553_s19), 63  ;;  %vm4529_vm3 = vcmp.eq.s32.totalorder %v1386_v48, 0  ;;  %v4065_v48 = vld [vmem:[%s6011_s4 + $0x38] sm:$0xff]  }
   0xf   : > { %s3554_s24 = sshll.u32 %s6073_s19, 2  ;;  %s4426_s12 = sshll.u32 %s6073_s19, 3 }
  0x10   : > { %s4416_s27 = scalar_lea.vmem %s6007_s0, %s3554_s24  ;;  %3844 = vmatpush3.bf16.msra.mxu0 %v4028_v2  ;;  %3993 = vmatpush3.bf16.msra.mxu1 %v4028_v2  ;;  %s4435_s21 = scalar_lea.vmem %s6010_s3, %s4426_s12 }
  0x11   : > { %v4034_v5 = vld [vmem:[%s4416_s27] sm:$0xff]   ;;  %3845 = vmatprep.subr.bf16.mxu0 %v4029_v4  ;;  %3986 = vmatprep.subr.bf16.mxu1 %v4029_v4  ;;  %v990_v11 = vld [vmem:[%s4435_s21 + $0x10] sm:$0xff]  ;;  %v989_v13 = vld [vmem:[%s4435_s21 + $0x8] sm:$0xff]  ;;  %s4495_s25 = scalar_lea.vmem %s6009_s2, %s4426_s12  ;;  %s5739_s30 = scalar_lea.vmem %s6017_s10, %s4426_s12 }
  0x12   : > { %v4035_v6 = vld [vmem:[%s4416_s27 + $0x40] sm:$0xff]   ;;  %3855 = vmatprep.mubr.bf16.mxu0 %v4034_v5  ;;  %1032 = vperm.xlu1 %4025, %v990_v11   ;;  %v991_v14 = vld [vmem:[%s4435_s21 + $0x18] sm:$0xff]  ;;  %v4036_v16 = vld [vmem:[%s4416_s27 + $0x8] sm:$0xff]   ;;  %v1346_v5 = vadd.s32 24, %v4471_v34 }
  0x13   : > { %3871 = vmatprep.mubr.bf16.mxu1 %v4035_v6  ;;  %v988_v10 = vld [vmem:[%s4435_s21] sm:$0xff]  ;;  %v4037_v17 = vld [vmem:[%s4416_s27 + $0x48] sm:$0xff]   ;;  %v994_v19 = vld [vmem:[%s4435_s21 + $0x30] sm:$0xff] }
  0x14   : > { %3846 = vmatpush3.bf16.msra.mxu0 %v4029_v4  ;;  %3994 = vmatpush3.bf16.msra.mxu1 %v4029_v4  ;;  %v992_v15 = vld [vmem:[%s4435_s21 + $0x20] sm:$0xff]  ;;  %v993_v18 = vld [vmem:[%s4435_s21 + $0x28] sm:$0xff]  ;;  %v4038_v20 = vld [vmem:[%s4416_s27 + $0x10] sm:$0xff]   ;;  %v1345_v4 = vadd.s32 16, %v4471_v34 }
  0x15   : > { %3847 = vmatprep.subr.bf16.mxu0 %v4030_v7  ;;  %3987 = vmatprep.subr.bf16.mxu1 %v4030_v7  ;;  %v4039_v21 = vld [vmem:[%s4416_s27 + $0x50] sm:$0xff]   ;;  %v995_v22 = vld [vmem:[%s4435_s21 + $0x38] sm:$0xff]  ;;  %v996_v23 = vld [vmem:[%s4435_s21 + $0x40] sm:$0xff] }
  0x16   : > { %1022 = vperm.xlu0 %4024, %v988_v10   ;;  %1037 = vperm.xlu1 %4025, %v991_v14   ;;  %v4040_v26 = vld [vmem:[%s4416_s27 + $0x18] sm:$0xff]   ;;  %v997_v28 = vld [vmem:[%s4435_s21 + $0x48] sm:$0xff]  ;;  %v4042_v30 = vld [vmem:[%s4416_s27 + $0x20] sm:$0xff]  }
  0x17   : > { %v4041_v27 = vld [vmem:[%s4416_s27 + $0x58] sm:$0xff]   ;;  %v998_v32 = vld [vmem:[%s4435_s21 + $0x50] sm:$0xff]  ;;  %v4043_v33 = vld [vmem:[%s4416_s27 + $0x60] sm:$0xff]  }
  0x18   : > { %3848 = vmatpush3.bf16.msra.mxu0 %v4030_v7  ;;  %3995 = vmatpush3.bf16.msra.mxu1 %v4030_v7  ;;  %v999_v35 = vld [vmem:[%s4435_s21 + $0x58] sm:$0xff]  ;;  %v1000_v37 = vld [vmem:[%s4435_s21 + $0x60] sm:$0xff]  ;;  %v4044_v40 = vld [vmem:[%s4416_s27 + $0x28] sm:$0xff]  }
  0x19   : > { %3849 = vmatprep.subr.bf16.mxu0 %v4031_v8  ;;  %3988 = vmatprep.subr.bf16.mxu1 %v4031_v8  ;;  %v4045_v41 = vld [vmem:[%s4416_s27 + $0x68] sm:$0xff]   ;;  %v4046_v43 = vld [vmem:[%s4416_s27 + $0x30] sm:$0xff]   ;;  %v1003_v49 = vld [vmem:[%s4435_s21 + $0x78] sm:$0xff] }
  0x1a   : > { %1027 = vperm.xlu0 %4024, %v989_v13   ;;  %1047 = vperm.xlu1 %4025, %v993_v18   ;;  %v1001_v44 = vld [vmem:[%s4435_s21 + $0x68] sm:$0xff]  ;;  %v1002_v45 = vld [vmem:[%s4435_s21 + $0x70] sm:$0xff]  ;;  %v1004_v50 = vld [vmem:[%s4435_s21 + $0x80] sm:$0xff] }
  0x1b   : > { %v4047_v47 = vld [vmem:[%s4416_s27 + $0x70] sm:$0xff]   ;;  %v4511_v54 = vld [vmem:[%s4495_s25] sm:$0xff]  ;;  %v4519_v56 = vld [vmem:[%s4495_s25 + $0x8] sm:$0xff] }
  0x1c   : > { %3850 = vmatpush3.bf16.msra.mxu0 %v4031_v8  ;;  %3996 = vmatpush3.bf16.msra.mxu1 %v4031_v8  ;;  %v4522_v57 = vld [vmem:[%s4495_s25 + $0x10] sm:$0xff]  ;;  %v4525_v58 = vld [vmem:[%s4495_s25 + $0xf8] sm:$0xff]  ;;  %v1212_v59 = vrot.slane %v4511_v54, 1  ;;  %v1279_v60 = vrot.slane %v4511_v54, 7  ;;  %v1213_v62 = vrot.slane %v4519_v56, 1  ;;  %v1280_v0 = vrot.slane %v4519_v56, 7 }
  0x1d   : > { %3851 = vmatprep.subr.bf16.mxu0 %v4032_v9  ;;  %3989 = vmatprep.subr.bf16.mxu1 %v4032_v9  ;;  %v1214_v63 = vrot.slane %v4522_v57, 1  ;;  %v1310_v1 = vrot.slane %v4525_v58, 7  ;;  %v4048_v2 = vld [vmem:[%s4416_s27 + $0x38] sm:$0xff]   ;;  %v1005_v6 = vld [vmem:[%s4435_s21 + $0x88] sm:$0xff]  ;;  %v1006_v7 = vld [vmem:[%s4435_s21 + $0x90] sm:$0xff] }
  0x1e   : > { %1042 = vperm.xlu0 %4024, %v992_v15   ;;  %1057 = vperm.xlu1 %4025, %v995_v22   ;;  %v4049_v3 = vld [vmem:[%s4416_s27 + $0x78] sm:$0xff]   ;;  %v4059_v8 = vld [vmem:[%s6011_s4 + $0x20] sm:$0xff]   ;;  %v1277_v10 = vsel %vm1246_vm0, %v1212_v59, %v1213_v62  ;;  %v1342_v11 = vsel %vm1311_vm1, %v1279_v60, %v1280_v0  ;;  %v1009_v25 = vld [vmem:[%s4435_s21 + $0xa8] sm:$0xff] }
  0x1f   : > { %v1007_v15 = vld [vmem:[%s4435_s21 + $0x98] sm:$0xff]  ;;  %v4066_v22 = vld [vmem:[%s6011_s4 + $0x80] sm:$0xff]   ;;  %v4624_v46 = vld [vmem:[%s4495_s25 + $0x30] sm:$0xff] }
  0x20   : > { %3852 = vmatpush3.bf16.msra.mxu0 %v4032_v9  ;;  %3997 = vmatpush3.bf16.msra.mxu1 %v4032_v9  ;;  %v1276_v9 = vsel %vm1246_vm0, %v1213_v62, %v1214_v63 }
  0x21   : > { %3853 = vmatprep.subr.bf16.mxu0 %v4033_v12  ;;  %3990 = vmatprep.subr.bf16.mxu1 %v4033_v12  ;;  %v1792_v14 = vsel %vm4529_vm3, %v1276_v9, %v1342_v11 }
  0x22   : > { %1052 = vperm.xlu0 %4024, %v994_v19   ;;  %1067 = vperm.xlu1 %4025, %v997_v28   ;;  %v4570_v19 = vld [vmem:[%s4495_s25 + $0x18] sm:$0xff] }
  0x23   : > { %v1215_v28 = vrot.slane %v4570_v19, 1 }
  0x24   : > { %3854 = vmatpush3.bf16.msra.mxu0 %v4033_v12  ;;  %3998 = vmatpush3.bf16.msra.mxu1 %v4033_v12  ;;  %v1343_v12 = vsel %vm1311_vm1, %v1310_v1, %v1279_v60  ;;  %v1218_v60 = vrot.slane %v4624_v46, 1 }
  0x25   : > { %3679 = vmatprep.subr.bf16.mxu1 %v4050_v24  ;;  %v1791_v13 = vsel %vm4514_vm2, %v1277_v10, %v1343_v12  ;;  %v1400_v24 = vand.u32 1, %v1346_v5  ;;  %3887 = vmatprep.subr.bf16.mxu0 %v4066_v22  ;;  %v1350_v5 = vadd.s32 56, %v4471_v34 }
  0x26   : > { %1062 = vperm.xlu0 %4024, %v996_v23   ;;  %1077 = vperm.xlu1 %4025, %v999_v35   ;;  %v1839_v18 = vpack.c.bf16 %v1792_v14, %v1791_v13  ;;  %v4061_v23 = vld [vmem:[%s6011_s4 + $0x28] sm:$0xff]   ;;  %v4670_v13 = vld [vmem:[%s4495_s25 + $0x40] sm:$0xff]  ;;  %v1015_v14 = vld [vmem:[%s4435_s21 + $0xd8] sm:$0xff] }
  0x27   : > { %3856 = vmatmul.mubr.bf16.vlgmr.msra.gmra.mrb[0].mxu0 %v4036_v16  ;;  %3872 = vmatmul.mubr.bf16.vlgmr.msra.gmra.mrb[0].mxu1 %v4037_v17  ;;  %v1008_v16 = vld [vmem:[%s4435_s21 + $0xa0] sm:$0xff]  ;;  %v4060_v17 = vld [vmem:[%s6011_s4 + $0x68] sm:$0xff]   ;;  %vm4619_vm5 = vcmp.eq.s32.totalorder %v1400_v24, 0 }
  0x28   : > { %3859 = vmatprep.mubr.bf16.mxu0 %v4038_v20  ;;  %3875 = vmatprep.mubr.bf16.mxu1 %v4039_v21  ;;  %v4573_v20 = vld [vmem:[%s4495_s25 + $0x20] sm:$0xff]  ;;  %v1393_v21 = vand.u32 1, %v1345_v4  ;;  %v4597_v35 = vld [vmem:[%s4495_s25 + $0x28] sm:$0xff]  ;;  %v1349_v4 = vadd.s32 48, %v4471_v34 }
  0x29   : > { %3680 = vmatpush3.bf16.msra.mxu1 %v4051_v29  ;;  %v1216_v29 = vrot.slane %v4573_v20, 1  ;;  %3888 = vmatpush3.bf16.msra.mxu0 %v4066_v22  ;;  %v1217_v55 = vrot.slane %v4597_v35, 1  ;;  %v1283_v62 = vrot.slane %v4573_v20, 7  ;;  %v4070_v24 = vld [vmem:[%s6011_s4 + $0xa0] sm:$0xff]  }
  0x2a   : > { %3681 = vmatprep.subr.bf16.mxu1 %v4052_v31  ;;  %1072 = vperm.xlu0 %4024, %v998_v32   ;;  %v1282_v31 = vrot.slane %v4570_v19, 7  ;;  %v4063_v32 = vld [vmem:[%s6011_s4 + $0x30] sm:$0xff]   ;;  %vm4604_vm4 = vcmp.eq.s32.totalorder %v1393_v21, 0 }
  0x2b   : > { %1087 = vperm.xlu1 %4025, %v1001_v44   ;;  %v1274_v39 = vsel %vm1246_vm0, %v1215_v28, %v1216_v29  ;;  %v1273_v9 = vsel %vm1246_vm0, %v1216_v29, %v1217_v55  ;;  %v1824_v29 = vpack.c.bf16 %v4570_v19, %v4522_v57  ;;  %v4071_v19 = vld [vmem:[%s6011_s4 + $0xa8] sm:$0xff]  }
  0x2c   : > { %v1339_v11 = vsel %vm1311_vm1, %v1282_v31, %v1283_v62 }
  0x2d   : > { %3682 = vmatpush3.bf16.msra.mxu1 %v4053_v36  ;;  %v1347_v36 = vadd.s32 32, %v4471_v34 }
  0x2e   : > { %1082 = vperm.xlu0 %4024, %v1000_v37   ;;  %3683 = vmatprep.subr.bf16.mxu1 %v4054_v38  ;;  %v1348_v37 = vadd.s32 40, %v4471_v34  ;;  %v1011_v38 = vld [vmem:[%s4435_s21 + $0xb8] sm:$0xff] }
  0x2f   : > { %3860 = vmatmul.mubr.bf16.gmra.mrb[4].mxu0 %v4040_v26  ;;  %3876 = vmatmul.mubr.bf16.gmra.mrb[4].mxu1 %v4041_v27  ;;  %v1010_v26 = vld [vmem:[%s4435_s21 + $0xb0] sm:$0xff] }
  0x30   : > { %3863 = vmatprep.mubr.bf16.mxu0 %v4042_v30  ;;  %3879 = vmatprep.mubr.bf16.mxu1 %v4043_v33  ;;  %v4062_v27 = vld [vmem:[%s6011_s4 + $0x70] sm:$0xff]   ;;  %v1281_v30 = vrot.slane %v4522_v57, 7  ;;  %v4064_v33 = vld [vmem:[%s6011_s4 + $0x78] sm:$0xff]  }
  0x31   : > { %3684 = vmatpush3.bf16.msra.mxu1 %v4055_v42  ;;  %1097 = vperm.xlu1 %4025, %v1003_v49   ;;  %v1275_v42 = vsel %vm1246_vm0, %v1214_v63, %v1215_v28  ;;  %v1407_v49 = vand.u32 1, %v1347_v36  ;;  %v1284_v63 = vrot.slane %v4597_v35, 7  ;;  %v1018_v28 = vld [vmem:[%s4435_s21 + $0xf0] sm:$0xff]  ;;  %v4787_v36 = vld [vmem:[%s4495_s25 + $0x80] sm:$0xff] }
  0x32   : > { %1092 = vperm.xlu0 %4024, %v1002_v45   ;;  %3685 = vmatprep.subr.bf16.mxu1 %v4056_v51  ;;  %v1341_v44 = vsel %vm1311_vm1, %v1280_v0, %v1281_v30  ;;  %v1013_v51 = vld [vmem:[%s4435_s21 + $0xc8] sm:$0xff]  ;;  %v1014_v0 = vld [vmem:[%s4435_s21 + $0xd0] sm:$0xff] }
  0x33   : > { %vm4649_vm6 = vcmp.eq.s32.totalorder %v1407_v49, 0  ;;  %v1338_v10 = vsel %vm1311_vm1, %v1283_v62, %v1284_v63  ;;  %v4705_v57 = vld [vmem:[%s4495_s25 + $0x50] sm:$0xff] }
  0x35   : > { %3686 = vmatpush3.bf16.msra.mxu1 %v4057_v52  ;;  %1107 = vperm.xlu1 %4025, %v1005_v6   ;;  %v1793_v52 = vsel %vm4604_vm4, %v1275_v42, %v1341_v44  ;;  %v1272_v6 = vsel %vm1246_vm0, %v1217_v55, %v1218_v60  ;;  %v1019_v42 = vld [vmem:[%s4435_s21 + $0xf8] sm:$0xff]  ;;  %v1222_v44 = vrot.slane %v4705_v57, 1 }
  0x36   : > { %1102 = vperm.xlu0 %4024, %v1004_v50   ;;  %3687 = vmatprep.subr.bf16.mxu1 %v4058_v53  ;;  %v1414_v50 = vand.u32 1, %v1348_v37  ;;  %v4702_v37 = vld [vmem:[%s4495_s25 + $0x48] sm:$0xff] }
  0x37   : > { %3864 = vmatmul.mubr.bf16.gmra.mrb[8].mxu0 %v4044_v40  ;;  %3880 = vmatmul.mubr.bf16.gmra.mrb[8].mxu1 %v4045_v41  ;;  %v4067_v41 = vld [vmem:[%s6011_s4 + $0x88] sm:$0xff]   ;;  %v1351_v40 = vadd.s32 64, %v4471_v34  ;;  %v1288_v49 = vrot.slane %v4702_v37, 7 }
  0x38   : > { %3867 = vmatprep.mubr.bf16.mxu0 %v4046_v43  ;;  %3883 = vmatprep.mubr.bf16.mxu1 %v4047_v47  ;;  %v1340_v43 = vsel %vm1311_vm1, %v1281_v30, %v1282_v31  ;;  %v1012_v47 = vld [vmem:[%s4435_s21 + $0xc0] sm:$0xff]  ;;  %vm4665_vm7 = vcmp.eq.s32.totalorder %v1414_v50, 0 }
  0x39   : > { %3688 = vmatpush3.bf16.msra.mxu1 %v4059_v8  ;;  %1117 = vperm.xlu1 %4025, %v1007_v15   ;;  %v1794_v53 = vsel %vm4619_vm5, %v1274_v39, %v1340_v43  ;;  %v4654_v8 = vld [vmem:[%s4495_s25 + $0x38] sm:$0xff]  ;;  %v1016_v15 = vld [vmem:[%s4435_s21 + $0xe0] sm:$0xff]  ;;  %v1796_v21 = vsel %vm4665_vm7, %v1272_v6, %v1338_v10  ;;  %v1221_v43 = vrot.slane %v4702_v37, 1  ;;  %v1435_v50 = vand.u32 1, %v1351_v40 }
  0x3a   : > { %1112 = vperm.xlu0 %4024, %v1006_v7   ;;  %3689 = vmatprep.subr.bf16.mxu1 %v4060_v17  ;;  %v1428_v17 = vand.u32 1, %v1350_v5  ;;  %v1219_v22 = vrot.slane %v4654_v8, 1  ;;  %v1289_v6 = vrot.slane %v4705_v57, 7  ;;  %v1826_v10 = vpack.c.bf16 %v4654_v8, %v4624_v46 }
  0x3b   : > { %3889 = vmatprep.subr.bf16.mxu0 %v4067_v41  ;;  %v1268_v55 = vsel %vm1246_vm0, %v1221_v43, %v1222_v44  ;;  %vm1767_vm10 = vcmp.eq.s32.totalorder %v1435_v50, 0 }
  0x3c   : > { %3890 = vmatpush3.bf16.msra.mxu0 %v4067_v41  ;;  %vm4697_vm9 = vcmp.eq.s32.totalorder %v1428_v17, 0  ;;  %v1352_v41 = vadd.s32 72, %v4471_v34 }
  0x3d   : > { %3690 = vmatpush3.bf16.msra.mxu1 %v4061_v23  ;;  %1127 = vperm.xlu1 %4025, %v1009_v25   ;;  %v1220_v23 = vrot.slane %v4670_v13, 1  ;;  %v1285_v25 = vrot.slane %v4624_v46, 7  ;;  %v4766_v46 = vld [vmem:[%s4495_s25 + $0x68] sm:$0xff] }
  0x3e   : > { %1122 = vperm.xlu0 %4024, %v1008_v16   ;;  %3691 = vmatprep.subr.bf16.mxu1 %v4062_v27  ;;  %v1421_v16 = vand.u32 1, %v1349_v4  ;;  %v1017_v27 = vld [vmem:[%s4435_s21 + $0xe8] sm:$0xff] }
  0x3f   : > { %3868 = vmatmul.mubr.bf16.gmra.mrb[12].mxu0 %v4048_v2  ;;  %3884 = vmatmul.mubr.bf16.gmra.mrb[12].mxu1 %v4049_v3  ;;  %v1823_v2 = vpack.c.bf16 %v4519_v56, %v4511_v54  ;;  %v1840_v3 = vpack.c.bf16 %v1794_v53, %v1793_v52  ;;  %v4069_v56 = vld [vmem:[%s6011_s4 + $0x98] sm:$0xff]   ;;  %v1270_v31 = vsel %vm1246_vm0, %v1219_v22, %v1220_v23 }
  0x40   : > { %2102 = vmatprep.mubr.bf16.mxu1 %v1839_v18  ;;  %3891 = vmatprep.subr.bf16.mxu0 %v4068_v61  ;;  %v1795_v18 = vsel %vm4649_vm6, %v1273_v9, %v1339_v11  ;;  %vm4693_vm8 = vcmp.eq.s32.totalorder %v1421_v16, 0  ;;  %v1337_v39 = vsel %vm1311_vm1, %v1284_v63, %v1285_v25  ;;  %v1825_v52 = vpack.c.bf16 %v4597_v35, %v4573_v20  ;;  %v4736_v63 = vld [vmem:[%s4495_s25 + $0x58] sm:$0xff] }
  0x41   : > { %3692 = vmatpush3.bf16.msra.mxu1 %v4063_v32  ;;  %1137 = vperm.xlu1 %4025, %v1011_v38   ;;  %v1841_v30 = vpack.c.bf16 %v1796_v21, %v1795_v18  ;;  %v1271_v32 = vsel %vm1246_vm0, %v1218_v60, %v1219_v22  ;;  %v1269_v60 = vsel %vm1246_vm0, %v1220_v23, %v1221_v43  ;;  %v1353_v20 = vadd.s32 80, %v4471_v34 }
  0x42   : > { %1132 = vperm.xlu0 %4024, %v1010_v26   ;;  %3693 = vmatprep.subr.bf16.mxu1 %v4064_v33  ;;  %v1286_v26 = vrot.slane %v4654_v8, 7  ;;  %v1797_v45 = vsel %vm4693_vm8, %v1271_v32, %v1337_v39  ;;  %v1354_v35 = vadd.s32 88, %v4471_v34  ;;  %v1290_v7 = vrot.slane %v4736_v63, 7  ;;  %v4769_v8 = vld [vmem:[%s4495_s25 + $0x70] sm:$0xff]  ;;  %v4784_v33 = vld [vmem:[%s4495_s25 + $0x78] sm:$0xff] }
  0x43   : > { %3892 = vmatpush3.bf16.msra.mxu0 %v4068_v61  ;;  %v1333_v16 = vsel %vm1311_vm1, %v1288_v49, %v1289_v6  ;;  %v1355_v21 = vadd.s32 96, %v4471_v34  ;;  %v1356_v22 = vadd.s32 104, %v4471_v34  ;;  %v1228_v43 = vrot.slane %v4787_v36, 1 }
  0x44   : > { %3893 = vmatprep.subr.bf16.mxu0 %v4069_v56  ;;  %v1336_v38 = vsel %vm1311_vm1, %v1285_v25, %v1286_v26  ;;  %v1456_v9 = vand.u32 1, %v1354_v35  ;;  %v1225_v25 = vrot.slane %v4766_v46, 1  ;;  %v4830_v35 = vld [vmem:[%s4495_s25 + $0x88] sm:$0xff] }
  0x45   : > { %3694 = vmatpush3.bf16.msra.mxu1 %v4065_v48  ;;  %1147 = vperm.xlu1 %4025, %v1013_v51   ;;  %v1287_v48 = vrot.slane %v4670_v13, 7  ;;  %v1442_v51 = vand.u32 1, %v1352_v41 }
  0x46   : > { %1142 = vperm.xlu0 %4024, %v1012_v47   ;;  %v1798_v47 = vsel %vm4697_vm9, %v1270_v31, %v1336_v38  ;;  %vm4761_vm13 = vcmp.eq.s32.totalorder %v1456_v9, 0  ;;  %v1827_v31 = vpack.c.bf16 %v4702_v37, %v4670_v13  ;;  %v1358_v38 = vadd.s32 120, %v4471_v34 }
  0x47   : > { %3894 = vmatpush3.bf16.msra.mxu0 %v4069_v56  ;;  %v1842_v53 = vpack.c.bf16 %v1798_v47, %v1797_v45  ;;  %v1334_v61 = vsel %vm1311_vm1, %v1287_v48, %v1288_v49  ;;  %v1335_v62 = vsel %vm1311_vm1, %v1286_v26, %v1287_v48  ;;  %vm1768_vm11 = vcmp.eq.s32.totalorder %v1442_v51, 0 }
  0x48   : > { %2103 = vmatmul.mubr.bf16.vlgmr.msra.gmra.mrb[16].mxu1 %v1823_v2  ;;  %3895 = vmatprep.subr.bf16.mxu0 %v4070_v24  ;;  %v1223_v2 = vrot.slane %v4736_v63, 1  ;;  %v1799_v4 = vsel %vm1767_vm10, %v1269_v60, %v1335_v62  ;;  %v1800_v5 = vsel %vm1768_vm11, %v1268_v55, %v1334_v61  ;;  %v1449_v56 = vand.u32 1, %v1353_v20 }
  0x49   : > { %2110 = vmatprep.mubr.bf16.mxu1 %v1840_v3  ;;  %1157 = vperm.xlu1 %4025, %v1015_v14   ;;  %v1843_v11 = vpack.c.bf16 %v1800_v5, %v1799_v4  ;;  %v1226_v26 = vrot.slane %v4769_v8, 1  ;;  %v1294_v45 = vrot.slane %v4784_v33, 7  ;;  %v1484_v48 = vand.u32 1, %v1358_v38 }
  0x4a   : > { %1152 = vperm.xlu0 %4024, %v1014_v0   ;;  %v4739_v0 = vld [vmem:[%s4495_s25 + $0x60] sm:$0xff]  ;;  %v1267_v14 = vsel %vm1246_vm0, %v1222_v44, %v1223_v2  ;;  %vm4757_vm12 = vcmp.eq.s32.totalorder %v1449_v56, 0  ;;  %v1293_v44 = vrot.slane %v4769_v8, 7  ;;  %v1828_v51 = vpack.c.bf16 %v4736_v63, %v4705_v57 }
  0x4b   : > { %3896 = vmatpush3.bf16.msra.mxu0 %v4070_v24  ;;  %v1224_v3 = vrot.slane %v4739_v0, 1  ;;  %v1801_v23 = vsel %vm4757_vm12, %v1267_v14, %v1333_v16  ;;  %v1264_v39 = vsel %vm1246_vm0, %v1225_v25, %v1226_v26  ;;  %vm4823_vm3 = vcmp.eq.s32.totalorder %v1484_v48, 0 }
  0x4c   : > { %3897 = vmatprep.subr.bf16.mxu0 %v4071_v19  ;;  %v1328_v61 = vsel %vm1311_vm1, %v1293_v44, %v1294_v45  ;;  %v1359_v57 = vadd.s32 128, %v4471_v34  ;;  %v1360_v63 = vadd.s32 136, %v4471_v34  ;;  %v1229_v5 = vrot.slane %v4830_v35, 1 }
  0x4d   : > { %1167 = vperm.xlu1 %4025, %v1017_v27   ;;  %v1266_v12 = vsel %vm1246_vm0, %v1223_v2, %v1224_v3  ;;  %v1291_v27 = vrot.slane %v4739_v0, 7  ;;  %v1265_v40 = vsel %vm1246_vm0, %v1224_v3, %v1225_v25  ;;  %v4833_v2 = vld [vmem:[%s4495_s25 + $0x90] sm:$0xff]  ;;  %v1296_v56 = vrot.slane %v4830_v35, 7  ;;  %v4873_v25 = vld [vmem:[%s4495_s25 + $0xa0] sm:$0xff] }
  0x4e   : > { %1162 = vperm.xlu0 %4024, %v1016_v15   ;;  %v1332_v15 = vsel %vm1311_vm1, %v1289_v6, %v1290_v7  ;;  %v1230_v6 = vrot.slane %v4833_v2, 1  ;;  %v1491_v9 = vand.u32 1, %v1359_v57  ;;  %v1261_v16 = vsel %vm1246_vm0, %v1228_v43, %v1229_v5 }
  0x4f   : > { %3898 = vmatpush3.bf16.msra.mxu0 %v4071_v19  ;;  %v1802_v24 = vsel %vm4761_vm13, %v1266_v12, %v1332_v15  ;;  %v1357_v19 = vadd.s32 112, %v4471_v34  ;;  %v1331_v13 = vsel %vm1311_vm1, %v1290_v7, %v1291_v27  ;;  %v1295_v7 = vrot.slane %v4787_v36, 7 }
  0x50   : > { %2111 = vmatmul.mubr.bf16.gmra.mrb[20].mxu1 %v1824_v29  ;;  %v1463_v29 = vand.u32 1, %v1355_v21  ;;  %v1844_v32 = vpack.c.bf16 %v1802_v24, %v1801_v23  ;;  %v1829_v12 = vpack.c.bf16 %v4766_v46, %v4739_v0  ;;  %v1260_v15 = vsel %vm1246_vm0, %v1229_v5, %v1230_v6  ;;  %v4870_v24 = vld [vmem:[%s4495_s25 + $0x98] sm:$0xff] }
  0x51   : > { %2118 = vmatprep.mubr.bf16.mxu1 %v1841_v30  ;;  %1177 = vperm.xlu1 %4025, %v1019_v42   ;;  %v1470_v30 = vand.u32 1, %v1356_v22  ;;  %v1227_v42 = vrot.slane %v4784_v33, 1  ;;  %v1477_v47 = vand.u32 1, %v1357_v19  ;;  %v1326_v17 = vsel %vm1311_vm1, %v1295_v7, %v1296_v56  ;;  %v4938_v5 = vld [vmem:[%s4495_s25 + $0xb8] sm:$0xff] }
  0x52   : > { %1172 = vperm.xlu0 %4024, %v1018_v28   ;;  %v1292_v28 = vrot.slane %v4766_v46, 7  ;;  %vm4799_vm14 = vcmp.eq.s32.totalorder %v1463_v29, 0  ;;  %v1327_v18 = vsel %vm1311_vm1, %v1294_v45, %v1295_v7  ;;  %vm4856_vm4 = vcmp.eq.s32.totalorder %v1491_v9, 0  ;;  %v4073_v46 = vld [vmem:[%s6011_s4 + $0xb8] sm:$0xff]   ;;  %v4907_v45 = vld [vmem:[%s4495_s25 + $0xb0] sm:$0xff] }
  0x53   : > { %vm1772_vm15 = vcmp.eq.s32.totalorder %v1470_v30, 0  ;;  %v1803_v49 = vsel %vm4799_vm14, %v1265_v40, %v1331_v13  ;;  %vm4819_vm2 = vcmp.eq.s32.totalorder %v1477_v47, 0  ;;  %v1361_v22 = vadd.s32 144, %v4471_v34 }
  0x54   : > { %v1330_v41 = vsel %vm1311_vm1, %v1291_v27, %v1292_v28  ;;  %v1329_v55 = vsel %vm1311_vm1, %v1292_v28, %v1293_v44  ;;  %v1362_v23 = vadd.s32 152, %v4471_v34  ;;  %v1231_v28 = vrot.slane %v4870_v24, 1  ;;  %v4904_v44 = vld [vmem:[%s4495_s25 + $0xa8] sm:$0xff] }
  0x55   : > { %v1804_v50 = vsel %vm1772_vm15, %v1264_v39, %v1330_v41  ;;  %v1232_v29 = vrot.slane %v4873_v25, 1  ;;  %v1297_v30 = vrot.slane %v4833_v2, 7  ;;  %v1830_v38 = vpack.c.bf16 %v4784_v33, %v4769_v8 }
  0x56   : > { %v1845_v60 = vpack.c.bf16 %v1804_v50, %v1803_v49  ;;  %v1512_v19 = vand.u32 1, %v1362_v23  ;;  %v1259_v41 = vsel %vm1246_vm0, %v1230_v6, %v1231_v28  ;;  %v1363_v8 = vadd.s32 160, %v4471_v34  ;;  %v4941_v6 = vld [vmem:[%s4495_s25 + $0xc0] sm:$0xff] }
  0x57   : > { %v1258_v40 = vsel %vm1246_vm0, %v1231_v28, %v1232_v29  ;;  %v1325_v37 = vsel %vm1311_vm1, %v1296_v56, %v1297_v30  ;;  %v1364_v33 = vadd.s32 168, %v4471_v34  ;;  %v1233_v49 = vrot.slane %v4904_v44, 1 }
  0x58   : > { %2119 = vmatmul.mubr.bf16.gmra.mrb[24].mxu1 %v1825_v52  ;;  %v1262_v52 = vsel %vm1246_vm0, %v1227_v42, %v1228_v43  ;;  %vm4897_vm7 = vcmp.eq.s32.totalorder %v1512_v19, 0  ;;  %v1234_v50 = vrot.slane %v4907_v45, 1  ;;  %v1235_v9 = vrot.slane %v4938_v5, 1 }
  0x59   : > { %2126 = vmatprep.mubr.bf16.mxu1 %v1842_v53  ;;  %v1263_v53 = vsel %vm1246_vm0, %v1226_v26, %v1227_v42  ;;  %v1806_v4 = vsel %vm4823_vm3, %v1262_v52, %v1328_v61  ;;  %v1807_v26 = vsel %vm4856_vm4, %v1261_v16, %v1327_v18  ;;  %v1300_v52 = vrot.slane %v4904_v44, 7 }
  0x5a   : > { %v1805_v3 = vsel %vm4819_vm2, %v1263_v53, %v1329_v55  ;;  %v1519_v53 = vand.u32 1, %v1363_v8  ;;  %v1526_v55 = vand.u32 1, %v1364_v33  ;;  %v1256_v62 = vsel %vm1246_vm0, %v1233_v49, %v1234_v50 }
  0x5b   : > { %v1846_v14 = vpack.c.bf16 %v1806_v4, %v1805_v3  ;;  %v1257_v20 = vsel %vm1246_vm0, %v1232_v29, %v1233_v49  ;;  %v1832_v16 = vpack.c.bf16 %v4870_v24, %v4833_v2  ;;  %v1255_v21 = vsel %vm1246_vm0, %v1234_v50, %v1235_v9 }
  0x5c   : > { %vm4927_vm8 = vcmp.eq.s32.totalorder %v1519_v53, 0  ;;  %vm4931_vm9 = vcmp.eq.s32.totalorder %v1526_v55, 0  ;;  %v1367_v2 = vadd.s32 192, %v4471_v34 }
  0x60   : > { %2127 = vmatmul.mubr.bf16.gmra.mrb[28].mxu1 %v1826_v10  ;;  %v1498_v10 = vand.u32 1, %v1360_v63 }
  0x61   : > { %2134 = vmatprep.mubr.bf16.mxu1 %v1843_v11  ;;  %v4072_v11 = vld [vmem:[%s6011_s4 + $0xb0] sm:$0xff]  }
  0x62   : > { %3899 = vmatprep.subr.bf16.mxu0 %v4072_v11  ;;  %vm4860_vm5 = vcmp.eq.s32.totalorder %v1498_v10, 0  ;;  %v1236_v10 = vrot.slane %v4941_v6, 1 }
  0x63   : > { %3900 = vmatpush3.bf16.msra.mxu0 %v4072_v11  ;;  %v1808_v27 = vsel %vm4860_vm5, %v1260_v15, %v1326_v17  ;;  %v1301_v11 = vrot.slane %v4907_v45, 7 }
  0x64   : > { %3901 = vmatprep.subr.bf16.mxu0 %v4073_v46  ;;  %v1847_v39 = vpack.c.bf16 %v1808_v27, %v1807_v26  ;;  %v1254_v18 = vsel %vm1246_vm0, %v1235_v9, %v1236_v10  ;;  %v4972_v26 = vld [vmem:[%s4495_s25 + $0xc8] sm:$0xff]  ;;  %v4975_v27 = vld [vmem:[%s4495_s25 + $0xd0] sm:$0xff] }
  0x65   : > { %v1304_v19 = vrot.slane %v4972_v26, 7  ;;  %v1305_v53 = vrot.slane %v4975_v27, 7 }
  0x67   : > { %3902 = vmatpush3.bf16.msra.mxu0 %v4073_v46  ;;  %v1321_v46 = vsel %vm1311_vm1, %v1300_v52, %v1301_v11  ;;  %v1317_v4 = vsel %vm1311_vm1, %v1304_v19, %v1305_v53 }
  0x68   : > { %2135 = vmatmul.mubr.bf16.gmra.mrb[32].mxu1 %v1827_v31  ;;  %v1298_v31 = vrot.slane %v4870_v24, 7  ;;  %v1368_v24 = vadd.s32 200, %v4471_v34 }
  0x69   : > { %2142 = vmatprep.mubr.bf16.mxu1 %v1844_v32  ;;  %v1505_v32 = vand.u32 1, %v1361_v22 }
  0x6a   : > { %v1324_v13 = vsel %vm1311_vm1, %v1297_v30, %v1298_v31  ;;  %v1237_v30 = vrot.slane %v4972_v26, 1 }
  0x6b   : > { %vm4893_vm6 = vcmp.eq.s32.totalorder %v1505_v32, 0  ;;  %v1810_v48 = vsel %vm4897_vm7, %v1258_v40, %v1324_v13  ;;  %v1303_v32 = vrot.slane %v4941_v6, 7  ;;  %v1833_v40 = vpack.c.bf16 %v4904_v44, %v4873_v25 }
  0x6c   : > { %v1809_v47 = vsel %vm4893_vm6, %v1259_v41, %v1325_v37  ;;  %v1253_v37 = vsel %vm1246_vm0, %v1236_v10, %v1237_v30  ;;  %v1370_v44 = vadd.s32 216, %v4471_v34 }
  0x6d   : > { %v1848_v61 = vpack.c.bf16 %v1810_v48, %v1809_v47  ;;  %v1318_v42 = vsel %vm1311_vm1, %v1303_v32, %v1304_v19  ;;  %v5006_v47 = vld [vmem:[%s4495_s25 + $0xd8] sm:$0xff]  ;;  %v5009_v48 = vld [vmem:[%s4495_s25 + $0xe0] sm:$0xff] }
  0x6e   : > { %v1306_v55 = vrot.slane %v5006_v47, 7 }
  0x70   : > { %2143 = vmatmul.mubr.bf16.gmra.mrb[36].mxu1 %v1828_v51  ;;  %v1299_v51 = vrot.slane %v4873_v25, 7  ;;  %v1369_v25 = vadd.s32 208, %v4471_v34  ;;  %v1316_v3 = vsel %vm1311_vm1, %v1305_v53, %v1306_v55 }
  0x71   : > { %2150 = vmatprep.mubr.bf16.mxu1 %v1845_v60  ;;  %v1831_v60 = vpack.c.bf16 %v4830_v35, %v4787_v36  ;;  %v1365_v36 = vadd.s32 176, %v4471_v34  ;;  %v1366_v35 = vadd.s32 184, %v4471_v34 }
  0x72   : > { %v1322_v57 = vsel %vm1311_vm1, %v1299_v51, %v1300_v52  ;;  %v1323_v63 = vsel %vm1311_vm1, %v1298_v31, %v1299_v51  ;;  %v1238_v31 = vrot.slane %v4975_v27, 1  ;;  %v1239_v51 = vrot.slane %v5006_v47, 1 }
  0x73   : > { %v1811_v7 = vsel %vm4927_vm8, %v1257_v20, %v1323_v63  ;;  %v1812_v56 = vsel %vm4931_vm9, %v1256_v62, %v1322_v57  ;;  %v1540_v15 = vand.u32 1, %v1366_v35  ;;  %v1240_v52 = vrot.slane %v5009_v48, 1 }
  0x74   : > { %v1849_v17 = vpack.c.bf16 %v1812_v56, %v1811_v7  ;;  %v1252_v13 = vsel %vm1246_vm0, %v1237_v30, %v1238_v31  ;;  %v1834_v62 = vpack.c.bf16 %v4938_v5, %v4907_v45  ;;  %v1251_v63 = vsel %vm1246_vm0, %v1238_v31, %v1239_v51  ;;  %v953_v45 = vld [vmem:[%s4495_s25 + $0xe8] sm:$0xff] }
  0x75   : > { %vm4965_vm11 = vcmp.eq.s32.totalorder %v1540_v15, 0  ;;  %v1250_v57 = vsel %vm1246_vm0, %v1239_v51, %v1240_v52  ;;  %v1371_v7 = vadd.s32 224, %v4471_v34  ;;  %v1372_v56 = vadd.s32 232, %v4471_v34 }
  0x76   : > { %v1308_v15 = vrot.slane %v953_v45, 7  ;;  %v1243_v30 = vrot.slane %v4525_v58, 1  ;;  %v1837_v54 = vpack.c.bf16 %v953_v45, %v5009_v48 }
  0x78   : > { %2151 = vmatmul.mubr.bf16.gmra.mrb[40].mxu1 %v1829_v12  ;;  %v1302_v12 = vrot.slane %v4938_v5, 7  ;;  %v954_v5 = vld [vmem:[%s4495_s25 + $0xf0] sm:$0xff] }
  0x79   : > { %2158 = vmatprep.mubr.bf16.mxu1 %v1846_v14  ;;  %v1533_v14 = vand.u32 1, %v1365_v36  ;;  %v1309_v31 = vrot.slane %v954_v5, 7 }
  0x7a   : > { %v1320_v0 = vsel %vm1311_vm1, %v1301_v11, %v1302_v12  ;;  %v1319_v43 = vsel %vm1311_vm1, %v1302_v12, %v1303_v32  ;;  %v1241_v11 = vrot.slane %v953_v45, 1  ;;  %v1242_v12 = vrot.slane %v954_v5, 1 }
  0x7b   : > { %vm4961_vm10 = vcmp.eq.s32.totalorder %v1533_v14, 0  ;;  %v1814_v29 = vsel %vm4965_vm11, %v1254_v18, %v1320_v0  ;;  %v1307_v14 = vrot.slane %v5009_v48, 7  ;;  %v1835_v18 = vpack.c.bf16 %v4972_v26, %v4941_v6 }
  0x7c   : > { %v1813_v28 = vsel %vm4961_vm10, %v1255_v21, %v1321_v46  ;;  %v1248_v0 = vsel %vm1246_vm0, %v1241_v11, %v1242_v12  ;;  %v1249_v46 = vsel %vm1246_vm0, %v1240_v52, %v1241_v11 }
  0x7d   : > { %v1850_v41 = vpack.c.bf16 %v1814_v29, %v1813_v28  ;;  %v1314_v22 = vsel %vm1311_vm1, %v1307_v14, %v1308_v15  ;;  %v1315_v23 = vsel %vm1311_vm1, %v1306_v55, %v1307_v14 }
  0x80   : > { %2159 = vmatmul.mubr.bf16.gmra.mrb[44].mxu1 %v1830_v38  ;;  %v1547_v38 = vand.u32 1, %v1367_v2  ;;  %v1373_v2 = vadd.s32 240, %v4471_v34 }
  0x81   : > { %2166 = vmatprep.mubr.bf16.mxu1 %v1847_v39  ;;  %v1554_v39 = vand.u32 1, %v1368_v24  ;;  %v1374_v24 = vadd.s32 248, %v4471_v34 }
  0x82   : > { %vm4995_vm12 = vcmp.eq.s32.totalorder %v1547_v38, 0  ;;  %v1589_v32 = vand.u32 1, %v1373_v2  ;;  %v1836_v38 = vpack.c.bf16 %v5006_v47, %v4975_v27  ;;  %v1838_v47 = vpack.c.bf16 %v4525_v58, %v954_v5 }
  0x83   : > { %vm4999_vm13 = vcmp.eq.s32.totalorder %v1554_v39, 0  ;;  %v1815_v49 = vsel %vm4995_vm12, %v1253_v37, %v1319_v43  ;;  %v1596_v19 = vand.u32 1, %v1374_v24  ;;  %v1313_v37 = vsel %vm1311_vm1, %v1308_v15, %v1309_v31 }
  0x84   : > { %v1816_v50 = vsel %vm4999_vm13, %v1252_v13, %v1318_v42  ;;  %v1312_v13 = vsel %vm1311_vm1, %v1309_v31, %v1310_v1  ;;  %vm1789_vm4 = vcmp.eq.s32.totalorder %v1589_v32, 0 }
  0x85   : > { %v1851_v20 = vpack.c.bf16 %v1816_v50, %v1815_v49  ;;  %vm1790_vm5 = vcmp.eq.s32.totalorder %v1596_v19, 0 }
  0x88   : > { %2167 = vmatmul.mubr.bf16.gmra.mrb[48].mxu1 %v1831_v60  ;;  %v1561_v60 = vand.u32 1, %v1369_v25 }
  0x89   : > { %2174 = vmatprep.mubr.bf16.mxu1 %v1848_v61  ;;  %v1568_v61 = vand.u32 1, %v1370_v44 }
  0x8a   : > { %vm5029_vm14 = vcmp.eq.s32.totalorder %v1561_v60, 0 }
  0x8b   : > { %vm5033_vm15 = vcmp.eq.s32.totalorder %v1568_v61, 0  ;;  %v1817_v9 = vsel %vm5029_vm14, %v1251_v63, %v1317_v4 }
  0x8c   : > { %v1818_v10 = vsel %vm5033_vm15, %v1250_v57, %v1316_v3 }
  0x8d   : > { %v1852_v21 = vpack.c.bf16 %v1818_v10, %v1817_v9 }
  0x90   : > { %2175 = vmatmul.mubr.bf16.gmra.mrb[52].mxu1 %v1832_v16  ;;  %v1575_v16 = vand.u32 1, %v1371_v7 }
  0x91   : > { %2182 = vmatprep.mubr.bf16.mxu1 %v1849_v17  ;;  %v1582_v17 = vand.u32 1, %v1372_v56  ;;  %v1033_v26 = vpop.permute.xlu1 %1032 }
  0x92   : > { %vm1787_vm2 = vcmp.eq.s32.totalorder %v1575_v16, 0 }
  0x93   : > { %vm1788_vm3 = vcmp.eq.s32.totalorder %v1582_v17, 0  ;;  %v1819_v28 = vsel %vm1787_vm2, %v1249_v46, %v1315_v23 }
  0x94   : > { %v1820_v29 = vsel %vm1788_vm3, %v1248_v0, %v1314_v22 }
  0x95   : > { %v5058_v6 = vpop.permute.xlu0 %1022  ;;  %v1853_v39 = vpack.c.bf16 %v1820_v29, %v1819_v28  ;;  %v1038_v42 = vpop.permute.xlu1 %1037  ;;  %v4075_v29 = vld [vmem:[%s6013_s6 + $0x8] sm:$0xff]  }
  0x98   : > { %2183 = vmatmul.mubr.bf16.gmra.mrb[56].mxu1 %v1833_v40  ;;  %v1247_v40 = vsel %vm1246_vm0, %v1242_v12, %v1243_v30 }
  0x99   : > { %2190 = vmatprep.mubr.bf16.mxu1 %v1850_v41  ;;  %v1278_v41 = vsel %vm1246_vm0, %v1243_v30, %v1212_v59  ;;  %v1028_v27 = vpop.permute.xlu0 %1027  ;;  %v1821_v43 = vsel %vm1789_vm4, %v1247_v40, %v1313_v37  ;;  %v4074_v59 = vld [vmem:[%s6013_s6] sm:$0xff]   ;;  %v5081_v1 = vpop.permute.xlu1 %1047 }
  0x9a   : > { %v1822_v8 = vsel %vm1790_vm5, %v1278_v41, %v1312_v13  ;;  %3935 = vmatprep.subr.bf16.mxu0 %v4074_v59 }
  0x9b   : > { %v1854_v33 = vpack.c.bf16 %v1822_v8, %v1821_v43 }
  0x9d   : > { %v5079_v25 = vpop.permute.xlu0 %1042  ;;  %v1058_v44 = vpop.permute.xlu1 %1057 }
  0xa0   : > { %2191 = vmatmul.mubr.bf16.gmra.mrb[60].mxu1 %v1834_v62 }
  0xa1   : > { %2198 = vmatprep.mubr.bf16.mxu1 %v1851_v20  ;;  %v1053_v34 = vpop.permute.xlu0 %1052  ;;  %v5086_v48 = vpop.permute.xlu1 %1067 }
  0xa5   : > { %v5084_v49 = vpop.permute.xlu0 %1062  ;;  %v5090_v51 = vpop.permute.xlu1 %1077 }
  0xa8   : > { %2199 = vmatmul.mubr.bf16.gmra.mrb[64].mxu1 %v1835_v18 }
  0xa9   : > { %2206 = vmatprep.mubr.bf16.mxu1 %v1852_v21  ;;  %v5088_v50 = vpop.permute.xlu0 %1072 }
  0xaa   : > { %v5094_v53 = vpop.permute.xlu1 %1087 }
  0xad   : > { %v5092_v52 = vpop.permute.xlu0 %1082 }
  0xb0   : > { %2207 = vmatmul.mubr.bf16.gmra.mrb[68].mxu1 %v1836_v38  ;;  %v5098_v60 = vpop.permute.xlu1 %1097 }
  0xb1   : > { %2214 = vmatprep.mubr.bf16.mxu1 %v1853_v39  ;;  %v5096_v55 = vpop.permute.xlu0 %1092 }
  0xb4   : > { %v1108_v62 = vpop.permute.xlu1 %1107 }
  0xb5   : > { %v1103_v61 = vpop.permute.xlu0 %1102 }
  0xb8   : > { %2215 = vmatmul.mubr.bf16.gmra.mrb[72].mxu1 %v1837_v54  ;;  %v1118_v20 = vpop.permute.xlu1 %1117 }
  0xb9   : > { %2222 = vmatprep.mubr.bf16.mxu1 %v1854_v33  ;;  %v1113_v58 = vpop.permute.xlu0 %1112 }
  0xbc   : > { %v1128_v63 = vpop.permute.xlu1 %1127 }
  0xbd   : > { %v1123_v57 = vpop.permute.xlu0 %1122 }
  0xc0   : > { %2223 = vmatmul.mubr.bf16.gmra.mrb[76].mxu1 %v1838_v47  ;;  %v1138_v4 = vpop.permute.xlu1 %1137 }
  0xc1   : > { %v1133_v3 = vpop.permute.xlu0 %1132 }
  0xc4   : > { %v5102_v35 = vpop.permute.xlu1 %1147 }
  0xc5   : > { %v5100_v36 = vpop.permute.xlu0 %1142 }
  0xc8   : > { %v1158_v28 = vpop.permute.xlu1 %1157 }
  0xfa   : > { %v3857_v45 = vpop.f32.mrb[0].mxu0  ;;  %v3873_v5 = vpop.f32.mrb[0].mxu1 }
  0xfb   : > { %v730_v7 = vpop.f32.mrb[1].mxu0  ;;  %v794_v56 = vpop.f32.mrb[1].mxu1  ;;  %v1182_v11 = vmul.f32 %v3857_v45, %v1033_v26  ;;  %v5104_v12 = vmul.f32 %v3873_v5, %v1113_v58 }
  0xfc   : > { %v3858_v9 = vpop.f32.mrb[2].mxu0  ;;  %v3874_v10 = vpop.f32.mrb[2].mxu1  ;;  %v1180_v18 = vmul.f32 %v5058_v6, %v730_v7  ;;  %v5109_v21 = vmul.f32 %v1103_v61, %v794_v56 }
  0xfd   : > { %v1183_v14 = vmul.f32 %v3858_v9, %v1038_v42  ;;  %v5106_v15 = vmul.f32 %v3874_v10, %v1118_v20  ;;  %v733_v16 = vpop.f32.mrb[3].mxu0  ;;  %v797_v17 = vpop.f32.mrb[3].mxu1  ;;  %v4076_v42 = vld [vmem:[%s6013_s6 + $0x10] sm:$0xff]  }
  0xfe   : > { %v1181_v0 = vmul.f32 %v1028_v27, %v733_v16  ;;  %v5111_v46 = vmul.f32 %v1108_v62, %v797_v17  ;;  %v1153_v26 = vpop.permute.xlu0 %1152  ;;  %v1168_v62 = vpop.permute.xlu1 %1167 }
  0xff   : > { %v1856_v22 = vpack.c.bf16 %v1183_v14, %v1182_v11  ;;  %v1864_v23 = vpack.c.bf16 %v5106_v15, %v5104_v12 }
 0x100   : > { %v1855_v2 = vpack.c.bf16 %v1181_v0, %v1180_v18  ;;  %v1863_v24 = vpack.c.bf16 %v5111_v46, %v5109_v21 }
 0x102   : > { %v3861_v6 = vpop.f32.mrb[4].mxu0  ;;  %v3877_v30 = vpop.f32.mrb[4].mxu1  ;;  %3903 = vmatprep.mubr.bf16.mxu0 %v1855_v2 }
 0x103   : > { %v746_v31 = vpop.f32.mrb[5].mxu0  ;;  %v810_v32 = vpop.f32.mrb[5].mxu1  ;;  %3904 = vmatmul.mubr.bf16.vlgmr.msra.gmra.mrb[16].mxu0 %v1856_v22  ;;  %v1186_v39 = vmul.f32 %v3861_v6, %v1053_v34  ;;  %v5120_v40 = vmul.f32 %v3877_v30, %v1133_v3 }
 0x104   : > { %v3862_v19 = vpop.f32.mrb[6].mxu0  ;;  %v3878_v38 = vpop.f32.mrb[6].mxu1  ;;  %3936 = vmatpush3.bf16.msra.mxu0 %v4074_v59  ;;  %v1184_v43 = vmul.f32 %v5079_v25, %v746_v31  ;;  %v5128_v8 = vmul.f32 %v1123_v57, %v810_v32  ;;  %v4077_v25 = vld [vmem:[%s6013_s6 + $0x18] sm:$0xff]  }
 0x105   : > { %v1187_v41 = vmul.f32 %v3862_v19, %v1058_v44  ;;  %v5122_v13 = vmul.f32 %v3878_v38, %v1138_v4  ;;  %v749_v37 = vpop.f32.mrb[7].mxu0  ;;  %v813_v27 = vpop.f32.mrb[7].mxu1  ;;  %3937 = vmatprep.subr.bf16.mxu0 %v4075_v29 }
 0x106   : > { %v1185_v54 = vmul.f32 %v5081_v1, %v749_v37  ;;  %v5131_v59 = vmul.f32 %v1128_v63, %v813_v27  ;;  %v1163_v61 = vpop.permute.xlu0 %1162  ;;  %v1178_v2 = vpop.permute.xlu1 %1177 }
 0x107   : > { %v1858_v33 = vpack.c.bf16 %v1187_v41, %v1186_v39  ;;  %v1866_v34 = vpack.c.bf16 %v5122_v13, %v5120_v40 }
 0x108   : > { %v1857_v44 = vpack.c.bf16 %v1185_v54, %v1184_v43  ;;  %v1865_v47 = vpack.c.bf16 %v5131_v59, %v5128_v8  ;;  %3938 = vmatpush3.bf16.msra.mxu0 %v4075_v29 }
 0x109   : > { %3939 = vmatprep.subr.bf16.mxu0 %v4076_v42 }
 0x10a   : > { %v3865_v58 = vpop.f32.mrb[8].mxu0  ;;  %v3881_v1 = vpop.f32.mrb[8].mxu1  ;;  %3907 = vmatprep.mubr.bf16.mxu0 %v1857_v44 }
 0x10b   : > { %v762_v20 = vpop.f32.mrb[9].mxu0  ;;  %v826_v57 = vpop.f32.mrb[9].mxu1  ;;  %3908 = vmatmul.mubr.bf16.gmra.mrb[20].mxu0 %v1858_v33  ;;  %v1190_v4 = vmul.f32 %v3865_v58, %v5088_v50  ;;  %v1206_v45 = vmul.f32 %v3881_v1, %v1153_v26 }
 0x10c   : > { %v3866_v63 = vpop.f32.mrb[10].mxu0  ;;  %v3882_v3 = vpop.f32.mrb[10].mxu1  ;;  %3940 = vmatpush3.bf16.msra.mxu0 %v4076_v42  ;;  %v1188_v10 = vmul.f32 %v5084_v49, %v762_v20  ;;  %v1204_v11 = vmul.f32 %v5100_v36, %v826_v57 }
 0x10d   : > { %v1191_v5 = vmul.f32 %v3866_v63, %v5090_v51  ;;  %v1207_v7 = vmul.f32 %v3882_v3, %v1158_v28  ;;  %v765_v56 = vpop.f32.mrb[11].mxu0  ;;  %v829_v9 = vpop.f32.mrb[11].mxu1  ;;  %3941 = vmatprep.subr.bf16.mxu0 %v4077_v25 }
 0x10e   : > { %v1189_v14 = vmul.f32 %v5086_v48, %v765_v56  ;;  %v1205_v16 = vmul.f32 %v5102_v35, %v829_v9  ;;  %v1173_v50 = vpop.permute.xlu0 %1172 }
 0x10f   : > { %v1860_v17 = vpack.c.bf16 %v1191_v5, %v1190_v4  ;;  %v1868_v18 = vpack.c.bf16 %v1207_v7, %v1206_v45 }
 0x110   : > { %v1859_v0 = vpack.c.bf16 %v1189_v14, %v1188_v10  ;;  %v1867_v22 = vpack.c.bf16 %v1205_v16, %v1204_v11  ;;  %3942 = vmatpush3.bf16.msra.mxu0 %v4077_v25 }
 0x112   : > { %v3869_v51 = vpop.f32.mrb[12].mxu0  ;;  %v3885_v26 = vpop.f32.mrb[12].mxu1  ;;  %3911 = vmatprep.mubr.bf16.mxu0 %v1859_v0 }
 0x113   : > { %v778_v28 = vpop.f32.mrb[13].mxu0  ;;  %v842_v29 = vpop.f32.mrb[13].mxu1  ;;  %3912 = vmatmul.mubr.bf16.gmra.mrb[24].mxu0 %v1860_v17  ;;  %v1194_v36 = vmul.f32 %v3869_v51, %v5096_v55  ;;  %v1210_v48 = vmul.f32 %v3885_v26, %v1173_v50 }
 0x114   : > { %v3870_v49 = vpop.f32.mrb[14].mxu0  ;;  %v3886_v6 = vpop.f32.mrb[14].mxu1  ;;  %v1192_v19 = vmul.f32 %v5092_v52, %v778_v28  ;;  %v1208_v38 = vmul.f32 %v1163_v61, %v842_v29  ;;  %v4079_v28 = vld [vmem:[%s6013_s6 + $0x28] sm:$0xff]  }
 0x115   : > { %v1195_v35 = vmul.f32 %v3870_v49, %v5098_v60  ;;  %v1211_v30 = vmul.f32 %v3886_v6, %v1178_v2  ;;  %v781_v31 = vpop.f32.mrb[15].mxu0  ;;  %v845_v32 = vpop.f32.mrb[15].mxu1 }
 0x116   : > { %v1193_v39 = vmul.f32 %v5094_v53, %v781_v31  ;;  %v1209_v41 = vmul.f32 %v1168_v62, %v845_v32  ;;  %v4080_v31 = vld [vmem:[%s6013_s6 + $0x30] sm:$0xff]  }
 0x117   : > { %v1862_v37 = vpack.c.bf16 %v1195_v35, %v1194_v36  ;;  %v1870_v27 = vpack.c.bf16 %v1211_v30, %v1210_v48 }
 0x118   : > { %v1861_v42 = vpack.c.bf16 %v1193_v39, %v1192_v19  ;;  %v1869_v43 = vpack.c.bf16 %v1209_v41, %v1208_v38 }
 0x11a   : > { %3915 = vmatprep.mubr.bf16.mxu0 %v1861_v42 }
 0x11b   : > { %3916 = vmatmul.mubr.bf16.gmra.mrb[28].mxu0 %v1862_v37  ;;  %v3695_v55 = vpop.f32.mrb[16].mxu1 }
 0x11c   : > { %3919 = vmatprep.mubr.bf16.mxu0 %v1863_v24  ;;  %v3696_v52 = vpop.f32.mrb[17].mxu1 }
 0x11d   : > { %v5156_v60 = vadd.f32 %v3696_v52, %v3695_v55  ;;  %v3698_v53 = vpop.f32.mrb[18].mxu1 }
 0x11e   : > { %v3699_v8 = vpop.f32.mrb[19].mxu1 }
 0x11f   : > { %v5158_v54 = vadd.f32 %v3699_v8, %v3698_v53 }
 0x123   : > { %3920 = vmatmul.mubr.bf16.gmra.mrb[32].mxu0 %v1864_v23  ;;  %v3701_v59 = vpop.f32.mrb[20].mxu1 }
 0x124   : > { %3923 = vmatprep.mubr.bf16.mxu0 %v1865_v47  ;;  %v3702_v21 = vpop.f32.mrb[21].mxu1 }
 0x125   : > { %v5163_v46 = vadd.f32 %v3702_v21, %v3701_v59  ;;  %v3704_v24 = vpop.f32.mrb[22].mxu1 }
 0x126   : > { %v3705_v12 = vpop.f32.mrb[23].mxu1 }
 0x127   : > { %v5165_v15 = vadd.f32 %v3705_v12, %v3704_v24 }
 0x12b   : > { %3924 = vmatmul.mubr.bf16.gmra.mrb[36].mxu0 %v1866_v34  ;;  %v3707_v23 = vpop.f32.mrb[24].mxu1 }
 0x12c   : > { %3927 = vmatprep.mubr.bf16.mxu0 %v1867_v22  ;;  %v3708_v33 = vpop.f32.mrb[25].mxu1 }
 0x12d   : > { %v5167_v44 = vadd.f32 %v3708_v33, %v3707_v23  ;;  %v3710_v47 = vpop.f32.mrb[26].mxu1 }
 0x12e   : > { %v3711_v61 = vpop.f32.mrb[27].mxu1 }
 0x12f   : > { %v5173_v20 = vadd.f32 %v3711_v61, %v3710_v47 }
 0x133   : > { %3928 = vmatmul.mubr.bf16.gmra.mrb[40].mxu0 %v1868_v18  ;;  %v3713_v62 = vpop.f32.mrb[28].mxu1  ;;  %v4078_v18 = vld [vmem:[%s6013_s6 + $0x20] sm:$0xff]  }
 0x134   : > { %3931 = vmatprep.mubr.bf16.mxu0 %v1869_v43  ;;  %v3714_v40 = vpop.f32.mrb[29].mxu1  ;;  %3943 = vmatprep.subr.bf16.mxu0 %v4078_v18 }
 0x135   : > { %v5169_v13 = vadd.f32 %v3714_v40, %v3713_v62  ;;  %v3716_v34 = vpop.f32.mrb[30].mxu1  ;;  %3944 = vmatpush3.bf16.msra.mxu0 %v4078_v18 }
 0x136   : > { %v3717_v25 = vpop.f32.mrb[31].mxu1  ;;  %3945 = vmatprep.subr.bf16.mxu0 %v4079_v28 }
 0x137   : > { %v5171_v58 = vadd.f32 %v3717_v25, %v3716_v34 }
 0x139   : > { %3946 = vmatpush3.bf16.msra.mxu0 %v4079_v28 }
 0x13a   : > { %3947 = vmatprep.subr.bf16.mxu0 %v4080_v31 }
 0x13b   : > { %3932 = vmatmul.mubr.bf16.gmra.mrb[44].mxu0 %v1870_v27  ;;  %v3719_v1 = vpop.f32.mrb[32].mxu1  ;;  %v4081_v27 = vld [vmem:[%s6013_s6 + $0x38] sm:$0xff]  }
 0x13c   : > { %v3720_v57 = vpop.f32.mrb[33].mxu1 }
 0x13d   : > { %v3722_v63 = vpop.f32.mrb[34].mxu1  ;;  %v5177_v56 = vadd.f32 %v3720_v57, %v3719_v1  ;;  %3948 = vmatpush3.bf16.msra.mxu0 %v4080_v31 }
 0x13e   : > { %v3723_v3 = vpop.f32.mrb[35].mxu1  ;;  %3949 = vmatprep.subr.bf16.mxu0 %v4081_v27 }
 0x13f   : > { %v5181_v14 = vadd.f32 %v3723_v3, %v3722_v63 }
 0x141   : > { %3950 = vmatpush3.bf16.msra.mxu0 %v4081_v27 }
 0x143   : > { %v3725_v4 = vpop.f32.mrb[36].mxu1 }
 0x144   : > { %v3726_v45 = vpop.f32.mrb[37].mxu1 }
 0x145   : > { %v5175_v5 = vadd.f32 %v3726_v45, %v3725_v4  ;;  %v3728_v7 = vpop.f32.mrb[38].mxu1 }
 0x146   : > { %v3729_v9 = vpop.f32.mrb[39].mxu1 }
 0x147   : > { %v5179_v10 = vadd.f32 %v3729_v9, %v3728_v7 }
 0x14b   : > { %v3731_v11 = vpop.f32.mrb[40].mxu1 }
 0x14c   : > { %v3732_v16 = vpop.f32.mrb[41].mxu1 }
 0x14d   : > { %v3734_v17 = vpop.f32.mrb[42].mxu1  ;;  %v5186_v2 = vadd.f32 %v3732_v16, %v3731_v11 }
 0x14e   : > { %v3735_v0 = vpop.f32.mrb[43].mxu1 }
 0x14f   : > { %v5195_v36 = vadd.f32 %v3735_v0, %v3734_v17 }
 0x153   : > { %v3737_v22 = vpop.f32.mrb[44].mxu1 }
 0x154   : > { %v3738_v50 = vpop.f32.mrb[45].mxu1 }
 0x155   : > { %v5188_v51 = vadd.f32 %v3738_v50, %v3737_v22  ;;  %v3740_v26 = vpop.f32.mrb[46].mxu1 }
 0x156   : > { %v3741_v29 = vpop.f32.mrb[47].mxu1 }
 0x157   : > { %v5193_v49 = vadd.f32 %v3741_v29, %v3740_v26 }
 0x15b   : > { %v3743_v6 = vpop.f32.mrb[48].mxu1 }
 0x15c   : > { %v3744_v48 = vpop.f32.mrb[49].mxu1 }
 0x15d   : > { %v3746_v35 = vpop.f32.mrb[50].mxu1  ;;  %v5202_v41 = vadd.f32 %v3744_v48, %v3743_v6 }
 0x15e   : > { %v3747_v30 = vpop.f32.mrb[51].mxu1 }
 0x15f   : > { %v5209_v55 = vadd.f32 %v3747_v30, %v3746_v35  ;;  %v5238_v35 = vld [vmem:[%s6012_s5] ss:$0 sm:$0xff] }
 0x160   : > { %v2113_v30 = vadd.f32 %v5163_v46, %v5238_v35  ;;  %v2116_v31 = vadd.f32 %v5165_v15, %v5238_v35 }
 0x163   : > { %v3749_v32 = vpop.f32.mrb[52].mxu1 }
 0x164   : > { %v3750_v19 = vpop.f32.mrb[53].mxu1 }
 0x165   : > { %v5200_v38 = vadd.f32 %v3750_v19, %v3749_v32  ;;  %v3752_v39 = vpop.f32.mrb[54].mxu1  ;;  %v2105_v19 = vadd.f32 %v5156_v60, %v5238_v35 }
 0x166   : > { %v3753_v37 = vpop.f32.mrb[55].mxu1 }
 0x167   : > { %v5207_v42 = vadd.f32 %v3753_v37, %v3752_v39 }
 0x16b   : > { %v3755_v43 = vpop.f32.mrb[56].mxu1 }
 0x16c   : > { %v3756_v52 = vpop.f32.mrb[57].mxu1 }
 0x16d   : > { %v3758_v53 = vpop.f32.mrb[58].mxu1  ;;  %v5211_v24 = vadd.f32 %v3756_v52, %v3755_v43  ;;  %v2108_v52 = vadd.f32 %v5158_v54, %v5238_v35  ;;  %v2121_v54 = vadd.f32 %v5167_v44, %v5238_v35 }
 0x16e   : > { %v3759_v8 = vpop.f32.mrb[59].mxu1 }
 0x16f   : > { %v5217_v61 = vadd.f32 %v3759_v8, %v3758_v53 }
 0x173   : > { %v3761_v59 = vpop.f32.mrb[60].mxu1 }
 0x174   : > { %v3762_v21 = vpop.f32.mrb[61].mxu1 }
 0x175   : > { %v5213_v12 = vadd.f32 %v3762_v21, %v3761_v59  ;;  %v3764_v23 = vpop.f32.mrb[62].mxu1  ;;  %v2129_v21 = vadd.f32 %v5169_v13, %v5238_v35 }
 0x176   : > { %v3765_v33 = vpop.f32.mrb[63].mxu1 }
 0x177   : > { %v5215_v47 = vadd.f32 %v3765_v33, %v3764_v23  ;;  %v2132_v33 = vadd.f32 %v5171_v58, %v5238_v35 }
 0x17b   : > { %v3767_v62 = vpop.f32.mrb[64].mxu1 }
 0x17c   : > { %v3768_v40 = vpop.f32.mrb[65].mxu1 }
 0x17d   : > { %v3770_v34 = vpop.f32.mrb[66].mxu1  ;;  %v5219_v1 = vadd.f32 %v3768_v40, %v3767_v62  ;;  %v2124_v40 = vadd.f32 %v5173_v20, %v5238_v35  ;;  %v2145_v20 = vadd.f32 %v5175_v5, %v5238_v35 }
 0x17e   : > { %v3771_v25 = vpop.f32.mrb[67].mxu1 }
 0x17f   : > { %v5221_v57 = vadd.f32 %v3771_v25, %v3770_v34 }
 0x183   : > { %v3773_v63 = vpop.f32.mrb[68].mxu1 }
 0x184   : > { %v3774_v3 = vpop.f32.mrb[69].mxu1 }
 0x185   : > { %v5223_v4 = vadd.f32 %v3774_v3, %v3773_v63  ;;  %v3776_v45 = vpop.f32.mrb[70].mxu1 }
 0x186   : > { %v3777_v7 = vpop.f32.mrb[71].mxu1 }
 0x187   : > { %v5225_v9 = vadd.f32 %v3777_v7, %v3776_v45 }
 0x18b   : > { %v3779_v11 = vpop.f32.mrb[72].mxu1 }
 0x18c   : > { %v3780_v16 = vpop.f32.mrb[73].mxu1 }
 0x18d   : > { %v5227_v17 = vadd.f32 %v3780_v16, %v3779_v11  ;;  %v3782_v18 = vpop.f32.mrb[74].mxu1 }
 0x18e   : > { %v3783_v0 = vpop.f32.mrb[75].mxu1 }
 0x18f   : > { %v5229_v22 = vadd.f32 %v3783_v0, %v3782_v18  ;;  %v2137_v18 = vadd.f32 %v5177_v56, %v5238_v35 }
 0x193   : > { %v3785_v50 = vpop.f32.mrb[76].mxu1 }
 0x194   : > { %v3786_v26 = vpop.f32.mrb[77].mxu1 }
 0x195   : > { %v5231_v28 = vadd.f32 %v3786_v26, %v3785_v50  ;;  %v3788_v29 = vpop.f32.mrb[78].mxu1  ;;  %v2148_v50 = vadd.f32 %v5179_v10, %v5238_v35 }
 0x196   : > { %v3789_v6 = vpop.f32.mrb[79].mxu1 }
 0x197   : > { %v5233_v48 = vadd.f32 %v3789_v6, %v3788_v29 }
 0x1d6   : > { %v3905_v32 = vpop.f32.mrb[16].mxu0 }
 0x1d7   : > { %v5246_v39 = vadd.f32 %v3905_v32, %v2113_v30  ;;  %v2265_v37 = vpop.f32.mrb[17].mxu0  ;;  %v2140_v30 = vadd.f32 %v5181_v14, %v5238_v35 }
 0x1d8   : > { %v5248_v27 = vadd.f32 %v2265_v37, %v2105_v19  ;;  %v3906_v43 = vpop.f32.mrb[18].mxu0 }
 0x1d9   : > { %v3612_v53 = vmul.f32 -1.442695, %v5246_v39  ;;  %v5253_v8 = vadd.f32 %v3906_v43, %v2116_v31  ;;  %v2268_v46 = vpop.f32.mrb[19].mxu0 }
 0x1da   : > { %v3610_v15 = vmul.f32 -1.442695, %v5248_v27  ;;  %v5256_v59 = vadd.f32 %v2268_v46, %v2108_v52 }
 0x1db   : > { %4082 = vpow2.f32 %v3612_v53  ;;  %v3613_v60 = vmul.f32 -1.442695, %v5253_v8 }
 0x1dc   : > { %4084 = vpow2.f32 %v3610_v15  ;;  %v3611_v23 = vmul.f32 -1.442695, %v5256_v59 }
 0x1dd   : > { %4086 = vpow2.f32 %v3613_v60 }
 0x1de   : > { %4088 = vpow2.f32 %v3611_v23  ;;  %v3909_v62 = vpop.f32.mrb[20].mxu0  ;;  %v2161_v23 = vadd.f32 %v5188_v51, %v5238_v35 }
 0x1df   : > { %v5268_v34 = vadd.f32 %v3909_v62, %v2129_v21  ;;  %v2281_v25 = vpop.f32.mrb[21].mxu0 }
 0x1e0   : > { %v5270_v63 = vadd.f32 %v2281_v25, %v2121_v54  ;;  %v3910_v13 = vpop.f32.mrb[22].mxu0 }
 0x1e1   : > { %v3616_v3 = vmul.f32 -1.442695, %v5268_v34  ;;  %v5273_v45 = vadd.f32 %v3910_v13, %v2132_v33  ;;  %v2284_v44 = vpop.f32.mrb[23].mxu0  ;;  %v2153_v33 = vadd.f32 %v5186_v2, %v5238_v35 }
 0x1e2   : > { %v3614_v7 = vmul.f32 -1.442695, %v5270_v63  ;;  %v5276_v11 = vadd.f32 %v2284_v44, %v2124_v40  ;;  %v2164_v40 = vadd.f32 %v5193_v49, %v5238_v35  ;;  %v2156_v44 = vadd.f32 %v5195_v36, %v5238_v35 }
 0x1e3   : > { %4090 = vpow2.f32 %v3616_v3  ;;  %v3617_v58 = vmul.f32 -1.442695, %v5273_v45 }
 0x1e4   : > { %4092 = vpow2.f32 %v3614_v7  ;;  %v3615_v16 = vmul.f32 -1.442695, %v5276_v11 }
 0x1e5   : > { %v4083_v0 = vpop.eup %4082  ;;  %4094 = vpow2.f32 %v3617_v58 }
 0x1e6   : > { %v4085_v26 = vpop.eup %4084  ;;  %v2490_v29 = vadd.f32 1.0, %v4083_v0  ;;  %4096 = vpow2.f32 %v3615_v16  ;;  %v3913_v6 = vpop.f32.mrb[24].mxu0 }
 0x1e7   : > { %v4087_v31 = vpop.eup %4086  ;;  %v2488_v5 = vadd.f32 1.0, %v4085_v26  ;;  %v5288_v32 = vadd.f32 %v3913_v6, %v2145_v20  ;;  %v2297_v19 = vpop.f32.mrb[25].mxu0 }
 0x1e8   : > { %v4089_v37 = vpop.eup %4088  ;;  %4098 = vrcp.f32 %v2490_v29  ;;  %v2491_v56 = vadd.f32 1.0, %v4087_v31  ;;  %v5290_v43 = vadd.f32 %v2297_v19, %v2137_v18  ;;  %v3914_v52 = vpop.f32.mrb[26].mxu0  ;;  %v2177_v19 = vadd.f32 %v5200_v38, %v5238_v35 }
 0x1e9   : > { %4100 = vrcp.f32 %v2488_v5  ;;  %v2489_v10 = vadd.f32 1.0, %v4089_v37  ;;  %v3620_v53 = vmul.f32 -1.442695, %v5288_v32  ;;  %v5293_v46 = vadd.f32 %v3914_v52, %v2148_v50  ;;  %v2300_v15 = vpop.f32.mrb[27].mxu0 }
 0x1ea   : > { %4102 = vrcp.f32 %v2491_v56  ;;  %v3618_v14 = vmul.f32 -1.442695, %v5290_v43  ;;  %v5296_v60 = vadd.f32 %v2300_v15, %v2140_v30  ;;  %v2169_v52 = vadd.f32 %v5202_v41, %v5238_v35 }
 0x1eb   : > { %4104 = vrcp.f32 %v2489_v10  ;;  %v3621_v21 = vmul.f32 -1.442695, %v5293_v46 }
 0x1ec   : > { %4106 = vpow2.f32 %v3620_v53  ;;  %v3619_v54 = vmul.f32 -1.442695, %v5296_v60 }
 0x1ed   : > { %v4091_v62 = vpop.eup %4090  ;;  %4108 = vpow2.f32 %v3618_v14  ;;  %v2180_v14 = vadd.f32 %v5207_v42, %v5238_v35 }
 0x1ee   : > { %v4093_v25 = vpop.eup %4092  ;;  %v2494_v13 = vadd.f32 1.0, %v4091_v62  ;;  %4110 = vpow2.f32 %v3621_v21  ;;  %v3917_v3 = vpop.f32.mrb[28].mxu0 }
 0x1ef   : > { %v4095_v7 = vpop.eup %4094  ;;  %v2492_v51 = vadd.f32 1.0, %v4093_v25  ;;  %4112 = vpow2.f32 %v3619_v54  ;;  %v5308_v58 = vadd.f32 %v3917_v3, %v2161_v23  ;;  %v2313_v20 = vpop.f32.mrb[29].mxu0 }
 0x1f0   : > { %v4097_v16 = vpop.eup %4096  ;;  %4114 = vrcp.f32 %v2494_v13  ;;  %v2495_v2 = vadd.f32 1.0, %v4095_v7  ;;  %v5310_v18 = vadd.f32 %v2313_v20, %v2153_v33  ;;  %v3918_v0 = vpop.f32.mrb[30].mxu0  ;;  %v2172_v33 = vadd.f32 %v5209_v55, %v5238_v35 }
 0x1f1   : > { %4116 = vrcp.f32 %v2492_v51  ;;  %v2493_v49 = vadd.f32 1.0, %v4097_v16  ;;  %v3624_v50 = vmul.f32 -1.442695, %v5308_v58  ;;  %v5313_v26 = vadd.f32 %v3918_v0, %v2164_v40  ;;  %v2316_v29 = vpop.f32.mrb[31].mxu0 }
 0x1f2   : > { %v4099_v36 = vpop.eup %4098  ;;  %4118 = vrcp.f32 %v2495_v2  ;;  %v3622_v6 = vmul.f32 -1.442695, %v5310_v18  ;;  %v5316_v30 = vadd.f32 %v2316_v29, %v2156_v44  ;;  %v2193_v29 = vadd.f32 %v5213_v12, %v5238_v35 }
 0x1f3   : > { %v4101_v31 = vpop.eup %4100  ;;  %4120 = vrcp.f32 %v2493_v49  ;;  %v3625_v5 = vmul.f32 -1.442695, %v5313_v26  ;;  %v2586_v53 = vmul.f32 %v4099_v36, %v5246_v39 }
 0x1f4   : > { %v4103_v37 = vpop.eup %4102  ;;  %4122 = vpow2.f32 %v3624_v50  ;;  %v3623_v56 = vmul.f32 -1.442695, %v5316_v30  ;;  %v2584_v23 = vmul.f32 %v4101_v31, %v5248_v27  ;;  %v2185_v31 = vadd.f32 %v5211_v24, %v5238_v35 }
 0x1f5   : > { %v4105_v10 = vpop.eup %4104  ;;  %v2587_v15 = vmul.f32 %v4103_v37, %v5253_v8  ;;  %4124 = vpow2.f32 %v3622_v6 }
 0x1f6   : > { %v4107_v21 = vpop.eup %4106  ;;  %v2585_v38 = vmul.f32 %v4105_v10, %v5256_v59  ;;  %4126 = vpow2.f32 %v3625_v5  ;;  %v3921_v54 = vpop.f32.mrb[32].mxu0 }
 0x1f7   : > { %v4109_v41 = vpop.eup %4108  ;;  %v2617_v62 = vpack.c.bf16 %v2587_v15, %v2586_v53  ;;  %v2498_v40 = vadd.f32 1.0, %v4107_v21  ;;  %4128 = vpow2.f32 %v3623_v56  ;;  %v5332_v39 = vadd.f32 %v3921_v54, %v2177_v19  ;;  %v2329_v8 = vpop.f32.mrb[33].mxu0 }
 0x1f8   : > { %v4111_v25 = vpop.eup %4110  ;;  %v2496_v13 = vadd.f32 1.0, %v4109_v41  ;;  %v5334_v42 = vadd.f32 %v2329_v8, %v2169_v52  ;;  %v3922_v3 = vpop.f32.mrb[34].mxu0  ;;  %v2616_v27 = vpack.c.bf16 %v2585_v38, %v2584_v23  ;;  %v2196_v56 = vadd.f32 %v5215_v47, %v5238_v35 }
 0x1f9   : > { %v4113_v44 = vpop.eup %4112  ;;  %4130 = vrcp.f32 %v2498_v40  ;;  %v2499_v59 = vadd.f32 1.0, %v4111_v25  ;;  %v3628_v7 = vmul.f32 -1.442695, %v5332_v39  ;;  %v5337_v51 = vadd.f32 %v3922_v3, %v2180_v14  ;;  %v2332_v55 = vpop.f32.mrb[35].mxu0 }
 0x1fa   : > { %v4115_v20 = vpop.eup %4114  ;;  %4132 = vrcp.f32 %v2496_v13  ;;  %v2497_v16 = vadd.f32 1.0, %v4113_v44  ;;  %v3626_v2 = vmul.f32 -1.442695, %v5334_v42  ;;  %v5340_v0 = vadd.f32 %v2332_v55, %v2172_v33  ;;  %3951 = vmatprep.mubr.bf16.mxu0 %v2616_v27 }
 0x1fb   : > { %v4117_v49 = vpop.eup %4116  ;;  %4134 = vrcp.f32 %v2499_v59  ;;  %v3629_v50 = vmul.f32 -1.442695, %v5337_v51  ;;  %3952 = vmatmul.mubr.bf16.vlgmr.msra.gmra.mrb[48].mxu0 %v2617_v62  ;;  %v2590_v19 = vmul.f32 %v4115_v20, %v5268_v34  ;;  %v2188_v15 = vadd.f32 %v5217_v61, %v5238_v35 }
 0x1fc   : > { %v4119_v36 = vpop.eup %4118  ;;  %4136 = vrcp.f32 %v2497_v16  ;;  %v3627_v6 = vmul.f32 -1.442695, %v5340_v0  ;;  %v2588_v10 = vmul.f32 %v4117_v49, %v5270_v63  ;;  %v2209_v27 = vadd.f32 %v5223_v4, %v5238_v35 }
 0x1fd   : > { %v4121_v5 = vpop.eup %4120  ;;  %v2591_v37 = vmul.f32 %v4119_v36, %v5273_v45  ;;  %4138 = vpow2.f32 %v3628_v7  ;;  %v2201_v7 = vadd.f32 %v5219_v1, %v5238_v35  ;;  %v2212_v20 = vadd.f32 %v5225_v9, %v5238_v35 }
 0x1fe   : > { %v4123_v52 = vpop.eup %4122  ;;  %v2589_v12 = vmul.f32 %v4121_v5, %v5276_v11  ;;  %4140 = vpow2.f32 %v3626_v2  ;;  %v3925_v53 = vpop.f32.mrb[36].mxu0  ;;  %v2204_v4 = vadd.f32 %v5221_v57, %v5238_v35 }
 0x1ff   : > { %v4125_v24 = vpop.eup %4124  ;;  %v2502_v14 = vadd.f32 1.0, %v4123_v52  ;;  %4142 = vpow2.f32 %v3629_v50  ;;  %v5356_v34 = vadd.f32 %v3925_v53, %v2193_v29  ;;  %v2345_v45 = vpop.f32.mrb[37].mxu0  ;;  %v2619_v21 = vpack.c.bf16 %v2591_v37, %v2590_v19 }
 0x200   : > { %v4127_v23 = vpop.eup %4126  ;;  %v2500_v38 = vadd.f32 1.0, %v4125_v24  ;;  %4144 = vpow2.f32 %v3627_v6  ;;  %v5358_v47 = vadd.f32 %v2345_v45, %v2185_v31  ;;  %v3926_v63 = vpop.f32.mrb[38].mxu0  ;;  %v2618_v54 = vpack.c.bf16 %v2589_v12, %v2588_v10 }
 0x201   : > { %v4129_v11 = vpop.eup %4128  ;;  %4146 = vrcp.f32 %v2502_v14  ;;  %v2503_v33 = vadd.f32 1.0, %v4127_v23  ;;  %v3632_v41 = vmul.f32 -1.442695, %v5356_v34  ;;  %v5361_v61 = vadd.f32 %v3926_v63, %v2196_v56  ;;  %v2348_v62 = vpop.f32.mrb[39].mxu0 }
 0x202   : > { %4148 = vrcp.f32 %v2500_v38  ;;  %v2501_v40 = vadd.f32 1.0, %v4129_v11  ;;  %v3630_v8 = vmul.f32 -1.442695, %v5358_v47  ;;  %v5364_v25 = vadd.f32 %v2348_v62, %v2188_v15  ;;  %3955 = vmatprep.mubr.bf16.mxu0 %v2618_v54 }
 0x203   : > { %v4131_v13 = vpop.eup %4130  ;;  %4150 = vrcp.f32 %v2503_v33  ;;  %v3633_v3 = vmul.f32 -1.442695, %v5361_v61  ;;  %3956 = vmatmul.mubr.bf16.gmra.mrb[52].mxu0 %v2619_v21  ;;  %v2225_v45 = vadd.f32 %v5231_v28, %v5238_v35  ;;  %v2217_v38 = vadd.f32 %v5227_v17, %v5238_v35 }
 0x204   : > { %v4133_v44 = vpop.eup %4132  ;;  %4152 = vrcp.f32 %v2501_v40  ;;  %v3631_v59 = vmul.f32 -1.442695, %v5364_v25  ;;  %v2594_v2 = vmul.f32 %v4131_v13, %v5288_v32  ;;  %v2228_v11 = vadd.f32 %v5233_v48, %v5238_v35 }
 0x205   : > { %v4135_v55 = vpop.eup %4134  ;;  %4154 = vpow2.f32 %v3632_v41  ;;  %v2592_v36 = vmul.f32 %v4133_v44, %v5290_v43  ;;  %v2220_v40 = vadd.f32 %v5229_v22, %v5238_v35 }
 0x206   : > { %v4137_v16 = vpop.eup %4136  ;;  %v2595_v49 = vmul.f32 %v4135_v55, %v5293_v46  ;;  %4156 = vpow2.f32 %v3630_v8  ;;  %v3929_v50 = vpop.f32.mrb[40].mxu0 }
 0x207   : > { %v4139_v29 = vpop.eup %4138  ;;  %v2593_v1 = vmul.f32 %v4137_v16, %v5296_v60  ;;  %4158 = vpow2.f32 %v3633_v3  ;;  %v5380_v6 = vadd.f32 %v3929_v50, %v2209_v27  ;;  %v2361_v31 = vpop.f32.mrb[41].mxu0 }
 0x208   : > { %v4141_v9 = vpop.eup %4140  ;;  %v2506_v5 = vadd.f32 1.0, %v4139_v29  ;;  %4160 = vpow2.f32 %v3631_v59  ;;  %v5382_v32 = vadd.f32 %v2361_v31, %v2201_v7  ;;  %v3930_v46 = vpop.f32.mrb[42].mxu0  ;;  %v2621_v19 = vpack.c.bf16 %v2595_v49, %v2594_v2 }
 0x209   : > { %v4143_v37 = vpop.eup %4142  ;;  %v2504_v56 = vadd.f32 1.0, %v4141_v9  ;;  %v5384_v52 = vadd.f32 %v3930_v46, %v2212_v20  ;;  %v2364_v57 = vpop.f32.mrb[43].mxu0  ;;  %v2620_v10 = vpack.c.bf16 %v2593_v1, %v2592_v36  ;;  %v3636_v12 = vmul.f32 -1.442695, %v5380_v6 }
 0x20a   : > { %v4145_v43 = vpop.eup %4144  ;;  %4162 = vrcp.f32 %v2506_v5  ;;  %v2507_v60 = vadd.f32 1.0, %v4143_v37  ;;  %v5387_v53 = vadd.f32 %v2364_v57, %v2204_v4  ;;  %v3634_v14 = vmul.f32 -1.442695, %v5382_v32 }
 0x20b   : > { %v4147_v15 = vpop.eup %4146  ;;  %4164 = vrcp.f32 %v2504_v56  ;;  %v2505_v24 = vadd.f32 1.0, %v4145_v43  ;;  %3959 = vmatprep.mubr.bf16.mxu0 %v2620_v10  ;;  %v3637_v23 = vmul.f32 -1.442695, %v5384_v52 }
 0x20c   : > { %v4149_v21 = vpop.eup %4148  ;;  %4166 = vrcp.f32 %v2507_v60  ;;  %3960 = vmatmul.mubr.bf16.gmra.mrb[56].mxu0 %v2621_v19  ;;  %v3635_v54 = vmul.f32 -1.442695, %v5387_v53  ;;  %v2598_v41 = vmul.f32 %v4147_v15, %v5308_v58 }
 0x20d   : > { %v4151_v63 = vpop.eup %4150  ;;  %4168 = vrcp.f32 %v2505_v24  ;;  %v2596_v7 = vmul.f32 %v4149_v21, %v5310_v18 }
 0x20e   : > { %v4153_v33 = vpop.eup %4152  ;;  %v2599_v28 = vmul.f32 %v4151_v63, %v5313_v26  ;;  %4170 = vpow2.f32 %v3636_v12  ;;  %v3933_v62 = vpop.f32.mrb[44].mxu0 }
 0x20f   : > { %v4155_v8 = vpop.eup %4154  ;;  %v2597_v17 = vmul.f32 %v4153_v33, %v5316_v30  ;;  %4172 = vpow2.f32 %v3634_v14  ;;  %v5403_v13 = vadd.f32 %v3933_v62, %v2225_v45  ;;  %v2377_v3 = vpop.f32.mrb[45].mxu0 }
 0x210   : > { %v4157_v27 = vpop.eup %4156  ;;  %v2510_v44 = vadd.f32 1.0, %v4155_v8  ;;  %4174 = vpow2.f32 %v3637_v23  ;;  %v5405_v48 = vadd.f32 %v2377_v3, %v2217_v38  ;;  %v3934_v58 = vpop.f32.mrb[46].mxu0  ;;  %v2623_v59 = vpack.c.bf16 %v2599_v28, %v2598_v41 }
 0x211   : > { %v4159_v26 = vpop.eup %4158  ;;  %v2508_v55 = vadd.f32 1.0, %v4157_v27  ;;  %4176 = vpow2.f32 %v3635_v54  ;;  %v5408_v22 = vadd.f32 %v3934_v58, %v2228_v11  ;;  %v2380_v35 = vpop.f32.mrb[47].mxu0  ;;  %v3640_v16 = vmul.f32 -1.442695, %v5403_v13 }
 0x212   : > { %v4161_v30 = vpop.eup %4160  ;;  %4178 = vrcp.f32 %v2510_v44  ;;  %v2511_v20 = vadd.f32 1.0, %v4159_v26  ;;  %v5411_v2 = vadd.f32 %v2380_v35, %v2220_v40  ;;  %v3638_v50 = vmul.f32 -1.442695, %v5405_v48 }
 0x213   : > { %4180 = vrcp.f32 %v2508_v55  ;;  %v2509_v49 = vadd.f32 1.0, %v4161_v30  ;;  %v2622_v4 = vpack.c.bf16 %v2597_v17, %v2596_v7  ;;  %v3641_v18 = vmul.f32 -1.442695, %v5408_v22 }
 0x214   : > { %v4163_v29 = vpop.eup %4162  ;;  %4182 = vrcp.f32 %v2511_v20  ;;  %v3639_v1 = vmul.f32 -1.442695, %v5411_v2 }
 0x215   : > { %v4165_v36 = vpop.eup %4164  ;;  %4184 = vrcp.f32 %v2509_v49  ;;  %3963 = vmatprep.mubr.bf16.mxu0 %v2622_v4  ;;  %v2602_v5 = vmul.f32 %v4163_v29, %v5332_v39 }
 0x216   : > { %v4167_v31 = vpop.eup %4166  ;;  %4186 = vpow2.f32 %v3640_v16  ;;  %3964 = vmatmul.mubr.bf16.gmra.mrb[60].mxu0 %v2623_v59  ;;  %v2600_v37 = vmul.f32 %v4165_v36, %v5334_v42 }
 0x217   : > { %v4169_v9 = vpop.eup %4168  ;;  %v2603_v46 = vmul.f32 %v4167_v31, %v5337_v51  ;;  %4188 = vpow2.f32 %v3638_v50  ;;  %v5435_v50 = vld [vmem:[%s6014_s7] ss:$0 sm:$0xff] }
 0x218   : > { %v4171_v19 = vpop.eup %4170  ;;  %v2601_v56 = vmul.f32 %v4169_v9, %v5340_v0  ;;  %4190 = vpow2.f32 %v3641_v18  ;;  %v4274_v18 = vld [vmem:[%s4495_s25 + $0x10] sm:$0xff]  ;;  %v4275_v9 = vld [vmem:[%s4495_s25] sm:$0xff] }
 0x219   : > { %v4173_v57 = vpop.eup %4172  ;;  %v2514_v10 = vadd.f32 1.0, %v4171_v19  ;;  %4192 = vpow2.f32 %v3639_v1  ;;  %v2625_v43 = vpack.c.bf16 %v2603_v46, %v2602_v5 }
 0x21a   : > { %v4175_v60 = vpop.eup %4174  ;;  %v2512_v12 = vadd.f32 1.0, %v4173_v57  ;;  %v2624_v15 = vpack.c.bf16 %v2601_v56, %v2600_v37  ;;  %v4276_v37 = vld [vmem:[%s4495_s25 + $0x8] sm:$0xff] }
 0x21b   : > { %v4177_v24 = vpop.eup %4176  ;;  %4194 = vrcp.f32 %v2514_v10  ;;  %v2515_v14 = vadd.f32 1.0, %v4175_v60 }
 0x21c   : > { %v4179_v39 = vpop.eup %4178  ;;  %4196 = vrcp.f32 %v2512_v12  ;;  %v2513_v51 = vadd.f32 1.0, %v4177_v24  ;;  %3967 = vmatprep.mubr.bf16.mxu0 %v2624_v15 }
 0x21d   : > { %v4181_v45 = vpop.eup %4180  ;;  %4198 = vrcp.f32 %v2515_v14  ;;  %v2606_v21 = vmul.f32 %v4179_v39, %v5356_v34  ;;  %v4278_v39 = vld [vmem:[%s4495_s25 + $0x30] sm:$0xff] }
 0x21e   : > { %v4183_v42 = vpop.eup %4182  ;;  %4200 = vrcp.f32 %v2513_v51  ;;  %3968 = vmatmul.mubr.bf16.gmra.mrb[64].mxu0 %v2625_v43  ;;  %v2604_v63 = vmul.f32 %v4181_v45, %v5358_v47  ;;  %v4277_v43 = vld [vmem:[%s4495_s25 + $0x18] sm:$0xff] }
 0x21f   : > { %v4185_v0 = vpop.eup %4184  ;;  %v2607_v23 = vmul.f32 %v4183_v42, %v5361_v61 }
 0x220   : > { %v4187_v38 = vpop.eup %4186  ;;  %v2605_v54 = vmul.f32 %v4185_v0, %v5364_v25 }
 0x221   : > { %v4189_v11 = vpop.eup %4188  ;;  %v2518_v33 = vadd.f32 1.0, %v4187_v38  ;;  %v2627_v41 = vpack.c.bf16 %v2607_v23, %v2606_v21 }
 0x222   : > { %v4191_v28 = vpop.eup %4190  ;;  %v2516_v62 = vadd.f32 1.0, %v4189_v11  ;;  %v2626_v40 = vpack.c.bf16 %v2605_v54, %v2604_v63  ;;  %v4279_v54 = vld [vmem:[%s4495_s25 + $0x20] sm:$0xff] }
 0x223   : > { %v4193_v8 = vpop.eup %4192  ;;  %4202 = vrcp.f32 %v2518_v33  ;;  %v2519_v17 = vadd.f32 1.0, %v4191_v28  ;;  %v4280_v33 = vld [vmem:[%s4495_s25 + $0x38] sm:$0xff] }
 0x224   : > { %4204 = vrcp.f32 %v2516_v62  ;;  %v2517_v3 = vadd.f32 1.0, %v4193_v8  ;;  %3971 = vmatprep.mubr.bf16.mxu0 %v2626_v40  ;;  %v4281_v40 = vld [vmem:[%s4495_s25 + $0x28] sm:$0xff] }
 0x225   : > { %v4195_v34 = vpop.eup %4194  ;;  %4206 = vrcp.f32 %v2519_v17 }
 0x226   : > { %v4197_v61 = vpop.eup %4196  ;;  %4208 = vrcp.f32 %v2517_v3  ;;  %3972 = vmatmul.mubr.bf16.gmra.mrb[68].mxu0 %v2627_v41  ;;  %v2610_v25 = vmul.f32 %v4195_v34, %v5380_v6 }
 0x227   : > { %v4199_v47 = vpop.eup %4198  ;;  %v2608_v58 = vmul.f32 %v4197_v61, %v5382_v32 }
 0x228   : > { %v4201_v27 = vpop.eup %4200  ;;  %v2611_v44 = vmul.f32 %v4199_v47, %v5384_v52 }
 0x229   : > { %v2609_v59 = vmul.f32 %v4201_v27, %v5387_v53 }
 0x22a   : > { %v2629_v26 = vpack.c.bf16 %v2611_v44, %v2610_v25  ;;  %v4282_v44 = vld [vmem:[%s4495_s25 + $0x50] sm:$0xff] }
 0x22b   : > { %v2628_v7 = vpack.c.bf16 %v2609_v59, %v2608_v58 }
 0x22d   : > { %v4203_v55 = vpop.eup %4202  ;;  %3975 = vmatprep.mubr.bf16.mxu0 %v2628_v7 }
 0x22e   : > { %v4205_v35 = vpop.eup %4204  ;;  %3976 = vmatmul.mubr.bf16.gmra.mrb[72].mxu0 %v2629_v26  ;;  %v2614_v16 = vmul.f32 %v4203_v55, %v5403_v13 }
 0x22f   : > { %v4207_v30 = vpop.eup %4206  ;;  %v2612_v6 = vmul.f32 %v4205_v35, %v5405_v48 }
 0x230   : > { %v4209_v20 = vpop.eup %4208  ;;  %v2615_v49 = vmul.f32 %v4207_v30, %v5408_v22  ;;  %v4283_v30 = vld [vmem:[%s4495_s25 + $0x40] sm:$0xff] }
 0x231   : > { %v2613_v52 = vmul.f32 %v4209_v20, %v5411_v2 }
 0x232   : > { %v2631_v32 = vpack.c.bf16 %v2615_v49, %v2614_v16 }
 0x233   : > { %v2630_v53 = vpack.c.bf16 %v2613_v52, %v2612_v6 }
 0x235   : > { %3979 = vmatprep.mubr.bf16.mxu0 %v2630_v53 }
 0x236   : > { %3980 = vmatmul.mubr.bf16.gmra.mrb[76].mxu0 %v2631_v32  ;;  %v4284_v32 = vld [vmem:[%s4495_s25 + $0x58] sm:$0xff] }
 0x2ce   : > { %v3953_v4 = vpop.f32.mrb[48].mxu0 }
 0x2cf   : > { %v2746_v13 = vadd.f32 %v3953_v4, %v5435_v50  ;;  %v2737_v29 = vpop.f32.mrb[49].mxu0 }
 0x2d0   : > { %v3954_v22 = vpop.f32.mrb[50].mxu0  ;;  %v2738_v2 = vadd.f32 %v5435_v50, %v2737_v29 }
 0x2d1   : > { %v5439_v48 = vadd.f32 %v4274_v18, %v2746_v13  ;;  %v2740_v36 = vpop.f32.mrb[51].mxu0  ;;  %v2749_v46 = vadd.f32 %v3954_v22, %v5435_v50  ;;  %v4285_v22 = vld [vmem:[%s4495_s25 + $0x48] sm:$0xff] }
 0x2d2   : > { %v2741_v1 = vadd.f32 %v5435_v50, %v2740_v36  ;;  %v5447_v5 = vadd.f32 %v4275_v9, %v2738_v2 }
 0x2d3   : > { %2902 = vadd.xlane.f32.xlu0 %v5439_v48  ;;  %v2996_v31 = vmul.f32 %v5439_v48, %v5439_v48  ;;  %v5455_v60 = vadd.f32 %v4277_v43, %v2749_v46 }
 0x2d4   : > { %v5451_v56 = vadd.f32 %v4276_v37, %v2741_v1  ;;  %v2994_v24 = vmul.f32 %v5447_v5, %v5447_v5 }
 0x2d5   : > { %3030 = vadd.xlane.f32.xlu1 %v2996_v31  ;;  %v2997_v14 = vmul.f32 %v5455_v60, %v5455_v60 }
 0x2d6   : > { %v3957_v19 = vpop.f32.mrb[52].mxu0  ;;  %v2995_v38 = vmul.f32 %v5451_v56, %v5451_v56 }
 0x2d7   : > { %v2753_v57 = vpop.f32.mrb[53].mxu0  ;;  %2898 = vadd.xlane.f32.xlu0 %v5447_v5  ;;  %v2762_v15 = vadd.f32 %v3957_v19, %v5435_v50 }
 0x2d8   : > { %v3958_v10 = vpop.f32.mrb[54].mxu0  ;;  %v2754_v45 = vadd.f32 %v5435_v50, %v2753_v57 }
 0x2d9   : > { %v2756_v12 = vpop.f32.mrb[55].mxu0  ;;  %2900 = vadd.xlane.f32.xlu1 %v5451_v56  ;;  %v5465_v51 = vadd.f32 %v4278_v39, %v2762_v15  ;;  %v2765_v21 = vadd.f32 %v3958_v10, %v5435_v50 }
 0x2da   : > { %v5473_v11 = vadd.f32 %v4279_v54, %v2754_v45  ;;  %v2757_v28 = vadd.f32 %v5435_v50, %v2756_v12  ;;  %v4286_v12 = vld [vmem:[%s4495_s25 + $0x70] sm:$0xff] }
 0x2db   : > { %2904 = vadd.xlane.f32.xlu0 %v5455_v60  ;;  %v5476_v41 = vadd.f32 %v4280_v33, %v2765_v21  ;;  %v3000_v62 = vmul.f32 %v5465_v51, %v5465_v51  ;;  %v4287_v21 = vld [vmem:[%s4495_s25 + $0x60] sm:$0xff] }
 0x2dc   : > { %v5484_v8 = vadd.f32 %v4281_v40, %v2757_v28  ;;  %v2998_v47 = vmul.f32 %v5473_v11, %v5473_v11  ;;  %v4288_v28 = vld [vmem:[%s4495_s25 + $0x78] sm:$0xff] }
 0x2dd   : > { %3026 = vadd.xlane.f32.xlu1 %v2994_v24  ;;  %v3001_v25 = vmul.f32 %v5476_v41, %v5476_v41 }
 0x2de   : > { %v2999_v55 = vmul.f32 %v5484_v8, %v5484_v8 }
 0x2df   : > { %v3961_v42 = vpop.f32.mrb[56].mxu0  ;;  %3032 = vadd.xlane.f32.xlu0 %v2997_v14 }
 0x2e0   : > { %v2769_v0 = vpop.f32.mrb[57].mxu0  ;;  %v2778_v34 = vadd.f32 %v3961_v42, %v5435_v50 }
 0x2e1   : > { %v3962_v23 = vpop.f32.mrb[58].mxu0  ;;  %2910 = vadd.xlane.f32.xlu1 %v5465_v51  ;;  %v2770_v59 = vadd.f32 %v5435_v50, %v2769_v0 }
 0x2e2   : > { %v2772_v63 = vpop.f32.mrb[59].mxu0  ;;  %v5493_v58 = vadd.f32 %v4282_v44, %v2778_v34  ;;  %v2781_v26 = vadd.f32 %v3962_v23, %v5435_v50  ;;  %v4289_v34 = vld [vmem:[%s4495_s25 + $0x68] sm:$0xff] }
 0x2e3   : > { %3028 = vadd.xlane.f32.xlu0 %v2995_v38  ;;  %v5503_v20 = vadd.f32 %v4283_v30, %v2770_v59  ;;  %v2773_v4 = vadd.f32 %v5435_v50, %v2772_v63 }
 0x2e4   : > { %v5512_v53 = vadd.f32 %v4284_v32, %v2781_v26  ;;  %v3004_v29 = vmul.f32 %v5493_v58, %v5493_v58 }
 0x2e5   : > { %2906 = vadd.xlane.f32.xlu1 %v5473_v11  ;;  %v5523_v18 = vadd.f32 %v4285_v22, %v2773_v4  ;;  %v3002_v19 = vmul.f32 %v5503_v20, %v5503_v20 }
 0x2e6   : > { %v3005_v43 = vmul.f32 %v5512_v53, %v5512_v53 }
 0x2e7   : > { %2912 = vadd.xlane.f32.xlu0 %v5476_v41  ;;  %v3003_v45 = vmul.f32 %v5523_v18, %v5523_v18 }
 0x2e9   : > { %v3965_v17 = vpop.f32.mrb[60].mxu0  ;;  %3038 = vadd.xlane.f32.xlu1 %v3000_v62 }
 0x2ea   : > { %v2785_v3 = vpop.f32.mrb[61].mxu0  ;;  %v2794_v31 = vadd.f32 %v3965_v17, %v5435_v50 }
 0x2eb   : > { %v3966_v61 = vpop.f32.mrb[62].mxu0  ;;  %2908 = vadd.xlane.f32.xlu0 %v5484_v8  ;;  %v2786_v24 = vadd.f32 %v5435_v50, %v2785_v3 }
 0x2ec   : > { %v2788_v27 = vpop.f32.mrb[63].mxu0  ;;  %v5544_v15 = vadd.f32 %v4286_v12, %v2794_v31  ;;  %v2797_v14 = vadd.f32 %v3966_v61, %v5435_v50  ;;  %v4293_v31 = vld [vmem:[%s4495_s25 + $0x88] sm:$0xff] }
 0x2ed   : > { %3034 = vadd.xlane.f32.xlu1 %v2998_v47  ;;  %v5555_v23 = vadd.f32 %v4287_v21, %v2786_v24  ;;  %v2789_v40 = vadd.f32 %v5435_v50, %v2788_v27  ;;  %v4296_v24 = vld [vmem:[%s4495_s25 + $0xb8] sm:$0xff] }
 0x2ee   : > { %v5564_v62 = vadd.f32 %v4288_v28, %v2797_v14  ;;  %v3008_v3 = vmul.f32 %v5544_v15, %v5544_v15  ;;  %v4300_v28 = vld [vmem:[%s4495_s25 + $0xd8] sm:$0xff] }
 0x2ef   : > { %3040 = vadd.xlane.f32.xlu0 %v3001_v25  ;;  %v5575_v61 = vadd.f32 %v4289_v34, %v2789_v40 }
 0x2f1   : > { %v5497_v7 = vpop.f32.mrb[64].mxu0  ;;  %2918 = vadd.xlane.f32.xlu1 %v5493_v58  ;;  %v3007_v4 = vmul.f32 %v5575_v61, %v5575_v61 }
 0x2f2   : > { %v2801_v35 = vpop.f32.mrb[65].mxu0  ;;  %v2810_v44 = vadd.f32 %v5497_v7, %v5435_v50  ;;  %v3009_v7 = vmul.f32 %v5564_v62, %v5564_v62 }
 0x2f3   : > { %v5506_v16 = vadd.f32 %v5435_v50, %v2801_v35  ;;  %v3970_v49 = vpop.f32.mrb[66].mxu0  ;;  %3036 = vadd.xlane.f32.xlu0 %v2999_v55  ;;  %v3006_v55 = vmul.f32 %v5555_v23, %v5555_v23 }
 0x2f4   : > { %v5509_v6 = vadd.f32 %v3970_v49, %v5435_v50  ;;  %v2804_v52 = vpop.f32.mrb[67].mxu0 }
 0x2f5   : > { %v5516_v13 = vadd.f32 %v5435_v50, %v2804_v52  ;;  %2914 = vadd.xlane.f32.xlu1 %v5503_v20  ;;  %v4290_v52 = vld [vmem:[%s4495_s25 + $0x90] sm:$0xff] }
 0x2f6   : > { %v5597_v32 = vadd.f32 %v4290_v52, %v2810_v44  ;;  %v4303_v44 = vld [vmem:[%s4495_s25 + $0xe0] sm:$0xff] }
 0x2f7   : > { %2920 = vadd.xlane.f32.xlu0 %v5512_v53 }
 0x2f9   : > { %v3973_v2 = vpop.f32.mrb[68].mxu0  ;;  %3046 = vadd.xlane.f32.xlu1 %v3004_v29  ;;  %v4291_v29 = vld [vmem:[%s4495_s25 + $0x80] sm:$0xff] }
 0x2fa   : > { %v5526_v36 = vadd.f32 %v3973_v2, %v5435_v50  ;;  %v2817_v1 = vpop.f32.mrb[69].mxu0  ;;  %v5604_v22 = vadd.f32 %v4291_v29, %v5506_v16 }
 0x2fb   : > { %v5530_v9 = vadd.f32 %v5435_v50, %v2817_v1  ;;  %v3974_v46 = vpop.f32.mrb[70].mxu0  ;;  %2916 = vadd.xlane.f32.xlu0 %v5523_v18  ;;  %v3012_v1 = vmul.f32 %v5597_v32, %v5597_v32 }
 0x2fc   : > { %v5536_v37 = vadd.f32 %v3974_v46, %v5435_v50  ;;  %v2820_v57 = vpop.f32.mrb[71].mxu0  ;;  %v5616_v46 = vadd.f32 %v4293_v31, %v5516_v13  ;;  %v3010_v16 = vmul.f32 %v5604_v22, %v5604_v22 }
 0x2fd   : > { %v5539_v10 = vadd.f32 %v5435_v50, %v2820_v57  ;;  %3042 = vadd.xlane.f32.xlu1 %v3002_v19  ;;  %v4294_v19 = vld [vmem:[%s4495_s25 + $0xb0] sm:$0xff] }
 0x2fe   : > { %v5625_v57 = vadd.f32 %v4294_v19, %v5526_v36  ;;  %v3011_v13 = vmul.f32 %v5616_v46, %v5616_v46  ;;  %v5636_v14 = vadd.f32 %v4296_v24, %v5536_v37 }
 0x2ff   : > { %3048 = vadd.xlane.f32.xlu0 %v3005_v43  ;;  %v4295_v43 = vld [vmem:[%s4495_s25 + $0xa0] sm:$0xff] }
 0x300   : > { %v5632_v12 = vadd.f32 %v4295_v43, %v5530_v9  ;;  %v3016_v36 = vmul.f32 %v5625_v57, %v5625_v57  ;;  %v3017_v37 = vmul.f32 %v5636_v14, %v5636_v14 }
 0x301   : > { %v3977_v39 = vpop.f32.mrb[72].mxu0  ;;  %2926 = vadd.xlane.f32.xlu1 %v5544_v15 }
 0x302   : > { %v5552_v42 = vadd.f32 %v3977_v39, %v5435_v50  ;;  %v2833_v0 = vpop.f32.mrb[73].mxu0  ;;  %v4297_v39 = vld [vmem:[%s4495_s25 + $0xa8] sm:$0xff]  ;;  %v3014_v9 = vmul.f32 %v5632_v12, %v5632_v12 }
 0x303   : > { %v5558_v38 = vadd.f32 %v5435_v50, %v2833_v0  ;;  %v3978_v63 = vpop.f32.mrb[74].mxu0  ;;  %3044 = vadd.xlane.f32.xlu0 %v3003_v45  ;;  %v5644_v45 = vadd.f32 %v4297_v39, %v5539_v10  ;;  %v4298_v0 = vld [vmem:[%s4495_s25 + $0xd0] sm:$0xff] }
 0x304   : > { %v5561_v54 = vadd.f32 %v3978_v63, %v5435_v50  ;;  %v2836_v33 = vpop.f32.mrb[75].mxu0  ;;  %v5653_v21 = vadd.f32 %v4298_v0, %v5552_v42  ;;  %v4299_v63 = vld [vmem:[%s4495_s25 + $0xc0] sm:$0xff] }
 0x305   : > { %v5568_v17 = vadd.f32 %v5435_v50, %v2836_v33  ;;  %2922 = vadd.xlane.f32.xlu1 %v5555_v23  ;;  %v3015_v10 = vmul.f32 %v5644_v45, %v5644_v45  ;;  %v5660_v33 = vadd.f32 %v4299_v63, %v5558_v38 }
 0x306   : > { %v5664_v40 = vadd.f32 %v4300_v28, %v5561_v54  ;;  %v3020_v42 = vmul.f32 %v5653_v21, %v5653_v21 }
 0x307   : > { %2928 = vadd.xlane.f32.xlu0 %v5564_v62  ;;  %v3018_v38 = vmul.f32 %v5660_v33, %v5660_v33 }
 0x308   : > { %v3021_v54 = vmul.f32 %v5664_v40, %v5664_v40 }
 0x309   : > { %v3981_v47 = vpop.f32.mrb[76].mxu0  ;;  %3054 = vadd.xlane.f32.xlu1 %v3008_v3  ;;  %v4301_v3 = vld [vmem:[%s4495_s25 + $0xc8] sm:$0xff] }
 0x30a   : > { %v5578_v25 = vadd.f32 %v3981_v47, %v5435_v50  ;;  %v2849_v27 = vpop.f32.mrb[77].mxu0  ;;  %v5672_v34 = vadd.f32 %v4301_v3, %v5568_v17  ;;  %v4302_v47 = vld [vmem:[%s4495_s25 + $0xf0] sm:$0xff] }
 0x30b   : > { %v5583_v59 = vadd.f32 %v5435_v50, %v2849_v27  ;;  %v3982_v26 = vpop.f32.mrb[78].mxu0  ;;  %2924 = vadd.xlane.f32.xlu0 %v5575_v61 }
 0x30c   : > { %v5589_v35 = vadd.f32 %v3982_v26, %v5435_v50  ;;  %v2852_v30 = vpop.f32.mrb[79].mxu0  ;;  %v5681_v27 = vadd.f32 %v4302_v47, %v5578_v25  ;;  %v3019_v17 = vmul.f32 %v5672_v34, %v5672_v34 }
 0x30d   : > { %v5592_v49 = vadd.f32 %v5435_v50, %v2852_v30  ;;  %3050 = vadd.xlane.f32.xlu1 %v3006_v55  ;;  %v4292_v50 = vld [vmem:[%s4495_s25 + $0x98] sm:$0xff]  ;;  %v5688_v26 = vadd.f32 %v4303_v44, %v5583_v59 }
 0x30e   : > { %v5608_v2 = vadd.f32 %v4292_v50, %v5509_v6  ;;  %v4304_v55 = vld [vmem:[%s4495_s25 + $0xf8] sm:$0xff]  ;;  %v3024_v59 = vmul.f32 %v5681_v27, %v5681_v27 }
 0x30f   : > { %3056 = vadd.xlane.f32.xlu0 %v3009_v7  ;;  %v5692_v30 = vadd.f32 %v4304_v55, %v5589_v35  ;;  %v3022_v25 = vmul.f32 %v5688_v26, %v5688_v26  ;;  %v4305_v7 = vld [vmem:[%s4495_s25 + $0xe8] sm:$0xff] }
 0x310   : > { %v3013_v6 = vmul.f32 %v5608_v2, %v5608_v2  ;;  %v5700_v52 = vadd.f32 %v4305_v7, %v5592_v49 }
 0x311   : > { %2934 = vadd.xlane.f32.xlu1 %v5597_v32 }
 0x312   : > { %v3023_v35 = vmul.f32 %v5700_v52, %v5700_v52 }
 0x313   : > { %3052 = vadd.xlane.f32.xlu0 %v3007_v4  ;;  %v3025_v4 = vmul.f32 %v5692_v30, %v5692_v30 }
 0x315   : > { %2930 = vadd.xlane.f32.xlu1 %v5604_v22 }
 0x317   : > { %2936 = vadd.xlane.f32.xlu0 %v5608_v2 }
 0x319   : > { %3062 = vadd.xlane.f32.xlu1 %v3012_v1 }
 0x31b   : > { %2932 = vadd.xlane.f32.xlu0 %v5616_v46 }
 0x31d   : > { %3058 = vadd.xlane.f32.xlu1 %v3010_v16 }
 0x31f   : > { %3064 = vadd.xlane.f32.xlu0 %v3013_v6 }
 0x321   : > { %2942 = vadd.xlane.f32.xlu1 %v5625_v57 }
 0x323   : > { %3060 = vadd.xlane.f32.xlu0 %v3011_v13 }
 0x325   : > { %2938 = vadd.xlane.f32.xlu1 %v5632_v12 }
 0x327   : > { %2944 = vadd.xlane.f32.xlu0 %v5636_v14 }
 0x329   : > { %3070 = vadd.xlane.f32.xlu1 %v3016_v36 }
 0x32b   : > { %2940 = vadd.xlane.f32.xlu0 %v5644_v45 }
 0x32d   : > { %3066 = vadd.xlane.f32.xlu1 %v3014_v9 }
 0x32f   : > { %3072 = vadd.xlane.f32.xlu0 %v3017_v37 }
 0x331   : > { %2950 = vadd.xlane.f32.xlu1 %v5653_v21 }
 0x333   : > { %3068 = vadd.xlane.f32.xlu0 %v3015_v10 }
 0x335   : > { %2946 = vadd.xlane.f32.xlu1 %v5660_v33 }
 0x337   : > { %2952 = vadd.xlane.f32.xlu0 %v5664_v40 }
 0x339   : > { %3078 = vadd.xlane.f32.xlu1 %v3020_v42 }
 0x33b   : > { %2948 = vadd.xlane.f32.xlu0 %v5672_v34 }
 0x33d   : > { %3074 = vadd.xlane.f32.xlu1 %v3018_v38 }
 0x33f   : > { %3080 = vadd.xlane.f32.xlu0 %v3021_v54 }
 0x341   : > { %2958 = vadd.xlane.f32.xlu1 %v5681_v27 }
 0x343   : > { %3076 = vadd.xlane.f32.xlu0 %v3019_v17 }
 0x345   : > { %2954 = vadd.xlane.f32.xlu1 %v5688_v26 }
 0x347   : > { %2960 = vadd.xlane.f32.xlu0 %v5692_v30 }
 0x349   : > { %3082 = vadd.xlane.f32.xlu1 %v3022_v25 }
 0x34b   : > { %2956 = vadd.xlane.f32.xlu0 %v5700_v52 }
 0x34d   : > { %3086 = vadd.xlane.f32.xlu1 %v3024_v59 }
 0x34f   : > { %3084 = vadd.xlane.f32.xlu0 %v3023_v35 }
 0x353   : > { %3088 = vadd.xlane.f32.xlu0 %v3025_v4 }
 0x360   : > { %v2903_v29 = vpop.xlane.xlu0 %2902 }
 0x361   : > { %v2964_v50 = vmul.f32 0.03125, %v2903_v29 }
 0x362   : > { %v3031_v1 = vpop.xlane.xlu1 %3030 }
 0x363   : > { %v3124_v49 = vmul.f32 %v2964_v50, %v2964_v50  ;;  %v3092_v31 = vmul.f32 0.03125, %v3031_v1  ;;  %v3220_v29 = vsub.f32 %v5439_v48, %v2964_v50 }
 0x364   : > { %v2899_v16 = vpop.xlane.xlu0 %2898 }
 0x365   : > { %v3156_v6 = vsub.f32 %v3092_v31, %v3124_v49  ;;  %v2962_v43 = vmul.f32 0.03125, %v2899_v16  ;;  %v5723_v16 = vld [vmem:[%s6015_s8] ss:$0 sm:$0xff] }
 0x366   : > { %v2901_v19 = vpop.xlane.xlu1 %2900 }
 0x367   : > { %v3188_v13 = vmax.f32 %v3156_v6, 0.0  ;;  %v3122_v37 = vmul.f32 %v2962_v43, %v2962_v43  ;;  %v5713_v3 = vmul.f32 0.03125, %v2901_v19 }
 0x368   : > { %v2905_v24 = vpop.xlane.xlu0 %2904 }
 0x369   : > { %v3252_v36 = vadd.f32 1e-05, %v3188_v13  ;;  %v5709_v39 = vmul.f32 0.03125, %v2905_v24  ;;  %v3123_v25 = vmul.f32 %v5713_v3, %v5713_v3  ;;  %v5728_v24 = vld [vmem:[%s6016_s9] ss:$0 sm:$0xff] }
 0x36a   : > { %v3027_v9 = vpop.xlane.xlu1 %3026 }
 0x36b   : > { %4210 = vrsqrt.f32 %v3252_v36  ;;  %v3090_v0 = vmul.f32 0.03125, %v3027_v9  ;;  %v3125_v63 = vmul.f32 %v5709_v39, %v5709_v39 }
 0x36c   : > { %v3033_v10 = vpop.xlane.xlu0 %3032 }
 0x36d   : > { %v3154_v28 = vsub.f32 %v3090_v0, %v3122_v37  ;;  %v3093_v42 = vmul.f32 0.03125, %v3033_v10 }
 0x36e   : > { %v2911_v38 = vpop.xlane.xlu1 %2910 }
 0x36f   : > { %v3186_v54 = vmax.f32 %v3154_v28, 0.0  ;;  %v3157_v47 = vsub.f32 %v3093_v42, %v3125_v63  ;;  %v5717_v4 = vmul.f32 0.03125, %v2911_v38 }
 0x370   : > { %v3029_v17 = vpop.xlane.xlu0 %3028 }
 0x371   : > { %v3250_v44 = vadd.f32 1e-05, %v3186_v54  ;;  %v3189_v55 = vmax.f32 %v3157_v47, 0.0  ;;  %v3091_v7 = vmul.f32 0.03125, %v3029_v17  ;;  %v3128_v48 = vmul.f32 %v5717_v4, %v5717_v4 }
 0x372   : > { %v2907_v59 = vpop.xlane.xlu1 %2906  ;;  %v3218_v17 = vsub.f32 %v5447_v5, %v2962_v43 }
 0x373   : > { %4212 = vrsqrt.f32 %v3250_v44  ;;  %v3253_v35 = vadd.f32 1e-05, %v3189_v55  ;;  %v3155_v1 = vsub.f32 %v3091_v7, %v3123_v25  ;;  %v5732_v50 = vmul.f32 0.03125, %v2907_v59 }
 0x374   : > { %v2913_v49 = vpop.xlane.xlu0 %2912 }
 0x375   : > { %v4211_v31 = vpop.eup %4210  ;;  %4214 = vrsqrt.f32 %v3253_v35  ;;  %v3187_v19 = vmax.f32 %v3155_v1, 0.0  ;;  %v5741_v10 = vmul.f32 0.03125, %v2913_v49  ;;  %v3126_v38 = vmul.f32 %v5732_v50, %v5732_v50 }
 0x376   : > { %v3316_v6 = vmul.f32 %v4211_v31, %v3220_v29  ;;  %v3039_v13 = vpop.xlane.xlu1 %3038  ;;  %v3221_v29 = vsub.f32 %v5455_v60, %v5709_v39 }
 0x377   : > { %v3096_v36 = vmul.f32 0.03125, %v3039_v13  ;;  %v3251_v37 = vadd.f32 1e-05, %v3187_v19  ;;  %v3129_v25 = vmul.f32 %v5741_v10, %v5741_v10 }
 0x378   : > { %v3354_v9 = vmul.f32 %v5723_v16, %v3316_v6  ;;  %v2909_v0 = vpop.xlane.xlu0 %2908 }
 0x379   : > { %v3160_v63 = vsub.f32 %v3096_v36, %v3128_v48  ;;  %4216 = vrsqrt.f32 %v3251_v37  ;;  %v5752_v49 = vmul.f32 0.03125, %v2909_v0 }
 0x37a   : > { %v3392_v28 = vadd.f32 %v5728_v24, %v3354_v9  ;;  %v3035_v42 = vpop.xlane.xlu1 %3034 }
 0x37b   : > { %v3192_v54 = vmax.f32 %v3160_v63, 0.0  ;;  %v3094_v47 = vmul.f32 0.03125, %v3035_v42  ;;  %v3127_v39 = vmul.f32 %v5752_v49, %v5752_v49 }
 0x37c   : > { %3424 = vst [vmem:[%s5739_s30 + $0x10] sm:$0xff] %v3392_v28  ;;  %v3041_v44 = vpop.xlane.xlu0 %3040  ;;  %v3219_v28 = vsub.f32 %v5451_v56, %v5713_v3 }
 0x37d   : > { %v4213_v55 = vpop.eup %4212  ;;  %v3256_v7 = vadd.f32 1e-05, %v3192_v54  ;;  %v3158_v59 = vsub.f32 %v3094_v47, %v3126_v38  ;;  %v3097_v35 = vmul.f32 0.03125, %v3041_v44 }
 0x37e   : > { %v3314_v1 = vmul.f32 %v4213_v55, %v3218_v17  ;;  %v2919_v31 = vpop.xlane.xlu1 %2918 }
 0x37f   : > { %v4215_v6 = vpop.eup %4214  ;;  %4218 = vrsqrt.f32 %v3256_v7  ;;  %v3190_v19 = vmax.f32 %v3158_v59, 0.0  ;;  %v3161_v13 = vsub.f32 %v3097_v35, %v3129_v25  ;;  %v5761_v38 = vmul.f32 0.03125, %v2919_v31 }
 0x380   : > { %v3352_v5 = vmul.f32 %v5723_v16, %v3314_v1  ;;  %v3317_v43 = vmul.f32 %v4215_v6, %v3221_v29  ;;  %v3037_v48 = vpop.xlane.xlu0 %3036  ;;  %v3224_v29 = vsub.f32 %v5465_v51, %v5717_v4  ;;  %v3222_v51 = vsub.f32 %v5473_v11, %v5732_v50 }
 0x381   : > { %v3254_v36 = vadd.f32 1e-05, %v3190_v19  ;;  %v3193_v9 = vmax.f32 %v3161_v13, 0.0  ;;  %v3095_v0 = vmul.f32 0.03125, %v3037_v48  ;;  %v3132_v56 = vmul.f32 %v5761_v38, %v5761_v38 }
 0x382   : > { %v3390_v37 = vadd.f32 %v5728_v24, %v3352_v5  ;;  %v3355_v60 = vmul.f32 %v5723_v16, %v3317_v43  ;;  %v2915_v63 = vpop.xlane.xlu1 %2914 }
 0x383   : > { %4220 = vrsqrt.f32 %v3254_v36  ;;  %v3257_v42 = vadd.f32 1e-05, %v3193_v9  ;;  %v4217_v54 = vpop.eup %4216  ;;  %v3159_v17 = vsub.f32 %v3095_v0, %v3127_v39  ;;  %v5769_v3 = vmul.f32 0.03125, %v2915_v63 }
 0x384   : > { %3422 = vst [vmem:[%s5739_s30] sm:$0xff] %v3390_v37  ;;  %v3393_v47 = vadd.f32 %v5728_v24, %v3355_v60  ;;  %v2921_v44 = vpop.xlane.xlu0 %2920  ;;  %v3315_v55 = vmul.f32 %v4217_v54, %v3219_v28  ;;  %v3225_v54 = vsub.f32 %v5476_v41, %v5741_v10 }
 0x385   : > { %4222 = vrsqrt.f32 %v3257_v42  ;;  %v3191_v25 = vmax.f32 %v3159_v17, 0.0  ;;  %v5774_v13 = vmul.f32 0.03125, %v2921_v44  ;;  %v3130_v36 = vmul.f32 %v5769_v3, %v5769_v3 }
 0x386   : > { %3425 = vst [vmem:[%s5739_s30 + $0x18] sm:$0xff] %v3393_v47  ;;  %v3047_v7 = vpop.xlane.xlu1 %3046  ;;  %v3353_v59 = vmul.f32 %v5723_v16, %v3315_v55 }
 0x387   : > { %v3100_v35 = vmul.f32 0.03125, %v3047_v7  ;;  %v3255_v1 = vadd.f32 1e-05, %v3191_v25  ;;  %v3133_v0 = vmul.f32 %v5774_v13, %v5774_v13 }
 0x388   : > { %v2917_v31 = vpop.xlane.xlu0 %2916  ;;  %v3391_v19 = vadd.f32 %v5728_v24, %v3353_v59 }
 0x389   : > { %v4219_v6 = vpop.eup %4218  ;;  %v3164_v5 = vsub.f32 %v3100_v35, %v3132_v56  ;;  %4224 = vrsqrt.f32 %v3255_v1  ;;  %v5787_v44 = vmul.f32 0.03125, %v2917_v31 }
 0x38a   : > { %v3320_v43 = vmul.f32 %v4219_v6, %v3224_v29  ;;  %v3043_v48 = vpop.xlane.xlu1 %3042  ;;  %3423 = vst [vmem:[%s5739_s30 + $0x8] sm:$0xff] %v3391_v19  ;;  %v3223_v19 = vsub.f32 %v5484_v8, %v5752_v49 }
 0x38b   : > { %v3196_v9 = vmax.f32 %v3164_v5, 0.0  ;;  %v3098_v37 = vmul.f32 0.03125, %v3043_v48  ;;  %v3131_v1 = vmul.f32 %v5787_v44, %v5787_v44 }
 0x38c   : > { %v3358_v4 = vmul.f32 %v5723_v16, %v3320_v43  ;;  %v3049_v60 = vpop.xlane.xlu0 %3048 }
 0x38d   : > { %v4221_v39 = vpop.eup %4220  ;;  %v3260_v63 = vadd.f32 1e-05, %v3196_v9  ;;  %v3162_v28 = vsub.f32 %v3098_v37, %v3130_v36  ;;  %v3101_v42 = vmul.f32 0.03125, %v3049_v60 }
 0x38e   : > { %v3396_v47 = vadd.f32 %v5728_v24, %v3358_v4  ;;  %v3318_v17 = vmul.f32 %v4221_v39, %v3222_v51  ;;  %v2927_v11 = vpop.xlane.xlu1 %2926 }
 0x38f   : > { %v4223_v50 = vpop.eup %4222  ;;  %4226 = vrsqrt.f32 %v3260_v63  ;;  %v3194_v55 = vmax.f32 %v3162_v28, 0.0  ;;  %v3165_v25 = vsub.f32 %v3101_v42, %v3133_v0  ;;  %v5797_v43 = vmul.f32 0.03125, %v2927_v11 }
 0x390   : > { %3428 = vst [vmem:[%s5739_s30 + $0x30] sm:$0xff] %v3396_v47  ;;  %v3356_v7 = vmul.f32 %v5723_v16, %v3318_v17  ;;  %v3321_v59 = vmul.f32 %v4223_v50, %v3225_v54  ;;  %v3045_v56 = vpop.xlane.xlu0 %3044  ;;  %v3228_v63 = vsub.f32 %v5493_v58, %v5761_v38  ;;  %v3226_v58 = vsub.f32 %v5503_v20, %v5769_v3 }
 0x391   : > { %v3258_v35 = vadd.f32 1e-05, %v3194_v55  ;;  %v3197_v29 = vmax.f32 %v3165_v25, 0.0  ;;  %v3099_v31 = vmul.f32 0.03125, %v3045_v56  ;;  %v3136_v8 = vmul.f32 %v5797_v43, %v5797_v43 }
 0x392   : > { %v3394_v41 = vadd.f32 %v5728_v24, %v3356_v7  ;;  %v3359_v10 = vmul.f32 %v5723_v16, %v3321_v59  ;;  %v2923_v6 = vpop.xlane.xlu1 %2922 }
 0x393   : > { %4228 = vrsqrt.f32 %v3258_v35  ;;  %v3261_v5 = vadd.f32 1e-05, %v3197_v29  ;;  %v4225_v48 = vpop.eup %4224  ;;  %v3163_v9 = vsub.f32 %v3099_v31, %v3131_v1  ;;  %v5805_v49 = vmul.f32 0.03125, %v2923_v6 }
 0x394   : > { %3426 = vst [vmem:[%s5739_s30 + $0x20] sm:$0xff] %v3394_v41  ;;  %v3397_v36 = vadd.f32 %v5728_v24, %v3359_v10  ;;  %v2929_v37 = vpop.xlane.xlu0 %2928  ;;  %v3319_v51 = vmul.f32 %v4225_v48, %v3223_v19  ;;  %v3229_v31 = vsub.f32 %v5512_v53, %v5774_v13 }
 0x395   : > { %4230 = vrsqrt.f32 %v3261_v5  ;;  %v3195_v4 = vmax.f32 %v3163_v9, 0.0  ;;  %v5810_v17 = vmul.f32 0.03125, %v2929_v37  ;;  %v3134_v25 = vmul.f32 %v5805_v49, %v5805_v49 }
 0x396   : > { %3429 = vst [vmem:[%s5739_s30 + $0x38] sm:$0xff] %v3397_v36  ;;  %v3055_v60 = vpop.xlane.xlu1 %3054  ;;  %v3357_v39 = vmul.f32 %v5723_v16, %v3319_v51 }
 0x397   : > { %v3104_v0 = vmul.f32 0.03125, %v3055_v60  ;;  %v3259_v28 = vadd.f32 1e-05, %v3195_v4  ;;  %v3137_v29 = vmul.f32 %v5810_v17, %v5810_v17 }
 0x398   : > { %v2925_v42 = vpop.xlane.xlu0 %2924  ;;  %v3395_v47 = vadd.f32 %v5728_v24, %v3357_v39 }
 0x399   : > { %v4227_v54 = vpop.eup %4226  ;;  %v3168_v11 = vsub.f32 %v3104_v0, %v3136_v8  ;;  %4232 = vrsqrt.f32 %v3259_v28  ;;  %v5823_v5 = vmul.f32 0.03125, %v2925_v42 }
 0x39a   : > { %v3324_v50 = vmul.f32 %v4227_v54, %v3228_v63  ;;  %v3051_v55 = vpop.xlane.xlu1 %3050  ;;  %3427 = vst [vmem:[%s5739_s30 + $0x28] sm:$0xff] %v3395_v47  ;;  %v3227_v63 = vsub.f32 %v5523_v18, %v5787_v44 }
 0x39b   : > { %v3200_v7 = vmax.f32 %v3168_v11, 0.0  ;;  %v3102_v59 = vmul.f32 0.03125, %v3051_v55  ;;  %v3135_v39 = vmul.f32 %v5823_v5, %v5823_v5 }
 0x39c   : > { %v3362_v38 = vmul.f32 %v5723_v16, %v3324_v50  ;;  %v3057_v56 = vpop.xlane.xlu0 %3056 }
 0x39d   : > { %v4229_v35 = vpop.eup %4228  ;;  %v3264_v41 = vadd.f32 1e-05, %v3200_v7  ;;  %v3166_v10 = vsub.f32 %v3102_v59, %v3134_v25  ;;  %v3105_v1 = vmul.f32 0.03125, %v3057_v56 }
 0x39e   : > { %v3400_v6 = vadd.f32 %v5728_v24, %v3362_v38  ;;  %v3322_v19 = vmul.f32 %v4229_v35, %v3226_v58  ;;  %v2935_v20 = vpop.xlane.xlu1 %2934  ;;  %v3232_v38 = vsub.f32 %v5544_v15, %v5797_v43  ;;  %v3230_v15 = vsub.f32 %v5555_v23, %v5805_v49 }
 0x39f   : > { %v4231_v3 = vpop.eup %4230  ;;  %4234 = vrsqrt.f32 %v3264_v41  ;;  %v3198_v48 = vmax.f32 %v3166_v10, 0.0  ;;  %v3169_v36 = vsub.f32 %v3105_v1, %v3137_v29  ;;  %v5833_v42 = vmul.f32 0.03125, %v2935_v20 }
 0x3a0   : > { %3432 = vst [vmem:[%s5739_s30 + $0x50] sm:$0xff] %v3400_v6  ;;  %v3360_v9 = vmul.f32 %v5723_v16, %v3322_v19  ;;  %v3325_v37 = vmul.f32 %v4231_v3, %v3229_v31  ;;  %v3053_v51 = vpop.xlane.xlu0 %3052 }
 0x3a1   : > { %v3262_v4 = vadd.f32 1e-05, %v3198_v48  ;;  %v3201_v60 = vmax.f32 %v3169_v36, 0.0  ;;  %v3103_v8 = vmul.f32 0.03125, %v3053_v51  ;;  %v3140_v18 = vmul.f32 %v5833_v42, %v5833_v42 }
 0x3a2   : > { %v3398_v53 = vadd.f32 %v5728_v24, %v3360_v9  ;;  %v3363_v13 = vmul.f32 %v5723_v16, %v3325_v37  ;;  %v2931_v0 = vpop.xlane.xlu1 %2930 }
 0x3a3   : > { %4236 = vrsqrt.f32 %v3262_v4  ;;  %v3265_v28 = vadd.f32 1e-05, %v3201_v60  ;;  %v4233_v54 = vpop.eup %4232  ;;  %v3167_v11 = vsub.f32 %v3103_v8, %v3135_v39  ;;  %v5841_v44 = vmul.f32 0.03125, %v2931_v0 }
 0x3a4   : > { %3430 = vst [vmem:[%s5739_s30 + $0x40] sm:$0xff] %v3398_v53  ;;  %v3401_v47 = vadd.f32 %v5728_v24, %v3363_v13  ;;  %v2937_v50 = vpop.xlane.xlu0 %2936  ;;  %v3323_v55 = vmul.f32 %v4233_v54, %v3227_v63  ;;  %v3233_v60 = vsub.f32 %v5564_v62, %v5810_v17 }
 0x3a5   : > { %4238 = vrsqrt.f32 %v3265_v28  ;;  %v3199_v25 = vmax.f32 %v3167_v11, 0.0  ;;  %v5846_v10 = vmul.f32 0.03125, %v2937_v50  ;;  %v3138_v19 = vmul.f32 %v5841_v44, %v5841_v44 }
 0x3a6   : > { %3433 = vst [vmem:[%s5739_s30 + $0x58] sm:$0xff] %v3401_v47  ;;  %v3063_v7 = vpop.xlane.xlu1 %3062  ;;  %v3361_v59 = vmul.f32 %v5723_v16, %v3323_v55 }
 0x3a7   : > { %v3108_v58 = vmul.f32 0.03125, %v3063_v7  ;;  %v3263_v56 = vadd.f32 1e-05, %v3199_v25  ;;  %v3141_v9 = vmul.f32 %v5846_v10, %v5846_v10  ;;  %v3231_v7 = vsub.f32 %v5575_v61, %v5823_v5 }
 0x3a8   : > { %v2933_v35 = vpop.xlane.xlu0 %2932  ;;  %v3399_v41 = vadd.f32 %v5728_v24, %v3361_v59 }
 0x3a9   : > { %v4235_v29 = vpop.eup %4234  ;;  %v3172_v1 = vsub.f32 %v3108_v58, %v3140_v18  ;;  %4240 = vrsqrt.f32 %v3263_v56  ;;  %v5859_v39 = vmul.f32 0.03125, %v2933_v35 }
 0x3aa   : > { %v3328_v31 = vmul.f32 %v4235_v29, %v3232_v38  ;;  %v3059_v6 = vpop.xlane.xlu1 %3058  ;;  %3431 = vst [vmem:[%s5739_s30 + $0x48] sm:$0xff] %v3399_v41 }
 0x3ab   : > { %v3204_v20 = vmax.f32 %v3172_v1, 0.0  ;;  %v3106_v3 = vmul.f32 0.03125, %v3059_v6  ;;  %v3139_v50 = vmul.f32 %v5859_v39, %v5859_v39 }
 0x3ac   : > { %v3366_v43 = vmul.f32 %v5723_v16, %v3328_v31  ;;  %v3065_v48 = vpop.xlane.xlu0 %3064 }
 0x3ad   : > { %v4237_v36 = vpop.eup %4236  ;;  %v3268_v37 = vadd.f32 1e-05, %v3204_v20  ;;  %v3170_v51 = vsub.f32 %v3106_v3, %v3138_v19  ;;  %v3109_v4 = vmul.f32 0.03125, %v3065_v48  ;;  %v3236_v19 = vsub.f32 %v5597_v32, %v5833_v42 }
 0x3ae   : > { %v3404_v53 = vadd.f32 %v5728_v24, %v3366_v43  ;;  %v3326_v13 = vmul.f32 %v4237_v36, %v3230_v15  ;;  %v2943_v23 = vpop.xlane.xlu1 %2942  ;;  %v3234_v32 = vsub.f32 %v5604_v22, %v5841_v44 }
 0x3af   : > { %v4239_v49 = vpop.eup %4238  ;;  %4242 = vrsqrt.f32 %v3268_v37  ;;  %v3202_v8 = vmax.f32 %v3170_v51, 0.0  ;;  %v3173_v0 = vsub.f32 %v3109_v4, %v3141_v9  ;;  %v5869_v18 = vmul.f32 0.03125, %v2943_v23 }
 0x3b0   : > { %3436 = vst [vmem:[%s5739_s30 + $0x70] sm:$0xff] %v3404_v53  ;;  %v3364_v63 = vmul.f32 %v5723_v16, %v3326_v13  ;;  %v3329_v28 = vmul.f32 %v4239_v49, %v3233_v60  ;;  %v3061_v54 = vpop.xlane.xlu0 %3060 }
 0x3b1   : > { %v3266_v47 = vadd.f32 1e-05, %v3202_v8  ;;  %v3205_v11 = vmax.f32 %v3173_v0, 0.0  ;;  %v3107_v55 = vmul.f32 0.03125, %v3061_v54  ;;  %v3144_v61 = vmul.f32 %v5869_v18, %v5869_v18 }
 0x3b2   : > { %v3402_v62 = vadd.f32 %v5728_v24, %v3364_v63  ;;  %v3367_v17 = vmul.f32 %v5723_v16, %v3329_v28  ;;  %v2939_v25 = vpop.xlane.xlu1 %2938  ;;  %v3237_v63 = vsub.f32 %v5608_v2, %v5846_v10 }
 0x3b3   : > { %4244 = vrsqrt.f32 %v3266_v47  ;;  %v3269_v59 = vadd.f32 1e-05, %v3205_v11  ;;  %v4241_v58 = vpop.eup %4240  ;;  %v3171_v56 = vsub.f32 %v3107_v55, %v3139_v50  ;;  %v5877_v5 = vmul.f32 0.03125, %v2939_v25 }
 0x3b4   : > { %3434 = vst [vmem:[%s5739_s30 + $0x60] sm:$0xff] %v3402_v62  ;;  %v3405_v38 = vadd.f32 %v5728_v24, %v3367_v17  ;;  %v2945_v35 = vpop.xlane.xlu0 %2944  ;;  %v3327_v29 = vmul.f32 %v4241_v58, %v3231_v7 }
 0x3b5   : > { %4246 = vrsqrt.f32 %v3269_v59  ;;  %v3203_v41 = vmax.f32 %v3171_v56, 0.0  ;;  %v5882_v48 = vmul.f32 0.03125, %v2945_v35  ;;  %v3142_v51 = vmul.f32 %v5877_v5, %v5877_v5 }
 0x3b6   : > { %3437 = vst [vmem:[%s5739_s30 + $0x78] sm:$0xff] %v3405_v38  ;;  %v3071_v1 = vpop.xlane.xlu1 %3070  ;;  %v3365_v31 = vmul.f32 %v5723_v16, %v3327_v29  ;;  %v3235_v56 = vsub.f32 %v5616_v46, %v5859_v39 }
 0x3b7   : > { %v3112_v6 = vmul.f32 0.03125, %v3071_v1  ;;  %v3267_v20 = vadd.f32 1e-05, %v3203_v41  ;;  %v3145_v23 = vmul.f32 %v5882_v48, %v5882_v48 }
 0x3b8   : > { %v2941_v3 = vpop.xlane.xlu0 %2940  ;;  %v3403_v43 = vadd.f32 %v5728_v24, %v3365_v31 }
 0x3b9   : > { %v4243_v15 = vpop.eup %4242  ;;  %v3176_v36 = vsub.f32 %v3112_v6, %v3144_v61  ;;  %4248 = vrsqrt.f32 %v3267_v20  ;;  %v5895_v47 = vmul.f32 0.03125, %v2941_v3 }
 0x3ba   : > { %v3332_v9 = vmul.f32 %v4243_v15, %v3236_v19  ;;  %v3067_v37 = vpop.xlane.xlu1 %3066  ;;  %3435 = vst [vmem:[%s5739_s30 + $0x68] sm:$0xff] %v3403_v43  ;;  %v3240_v43 = vsub.f32 %v5625_v57, %v5869_v18  ;;  %v3238_v57 = vsub.f32 %v5632_v12, %v5877_v5 }
 0x3bb   : > { %v3208_v4 = vmax.f32 %v3176_v36, 0.0  ;;  %v3110_v60 = vmul.f32 0.03125, %v3067_v37  ;;  %v3143_v59 = vmul.f32 %v5895_v47, %v5895_v47 }
 0x3bc   : > { %v3370_v42 = vmul.f32 %v5723_v16, %v3332_v9  ;;  %v3073_v53 = vpop.xlane.xlu0 %3072 }
 0x3bd   : > { %v4245_v13 = vpop.eup %4244  ;;  %v3272_v49 = vadd.f32 1e-05, %v3208_v4  ;;  %v3174_v8 = vsub.f32 %v3110_v60, %v3142_v51  ;;  %v3113_v0 = vmul.f32 0.03125, %v3073_v53 }
 0x3be   : > { %v3408_v28 = vadd.f32 %v5728_v24, %v3370_v42  ;;  %v3330_v54 = vmul.f32 %v4245_v13, %v3234_v32  ;;  %v2951_v22 = vpop.xlane.xlu1 %2950 }
 0x3bf   : > { %v4247_v44 = vpop.eup %4246  ;;  %4250 = vrsqrt.f32 %v3272_v49  ;;  %v3206_v11 = vmax.f32 %v3174_v8, 0.0  ;;  %v3177_v62 = vsub.f32 %v3113_v0, %v3145_v23  ;;  %v5905_v29 = vmul.f32 0.03125, %v2951_v22 }
 0x3c0   : > { %3440 = vst [vmem:[%s5739_s30 + $0x90] sm:$0xff] %v3408_v28  ;;  %v3368_v17 = vmul.f32 %v5723_v16, %v3330_v54  ;;  %v3333_v50 = vmul.f32 %v4247_v44, %v3237_v63  ;;  %v3069_v55 = vpop.xlane.xlu0 %3068  ;;  %v3241_v22 = vsub.f32 %v5636_v14, %v5882_v48 }
 0x3c1   : > { %v3270_v25 = vadd.f32 1e-05, %v3206_v11  ;;  %v3209_v7 = vmax.f32 %v3177_v62, 0.0  ;;  %v3111_v58 = vmul.f32 0.03125, %v3069_v55  ;;  %v3148_v46 = vmul.f32 %v5905_v29, %v5905_v29 }
 0x3c2   : > { %v3406_v2 = vadd.f32 %v5728_v24, %v3368_v17  ;;  %v3371_v10 = vmul.f32 %v5723_v16, %v3333_v50  ;;  %v2947_v38 = vpop.xlane.xlu1 %2946 }
 0x3c3   : > { %4252 = vrsqrt.f32 %v3270_v25  ;;  %v3273_v35 = vadd.f32 1e-05, %v3209_v7  ;;  %v4249_v41 = vpop.eup %4248  ;;  %v3175_v31 = vsub.f32 %v3111_v58, %v3143_v59  ;;  %v5913_v39 = vmul.f32 0.03125, %v2947_v38 }
 0x3c4   : > { %3438 = vst [vmem:[%s5739_s30 + $0x80] sm:$0xff] %v3406_v2  ;;  %v3409_v1 = vadd.f32 %v5728_v24, %v3371_v10  ;;  %v2953_v61 = vpop.xlane.xlu0 %2952  ;;  %v3331_v6 = vmul.f32 %v4249_v41, %v3235_v56  ;;  %v3239_v56 = vsub.f32 %v5644_v45, %v5895_v47 }
 0x3c5   : > { %4254 = vrsqrt.f32 %v3273_v35  ;;  %v3207_v19 = vmax.f32 %v3175_v31, 0.0  ;;  %v5918_v4 = vmul.f32 0.03125, %v2953_v61  ;;  %v3146_v53 = vmul.f32 %v5913_v39, %v5913_v39 }
 0x3c6   : > { %3441 = vst [vmem:[%s5739_s30 + $0x98] sm:$0xff] %v3409_v1  ;;  %v3079_v20 = vpop.xlane.xlu1 %3078  ;;  %v3369_v3 = vmul.f32 %v5723_v16, %v3331_v6 }
 0x3c7   : > { %v3116_v15 = vmul.f32 0.03125, %v3079_v20  ;;  %v3271_v36 = vadd.f32 1e-05, %v3207_v19  ;;  %v3149_v0 = vmul.f32 %v5918_v4, %v5918_v4 }
 0x3c8   : > { %v2949_v9 = vpop.xlane.xlu0 %2948  ;;  %v3407_v51 = vadd.f32 %v5728_v24, %v3369_v3 }
 0x3c9   : > { %v4251_v37 = vpop.eup %4250  ;;  %v3180_v60 = vsub.f32 %v3116_v15, %v3148_v46  ;;  %4256 = vrsqrt.f32 %v3271_v36  ;;  %v5931_v62 = vmul.f32 0.03125, %v2949_v9 }
 0x3ca   : > { %v3336_v32 = vmul.f32 %v4251_v37, %v3240_v43  ;;  %v3075_v42 = vpop.xlane.xlu1 %3074  ;;  %3439 = vst [vmem:[%s5739_s30 + $0x88] sm:$0xff] %v3407_v51  ;;  %v3244_v43 = vsub.f32 %v5653_v21, %v5905_v29  ;;  %v3242_v21 = vsub.f32 %v5660_v33, %v5913_v39 }
 0x3cb   : > { %v3212_v13 = vmax.f32 %v3180_v60, 0.0  ;;  %v3114_v23 = vmul.f32 0.03125, %v3075_v42  ;;  %v3147_v59 = vmul.f32 %v5931_v62, %v5931_v62 }
 0x3cc   : > { %v3374_v18 = vmul.f32 %v5723_v16, %v3336_v32  ;;  %v3081_v49 = vpop.xlane.xlu0 %3080 }
 0x3cd   : > { %v4253_v8 = vpop.eup %4252  ;;  %v3276_v63 = vadd.f32 1e-05, %v3212_v13  ;;  %v3178_v28 = vsub.f32 %v3114_v23, %v3146_v53  ;;  %v3117_v54 = vmul.f32 0.03125, %v3081_v49 }
 0x3ce   : > { %v3412_v44 = vadd.f32 %v5728_v24, %v3374_v18  ;;  %v3334_v11 = vmul.f32 %v4253_v8, %v3238_v57  ;;  %v2959_v12 = vpop.xlane.xlu1 %2958 }
 0x3cf   : > { %v4255_v5 = vpop.eup %4254  ;;  %4258 = vrsqrt.f32 %v3276_v63  ;;  %v3210_v17 = vmax.f32 %v3178_v28, 0.0  ;;  %v3181_v50 = vsub.f32 %v3117_v54, %v3149_v0  ;;  %v5947_v15 = vmul.f32 0.03125, %v2959_v12 }
 0x3d0   : > { %3444 = vst [vmem:[%s5739_s30 + $0xb0] sm:$0xff] %v3412_v44  ;;  %v3372_v55 = vmul.f32 %v5723_v16, %v3334_v11  ;;  %v3337_v25 = vmul.f32 %v4255_v5, %v3241_v22  ;;  %v3077_v7 = vpop.xlane.xlu0 %3076  ;;  %v3245_v22 = vsub.f32 %v5664_v40, %v5918_v4 }
 0x3d1   : > { %v3274_v2 = vadd.f32 1e-05, %v3210_v17  ;;  %v3213_v10 = vmax.f32 %v3181_v50, 0.0  ;;  %v3115_v58 = vmul.f32 0.03125, %v3077_v7  ;;  %v3152_v13 = vmul.f32 %v5947_v15, %v5947_v15 }
 0x3d2   : > { %v3410_v14 = vadd.f32 %v5728_v24, %v3372_v55  ;;  %v3375_v48 = vmul.f32 %v5723_v16, %v3337_v25  ;;  %v2955_v38 = vpop.xlane.xlu1 %2954 }
 0x3d3   : > { %4260 = vrsqrt.f32 %v3274_v2  ;;  %v3277_v35 = vadd.f32 1e-05, %v3213_v10  ;;  %v5941_v41 = vmul.f32 0.03125, %v2955_v38  ;;  %v4257_v1 = vpop.eup %4256  ;;  %v3179_v61 = vsub.f32 %v3115_v58, %v3147_v59 }
 0x3d4   : > { %3442 = vst [vmem:[%s5739_s30 + $0xa0] sm:$0xff] %v3410_v14  ;;  %v3413_v31 = vadd.f32 %v5728_v24, %v3375_v48  ;;  %v2961_v6 = vpop.xlane.xlu0 %2960  ;;  %v3335_v19 = vmul.f32 %v4257_v1, %v3239_v56  ;;  %v3243_v10 = vsub.f32 %v5672_v34, %v5931_v62 }
 0x3d5   : > { %4262 = vrsqrt.f32 %v3277_v35  ;;  %v3211_v20 = vmax.f32 %v3179_v61, 0.0  ;;  %v3150_v45 = vmul.f32 %v5941_v41, %v5941_v41  ;;  %v2993_v18 = vmul.f32 0.03125, %v2961_v6 }
 0x3d6   : > { %3445 = vst [vmem:[%s5739_s30 + $0xb8] sm:$0xff] %v3413_v31  ;;  %v3083_v3 = vpop.xlane.xlu1 %3082  ;;  %v3373_v46 = vmul.f32 %v5723_v16, %v3335_v19  ;;  %v3246_v31 = vsub.f32 %v5688_v26, %v5941_v41  ;;  %v3248_v6 = vsub.f32 %v5681_v27, %v5947_v15 }
 0x3d7   : > { %v3118_v47 = vmul.f32 0.03125, %v3083_v3  ;;  %v3275_v36 = vadd.f32 1e-05, %v3211_v20  ;;  %v3153_v55 = vmul.f32 %v2993_v18, %v2993_v18 }
 0x3d8   : > { %v2957_v9 = vpop.xlane.xlu0 %2956  ;;  %v3411_v51 = vadd.f32 %v5728_v24, %v3373_v46 }
 0x3d9   : > { %v4259_v37 = vpop.eup %4258  ;;  %v3182_v60 = vsub.f32 %v3118_v47, %v3150_v45  ;;  %v5954_v32 = vmul.f32 0.03125, %v2957_v9  ;;  %4264 = vrsqrt.f32 %v3275_v36 }
 0x3da   : > { %v3340_v42 = vmul.f32 %v4259_v37, %v3244_v43  ;;  %v3087_v53 = vpop.xlane.xlu1 %3086  ;;  %3443 = vst [vmem:[%s5739_s30 + $0xa8] sm:$0xff] %v3411_v51  ;;  %v3249_v43 = vsub.f32 %v5692_v30, %v2993_v18 }
 0x3db   : > { %v3214_v23 = vmax.f32 %v3182_v60, 0.0  ;;  %v3120_v57 = vmul.f32 0.03125, %v3087_v53  ;;  %v3151_v63 = vmul.f32 %v5954_v32, %v5954_v32  ;;  %v3247_v46 = vsub.f32 %v5700_v52, %v5954_v32 }
 0x3dc   : > { %v3378_v29 = vmul.f32 %v5723_v16, %v3340_v42  ;;  %v3085_v49 = vpop.xlane.xlu0 %3084 }
 0x3dd   : > { %v4261_v8 = vpop.eup %4260  ;;  %v3278_v0 = vadd.f32 1e-05, %v3214_v23  ;;  %v3184_v28 = vsub.f32 %v3120_v57, %v3152_v13  ;;  %v3119_v54 = vmul.f32 0.03125, %v3085_v49 }
 0x3de   : > { %v3416_v44 = vadd.f32 %v5728_v24, %v3378_v29  ;;  %v3338_v11 = vmul.f32 %v4261_v8, %v3242_v21 }
 0x3df   : > { %v4263_v12 = vpop.eup %4262  ;;  %4266 = vrsqrt.f32 %v3278_v0  ;;  %v3216_v33 = vmax.f32 %v3184_v28, 0.0  ;;  %v3183_v39 = vsub.f32 %v3119_v54, %v3151_v63 }
 0x3e0   : > { %3448 = vst [vmem:[%s5739_s30 + $0xd0] sm:$0xff] %v3416_v44  ;;  %v3376_v5 = vmul.f32 %v5723_v16, %v3338_v11  ;;  %v3341_v17 = vmul.f32 %v4263_v12, %v3245_v22  ;;  %v3089_v50 = vpop.xlane.xlu0 %3088 }
 0x3e1   : > { %v3280_v25 = vadd.f32 1e-05, %v3216_v33  ;;  %v3215_v7 = vmax.f32 %v3183_v39, 0.0  ;;  %v3121_v2 = vmul.f32 0.03125, %v3089_v50 }
 0x3e2   : > { %v3414_v40 = vadd.f32 %v5728_v24, %v3376_v5  ;;  %v3379_v4 = vmul.f32 %v5723_v16, %v3341_v17 }
 0x3e3   : > { %4268 = vrsqrt.f32 %v3280_v25  ;;  %v3279_v14 = vadd.f32 1e-05, %v3215_v7  ;;  %v3185_v48 = vsub.f32 %v3121_v2, %v3153_v55  ;;  %v4265_v59 = vpop.eup %4264 }
 0x3e4   : > { %3446 = vst [vmem:[%s5739_s30 + $0xc0] sm:$0xff] %v3414_v40  ;;  %v3417_v58 = vadd.f32 %v5728_v24, %v3379_v4  ;;  %v3339_v38 = vmul.f32 %v4265_v59, %v3243_v10 }
 0x3e5   : > { %4270 = vrsqrt.f32 %v3279_v14  ;;  %v3217_v56 = vmax.f32 %v3185_v48, 0.0 }
 0x3e6   : > { %3449 = vst [vmem:[%s5739_s30 + $0xd8] sm:$0xff] %v3417_v58  ;;  %v3377_v35 = vmul.f32 %v5723_v16, %v3339_v38 }
 0x3e7   : > { %v3281_v1 = vadd.f32 1e-05, %v3217_v56 }
 0x3e8   : > { %v3415_v62 = vadd.f32 %v5728_v24, %v3377_v35 }
 0x3e9   : > { %v4267_v34 = vpop.eup %4266  ;;  %4272 = vrsqrt.f32 %v3281_v1 }
 0x3ea   : > { %v3342_v61 = vmul.f32 %v4267_v34, %v3246_v31  ;;  %3447 = vst [vmem:[%s5739_s30 + $0xc8] sm:$0xff] %v3415_v62 }
 0x3ec   : > { %v3380_v19 = vmul.f32 %v5723_v16, %v3342_v61 }
 0x3ed   : > { %v4269_v20 = vpop.eup %4268 }
 0x3ee   : > { %v3418_v3 = vadd.f32 %v5728_v24, %v3380_v19  ;;  %v3344_v26 = vmul.f32 %v4269_v20, %v3248_v6 }
 0x3ef   : > { %v4271_v41 = vpop.eup %4270 }
 0x3f0   : > { %3450 = vst [vmem:[%s5739_s30 + $0xe0] sm:$0xff] %v3418_v3  ;;  %v3382_v45 = vmul.f32 %v5723_v16, %v3344_v26  ;;  %v3343_v47 = vmul.f32 %v4271_v41, %v3247_v46 }
 0x3f2   : > { %v3420_v27 = vadd.f32 %v5728_v24, %v3382_v45  ;;  %v3381_v15 = vmul.f32 %v5723_v16, %v3343_v47 }
 0x3f3   : > { %v4273_v36 = vpop.eup %4272 }
 0x3f4   : > { %3452 = vst [vmem:[%s5739_s30 + $0xf0] sm:$0xff] %v3420_v27  ;;  %v3419_v9 = vadd.f32 %v5728_v24, %v3381_v15  ;;  %v3345_v37 = vmul.f32 %v4273_v36, %v3249_v43 }
 0x3f6   : > { %3451 = vst [vmem:[%s5739_s30 + $0xe8] sm:$0xff] %v3419_v9  ;;  %v3383_v52 = vmul.f32 %v5723_v16, %v3345_v37 }
 0x3f8   : > { %v3421_v51 = vadd.f32 %v5728_v24, %v3383_v52 }
 0x3fa   : > { %3453 = vst [vmem:[%s5739_s30 + $0xf8] sm:$0xff] %v3421_v51 }
 0x3fb PF: > { %s20_s15 = sadd.s32 1, %s4328_s15   ;;  %s6068_s13 = smov %s4324_s14 }
 0x3fc   : > { %p17_p5 = scmp.ge.s32.totalorder %s20_s15, 4   ;;  %s6069_s14 = smov %s6071_s16 }
 0x3fe   :  { %19 = sbr.rel (!%p17_p5) target bundleno = 2 (0x2), region = 105 }

</bundles_post_ra>
